<compile_context>
chip_gen: v7x
topology: tpu7x:2x2x1
jax: 0.10.0
libtpu: 0.0.40
codegen_flags: <defaults>
</compile_context>

<pallas_src>
import functools

import jax
import jax.numpy as jnp
from jax.experimental import pallas as pl
from jax.experimental.pallas import tpu as pltpu

LANE = 128     # lane width: every gate / output block is padded to this.
SUBLANE = 8    # sublane tile: batch (and layer-0 feature rows) padded to this.


def _round_up(x, m):
    return ((x + m - 1) // m) * m


# ----------------------------------------------------------------------------
# Fused kernel: num_layers GRU layers (wavefront-skewed) + Linear head.
# ----------------------------------------------------------------------------
def fused_gru_fc_kernel(*refs, num_layers, bp, seq_len, hp):
    """Ref layout:
         refs[0]               x      (T*Bp, Dp)    time-major, batch-padded, bf16
         refs[1 + 4*l + 0]     w_ih_l (in_l, 3*Hp)  bf16, gate blocks [r | z | n]
         refs[1 + 4*l + 1]     w_hh_l (Hp, 3*Hp)    bf16
         refs[1 + 4*l + 2]     b_gi_l (1, 3*Hp)     f32  = b_ih (+ b_hh for r,z)
         refs[1 + 4*l + 3]     b_hn_l (1, Hp)       f32  = b_hh of the n gate
         refs[1 + 4*L + 0]     w_fc   (Hp, Op)      bf16
         refs[1 + 4*L + 1]     b_fc   (1, Op)       f32
         refs[1 + 4*L + 2]     out    (Bp, Op)      f32
    """
    Bp, T, Hp = bp, seq_len, hp
    x_ref = refs[0]
    w_fc_ref = refs[1 + 4 * num_layers]
    b_fc_ref = refs[2 + 4 * num_layers]
    out_ref = refs[3 + 4 * num_layers]

    w_ih_refs = [refs[1 + 4 * l] for l in range(num_layers)]
    w_hh_refs = [refs[2 + 4 * l] for l in range(num_layers)]

    # Hoist all bias broadcasts out of the unrolled time loop.
    b_gi_b = [None] + [
        jnp.broadcast_to(refs[3 + 4 * l][...], (Bp, 3 * Hp))
        for l in range(1, num_layers)
    ]
    b_hn_b = [
        jnp.broadcast_to(refs[4 + 4 * l][...], (Bp, Hp))
        for l in range(num_layers)
    ]

    # Hoisted layer-0 input projection: ONE MXU matmul for the whole sequence;
    # only the truly sequential h @ W_hh work stays inside the time loop.
    gi0 = (jnp.dot(x_ref[...], w_ih_refs[0][...],
                   preferred_element_type=jnp.float32)
           + refs[3][...])                                    # (T*Bp, 3*Hp) f32

    def gru_cell(l, h, gi_t):
        gh = jnp.dot(h.astype(jnp.bfloat16), w_hh_refs[l][...],
                     preferred_element_type=jnp.float32)      # (Bp, 3*Hp) f32
        # Gate slices are whole 128-lane blocks (no masked sub-lane picks).
        r = jax.nn.sigmoid(gi_t[:, 0:Hp] + gh[:, 0:Hp])
        z = jax.nn.sigmoid(gi_t[:, Hp:2 * Hp] + gh[:, Hp:2 * Hp])
        n = jnp.tanh(gi_t[:, 2 * Hp:3 * Hp]
                     + r * (gh[:, 2 * Hp:3 * Hp] + b_hn_b[l]))
        return n + z * (h - n)                                # == (1-z)*n + z*h

    # Wavefront schedule: superstep s runs layer l at timestep t = s - l, so
    # layer l's step t reads layer l-1's step-t output (produced at superstep
    # s-1) straight from vregs -- no inter-layer VMEM round trip, and the two
    # recurrences overlap instead of running back-to-back.
    h = [jnp.zeros((Bp, Hp), jnp.float32) for _ in range(num_layers)]
    for s in range(T + num_layers - 1):
        prev = list(h)                 # snapshot of states after superstep s-1
        for l in range(num_layers):
            t = s - l
            if 0 <= t < T:
                if l == 0:
                    gi_t = gi0[t * Bp:(t + 1) * Bp, :]        # static 8-row slice
                else:
                    gi_t = (jnp.dot(prev[l - 1].astype(jnp.bfloat16),
                                    w_ih_refs[l][...],
                                    preferred_element_type=jnp.float32)
                            + b_gi_b[l])
                h[l] = gru_cell(l, h[l], gi_t)

    # Linear head on h_T of the last layer only (torch: fc(out[:, -1, :])).
    out_ref[...] = (jnp.dot(h[-1].astype(jnp.bfloat16), w_fc_ref[...],
                            preferred_element_type=jnp.float32)
                    + b_fc_ref[...])


# ----------------------------------------------------------------------------
# Wrapper
# ----------------------------------------------------------------------------
def fused_gru_fc(x, layer_params, fc_w, fc_b, *, hp, op):
    """x: (B, T, D) batch-first (torch batch_first=True).
    layer_params: list of (w_ih_pad_bf16, w_hh_pad_bf16, b_gi_pad, b_hn_pad).
    fc_w: (Hp, Op) bf16 zero-padded, fc_b: (1, Op) f32 zero-padded.
    Returns the padded (Bp, Op) output; caller slices [:B, :O]."""
    B, T, D = x.shape
    Bp = _round_up(max(B, SUBLANE), SUBLANE)
    Dp = layer_params[0][0].shape[0]          # padded layer-0 input feature dim

    # Tiny host-side reorder: time-major, batch- and feature-padded (zeros in
    # padded rows/cols so they never leak), cast to bf16 for the MXU.
    x_tm = jnp.zeros((T, Bp, Dp), jnp.float32)
    x_tm = x_tm.at[:, :B, :D].set(jnp.transpose(x.astype(jnp.float32), (1, 0, 2)))
    x_tm = x_tm.reshape(T * Bp, Dp).astype(jnp.bfloat16)

    flat_params = []
    for p in layer_params:
        flat_params.extend(p)
    n_inputs = 1 + len(flat_params) + 2

    kernel = functools.partial(
        fused_gru_fc_kernel,
        num_layers=len(layer_params), bp=Bp, seq_len=T, hp=hp)

    return pl.pallas_call(
        kernel,
        out_shape=jax.ShapeDtypeStruct((Bp, op), jnp.float32),
        in_specs=[pl.BlockSpec(memory_space=pltpu.MemorySpace.VMEM)] * n_inputs,
        out_specs=pl.BlockSpec(memory_space=pltpu.MemorySpace.VMEM),
    )(x_tm, *flat_params, fc_w, fc_b)


# ----------------------------------------------------------------------------
# Model: deterministic parameter init (torch shapes / init ranges), with gate
# padding, batch/feature padding, bias folding and bf16 casting done once.
# ----------------------------------------------------------------------------
class GRUModelPallas:
    def __init__(self, input_size, hidden_size, num_layers, output_size, key):
        H = hidden_size
        Hp = _round_up(H, LANE)
        Op = _round_up(output_size, LANE)
        self.hidden_size = H
        self.num_layers = num_layers
        self.output_size = output_size
        self.Hp = Hp
        self.Op = Op
        k = 1.0 / float(H) ** 0.5

        def pad_gate_cols(w):        # (rows, 3H) -> (rows, 3Hp), zero padding
            rows = w.shape[0]
            out = jnp.zeros((rows, 3 * Hp), jnp.float32)
            for g in range(3):
                out = out.at[:, g * Hp:g * Hp + H].set(w[:, g * H:(g + 1) * H])
            return out

        def pad_rows(w, rp):         # (r, cols) -> (rp, cols), zero padding
            return jnp.zeros((rp, w.shape[1]), jnp.float32).at[:w.shape[0], :].set(w)

        self.layer_params = []
        for layer in range(num_layers):
            in_sz = input_size if layer == 0 else H
            in_pad = _round_up(max(input_size, SUBLANE), SUBLANE) if layer == 0 else Hp
            key, k1, k2, k3, k4 = jax.random.split(key, 5)
            # torch stores weight_ih: (3H, in), weight_hh: (3H, H); kept
            # pre-transposed so in-kernel matmuls are lane-dense on 3*Hp.
            w_ih = jax.random.uniform(k1, (in_sz, 3 * H), jnp.float32, -k, k)
            w_hh = jax.random.uniform(k2, (H, 3 * H), jnp.float32, -k, k)
            b_ih = jax.random.uniform(k3, (3 * H,), jnp.float32, -k, k)
            b_hh = jax.random.uniform(k4, (3 * H,), jnp.float32, -k, k)

            w_ih_p = pad_rows(pad_gate_cols(w_ih), in_pad).astype(jnp.bfloat16)
            w_hh_p = pad_rows(pad_gate_cols(w_hh), Hp).astype(jnp.bfloat16)

            # Fold biases: gi bias = b_ih (all gates) + b_hh (r,z gates only);
            # the n-gate b_hh must stay inside r * (W_hn h + b_hn).
            b_gi = b_ih.at[0:2 * H].add(b_hh[0:2 * H])
            b_gi_p = pad_gate_cols(b_gi.reshape(1, 3 * H))                 # f32
            b_hn_p = jnp.zeros((1, Hp), jnp.float32).at[0, :H].set(b_hh[2 * H:])

            self.layer_params.append((w_ih_p, w_hh_p, b_gi_p, b_hn_p))

        key, k1, k2 = jax.random.split(key, 3)
        fc_w = jax.random.uniform(k1, (H, output_size), jnp.float32, -k, k)
        fc_b = jax.random.uniform(k2, (output_size,), jnp.float32, -k, k)
        fc_w_p = jnp.zeros((Hp, Op), jnp.float32).at[:H, :output_size].set(fc_w)
        self.fc_w = fc_w_p.astype(jnp.bfloat16)                # (Hp, Op) bf16
        self.fc_b = jnp.zeros((1, Op), jnp.float32).at[0, :output_size].set(fc_b)

    def __call__(self, x):
        # x: (B, T, input_size) -> (B, output_size)
        B = x.shape[0]
        out_padded = fused_gru_fc(x, self.layer_params, self.fc_w, self.fc_b,
                                  hp=self.Hp, op=self.Op)
        return out_padded[:B, :self.output_size]


# ----------------------------------------------------------------------------
if __name__ == "__main__":
    input_size = 4       # e.g. OHLC features
    hidden_size = 32
    num_layers = 2
    output_size = 1
    batch = 2
    seq_len = 8

    root = jax.random.PRNGKey(0)
    k_param, k_x = jax.random.split(root)

    model = GRUModelPallas(input_size, hidden_size, num_layers, output_size,
                           key=k_param)
    x = jax.random.normal(k_x, (batch, seq_len, input_size), jnp.float32)

    out = model(x)
    jax.block_until_ready(out)
    assert out.shape == (batch, output_size)
    assert bool(jnp.all(jnp.isfinite(out)))
    print("KERNEL_OK")
</pallas_src>

<mosaic_0001>
module attributes {stable_mosaic.version = 11 : i64} {
  func.func @fused_gru_fc_kernel(%arg0: memref<64x8xbf16, #tpu.memory_space<vmem>>, %arg1: memref<8x384xbf16, #tpu.memory_space<vmem>>, %arg2: memref<128x384xbf16, #tpu.memory_space<vmem>>, %arg3: memref<1x384xf32, #tpu.memory_space<vmem>>, %arg4: memref<1x128xf32, #tpu.memory_space<vmem>>, %arg5: memref<128x384xbf16, #tpu.memory_space<vmem>>, %arg6: memref<128x384xbf16, #tpu.memory_space<vmem>>, %arg7: memref<1x384xf32, #tpu.memory_space<vmem>>, %arg8: memref<1x128xf32, #tpu.memory_space<vmem>>, %arg9: memref<128x128xbf16, #tpu.memory_space<vmem>>, %arg10: memref<1x128xf32, #tpu.memory_space<vmem>>, %arg11: memref<8x128xf32, #tpu.memory_space<vmem>>) attributes {dimension_semantics = [], scalar_prefetch = 0 : i64, scratch_operands = 0 : i64, tpu.core_type = #tpu.core_type<tc>} {
    %c0 = arith.constant 0 : index
    %c0_0 = arith.constant 0 : index
    %0 = vector.load %arg7[%c0, %c0_0] : memref<1x384xf32, #tpu.memory_space<vmem>>, vector<1x384xf32>
    %1 = vector.shape_cast %0 : vector<1x384xf32> to vector<1x384xf32>
    %2 = vector.broadcast %1 : vector<1x384xf32> to vector<8x384xf32>
    %c0_1 = arith.constant 0 : index
    %c0_2 = arith.constant 0 : index
    %3 = vector.load %arg4[%c0_1, %c0_2] : memref<1x128xf32, #tpu.memory_space<vmem>>, vector<1x128xf32>
    %4 = vector.shape_cast %3 : vector<1x128xf32> to vector<1x128xf32>
    %5 = vector.broadcast %4 : vector<1x128xf32> to vector<8x128xf32>
    %c0_3 = arith.constant 0 : index
    %c0_4 = arith.constant 0 : index
    %6 = vector.load %arg8[%c0_3, %c0_4] : memref<1x128xf32, #tpu.memory_space<vmem>>, vector<1x128xf32>
    %7 = vector.shape_cast %6 : vector<1x128xf32> to vector<1x128xf32>
    %8 = vector.broadcast %7 : vector<1x128xf32> to vector<8x128xf32>
    %c0_5 = arith.constant 0 : index
    %c0_6 = arith.constant 0 : index
    %9 = vector.load %arg0[%c0_5, %c0_6] : memref<64x8xbf16, #tpu.memory_space<vmem>>, vector<64x8xbf16>
    %c0_7 = arith.constant 0 : index
    %c0_8 = arith.constant 0 : index
    %10 = vector.load %arg1[%c0_7, %c0_8] : memref<8x384xbf16, #tpu.memory_space<vmem>>, vector<8x384xbf16>
    %cst = arith.constant dense<0.000000e+00> : vector<64x384xf32>
    %11 = tpu.matmul %9, %10, %cst {dimension_numbers = #tpu.dot_dimension_numbers<[1], [0], [0], [1], [0, 0, 1, 1], [], []>} : vector<64x8xbf16>, vector<8x384xbf16>, vector<64x384xf32> -> vector<64x384xf32>
    %c0_9 = arith.constant 0 : index
    %c0_10 = arith.constant 0 : index
    %12 = vector.load %arg3[%c0_9, %c0_10] : memref<1x384xf32, #tpu.memory_space<vmem>>, vector<1x384xf32>
    %13 = vector.broadcast %12 : vector<1x384xf32> to vector<64x384xf32>
    %14 = arith.addf %11, %13 : vector<64x384xf32>
    %cst_11 = arith.constant 0.000000e+00 : f32
    %15 = vector.broadcast %cst_11 : f32 to vector<8x128xf32>
    %cst_12 = arith.constant 0.000000e+00 : f32
    %16 = vector.broadcast %cst_12 : f32 to vector<8x128xf32>
    %17 = vector.extract_strided_slice %14 {offsets = [0, 0], sizes = [8, 384], strides = [1, 1]} : vector<64x384xf32> to vector<8x384xf32>
    %18 = arith.truncf %15 : vector<8x128xf32> to vector<8x128xbf16>
    %c0_13 = arith.constant 0 : index
    %c0_14 = arith.constant 0 : index
    %19 = vector.load %arg2[%c0_13, %c0_14] : memref<128x384xbf16, #tpu.memory_space<vmem>>, vector<128x384xbf16>
    %cst_15 = arith.constant dense<0.000000e+00> : vector<8x384xf32>
    %20 = tpu.matmul %18, %19, %cst_15 {dimension_numbers = #tpu.dot_dimension_numbers<[1], [0], [0], [1], [0, 0, 1, 1], [], []>} : vector<8x128xbf16>, vector<128x384xbf16>, vector<8x384xf32> -> vector<8x384xf32>
    %21 = vector.extract_strided_slice %17 {offsets = [0, 0], sizes = [8, 128], strides = [1, 1]} : vector<8x384xf32> to vector<8x128xf32>
    %22 = vector.extract_strided_slice %20 {offsets = [0, 0], sizes = [8, 128], strides = [1, 1]} : vector<8x384xf32> to vector<8x128xf32>
    %23 = arith.addf %21, %22 : vector<8x128xf32>
    %24 = arith.negf %23 : vector<8x128xf32>
    %25 = math.exp %24 : vector<8x128xf32>
    %cst_16 = arith.constant 1.000000e+00 : f32
    %26 = vector.broadcast %cst_16 : f32 to vector<8x128xf32>
    %27 = arith.addf %26, %25 : vector<8x128xf32>
    %28 = arith.divf %26, %27 : vector<8x128xf32>
    %29 = vector.extract_strided_slice %17 {offsets = [0, 128], sizes = [8, 128], strides = [1, 1]} : vector<8x384xf32> to vector<8x128xf32>
    %30 = vector.extract_strided_slice %20 {offsets = [0, 128], sizes = [8, 128], strides = [1, 1]} : vector<8x384xf32> to vector<8x128xf32>
    %31 = arith.addf %29, %30 : vector<8x128xf32>
    %32 = arith.negf %31 : vector<8x128xf32>
    %33 = math.exp %32 : vector<8x128xf32>
    %cst_17 = arith.constant 1.000000e+00 : f32
    %34 = vector.broadcast %cst_17 : f32 to vector<8x128xf32>
    %35 = arith.addf %34, %33 : vector<8x128xf32>
    %36 = arith.divf %34, %35 : vector<8x128xf32>
    %37 = vector.extract_strided_slice %17 {offsets = [0, 256], sizes = [8, 128], strides = [1, 1]} : vector<8x384xf32> to vector<8x128xf32>
    %38 = vector.extract_strided_slice %20 {offsets = [0, 256], sizes = [8, 128], strides = [1, 1]} : vector<8x384xf32> to vector<8x128xf32>
    %39 = arith.addf %38, %5 : vector<8x128xf32>
    %40 = arith.mulf %28, %39 : vector<8x128xf32>
    %41 = arith.addf %37, %40 : vector<8x128xf32>
    %42 = math.tanh %41 : vector<8x128xf32>
    %43 = arith.subf %15, %42 : vector<8x128xf32>
    %44 = arith.mulf %36, %43 : vector<8x128xf32>
    %45 = arith.addf %42, %44 : vector<8x128xf32>
    %46 = vector.extract_strided_slice %14 {offsets = [8, 0], sizes = [8, 384], strides = [1, 1]} : vector<64x384xf32> to vector<8x384xf32>
    %47 = arith.truncf %45 : vector<8x128xf32> to vector<8x128xbf16>
    %c0_18 = arith.constant 0 : index
    %c0_19 = arith.constant 0 : index
    %48 = vector.load %arg2[%c0_18, %c0_19] : memref<128x384xbf16, #tpu.memory_space<vmem>>, vector<128x384xbf16>
    %cst_20 = arith.constant dense<0.000000e+00> : vector<8x384xf32>
    %49 = tpu.matmul %47, %48, %cst_20 {dimension_numbers = #tpu.dot_dimension_numbers<[1], [0], [0], [1], [0, 0, 1, 1], [], []>} : vector<8x128xbf16>, vector<128x384xbf16>, vector<8x384xf32> -> vector<8x384xf32>
    %50 = vector.extract_strided_slice %46 {offsets = [0, 0], sizes = [8, 128], strides = [1, 1]} : vector<8x384xf32> to vector<8x128xf32>
    %51 = vector.extract_strided_slice %49 {offsets = [0, 0], sizes = [8, 128], strides = [1, 1]} : vector<8x384xf32> to vector<8x128xf32>
    %52 = arith.addf %50, %51 : vector<8x128xf32>
    %53 = arith.negf %52 : vector<8x128xf32>
    %54 = math.exp %53 : vector<8x128xf32>
    %cst_21 = arith.constant 1.000000e+00 : f32
    %55 = vector.broadcast %cst_21 : f32 to vector<8x128xf32>
    %56 = arith.addf %55, %54 : vector<8x128xf32>
    %57 = arith.divf %55, %56 : vector<8x128xf32>
    %58 = vector.extract_strided_slice %46 {offsets = [0, 128], sizes = [8, 128], strides = [1, 1]} : vector<8x384xf32> to vector<8x128xf32>
    %59 = vector.extract_strided_slice %49 {offsets = [0, 128], sizes = [8, 128], strides = [1, 1]} : vector<8x384xf32> to vector<8x128xf32>
    %60 = arith.addf %58, %59 : vector<8x128xf32>
    %61 = arith.negf %60 : vector<8x128xf32>
    %62 = math.exp %61 : vector<8x128xf32>
    %cst_22 = arith.constant 1.000000e+00 : f32
    %63 = vector.broadcast %cst_22 : f32 to vector<8x128xf32>
    %64 = arith.addf %63, %62 : vector<8x128xf32>
    %65 = arith.divf %63, %64 : vector<8x128xf32>
    %66 = vector.extract_strided_slice %46 {offsets = [0, 256], sizes = [8, 128], strides = [1, 1]} : vector<8x384xf32> to vector<8x128xf32>
    %67 = vector.extract_strided_slice %49 {offsets = [0, 256], sizes = [8, 128], strides = [1, 1]} : vector<8x384xf32> to vector<8x128xf32>
    %68 = arith.addf %67, %5 : vector<8x128xf32>
    %69 = arith.mulf %57, %68 : vector<8x128xf32>
    %70 = arith.addf %66, %69 : vector<8x128xf32>
    %71 = math.tanh %70 : vector<8x128xf32>
    %72 = arith.subf %45, %71 : vector<8x128xf32>
    %73 = arith.mulf %65, %72 : vector<8x128xf32>
    %74 = arith.addf %71, %73 : vector<8x128xf32>
    %75 = arith.truncf %45 : vector<8x128xf32> to vector<8x128xbf16>
    %c0_23 = arith.constant 0 : index
    %c0_24 = arith.constant 0 : index
    %76 = vector.load %arg5[%c0_23, %c0_24] : memref<128x384xbf16, #tpu.memory_space<vmem>>, vector<128x384xbf16>
    %cst_25 = arith.constant dense<0.000000e+00> : vector<8x384xf32>
    %77 = tpu.matmul %75, %76, %cst_25 {dimension_numbers = #tpu.dot_dimension_numbers<[1], [0], [0], [1], [0, 0, 1, 1], [], []>} : vector<8x128xbf16>, vector<128x384xbf16>, vector<8x384xf32> -> vector<8x384xf32>
    %78 = arith.addf %77, %2 : vector<8x384xf32>
    %79 = arith.truncf %16 : vector<8x128xf32> to vector<8x128xbf16>
    %c0_26 = arith.constant 0 : index
    %c0_27 = arith.constant 0 : index
    %80 = vector.load %arg6[%c0_26, %c0_27] : memref<128x384xbf16, #tpu.memory_space<vmem>>, vector<128x384xbf16>
    %cst_28 = arith.constant dense<0.000000e+00> : vector<8x384xf32>
    %81 = tpu.matmul %79, %80, %cst_28 {dimension_numbers = #tpu.dot_dimension_numbers<[1], [0], [0], [1], [0, 0, 1, 1], [], []>} : vector<8x128xbf16>, vector<128x384xbf16>, vector<8x384xf32> -> vector<8x384xf32>
    %82 = vector.extract_strided_slice %78 {offsets = [0, 0], sizes = [8, 128], strides = [1, 1]} : vector<8x384xf32> to vector<8x128xf32>
    %83 = vector.extract_strided_slice %81 {offsets = [0, 0], sizes = [8, 128], strides = [1, 1]} : vector<8x384xf32> to vector<8x128xf32>
    %84 = arith.addf %82, %83 : vector<8x128xf32>
    %85 = arith.negf %84 : vector<8x128xf32>
    %86 = math.exp %85 : vector<8x128xf32>
    %cst_29 = arith.constant 1.000000e+00 : f32
    %87 = vector.broadcast %cst_29 : f32 to vector<8x128xf32>
    %88 = arith.addf %87, %86 : vector<8x128xf32>
    %89 = arith.divf %87, %88 : vector<8x128xf32>
    %90 = vector.extract_strided_slice %78 {offsets = [0, 128], sizes = [8, 128], strides = [1, 1]} : vector<8x384xf32> to vector<8x128xf32>
    %91 = vector.extract_strided_slice %81 {offsets = [0, 128], sizes = [8, 128], strides = [1, 1]} : vector<8x384xf32> to vector<8x128xf32>
    %92 = arith.addf %90, %91 : vector<8x128xf32>
    %93 = arith.negf %92 : vector<8x128xf32>
    %94 = math.exp %93 : vector<8x128xf32>
    %cst_30 = arith.constant 1.000000e+00 : f32
    %95 = vector.broadcast %cst_30 : f32 to vector<8x128xf32>
    %96 = arith.addf %95, %94 : vector<8x128xf32>
    %97 = arith.divf %95, %96 : vector<8x128xf32>
    %98 = vector.extract_strided_slice %78 {offsets = [0, 256], sizes = [8, 128], strides = [1, 1]} : vector<8x384xf32> to vector<8x128xf32>
    %99 = vector.extract_strided_slice %81 {offsets = [0, 256], sizes = [8, 128], strides = [1, 1]} : vector<8x384xf32> to vector<8x128xf32>
    %100 = arith.addf %99, %8 : vector<8x128xf32>
    %101 = arith.mulf %89, %100 : vector<8x128xf32>
    %102 = arith.addf %98, %101 : vector<8x128xf32>
    %103 = math.tanh %102 : vector<8x128xf32>
    %104 = arith.subf %16, %103 : vector<8x128xf32>
    %105 = arith.mulf %97, %104 : vector<8x128xf32>
    %106 = arith.addf %103, %105 : vector<8x128xf32>
    %107 = vector.extract_strided_slice %14 {offsets = [16, 0], sizes = [8, 384], strides = [1, 1]} : vector<64x384xf32> to vector<8x384xf32>
    %108 = arith.truncf %74 : vector<8x128xf32> to vector<8x128xbf16>
    %c0_31 = arith.constant 0 : index
    %c0_32 = arith.constant 0 : index
    %109 = vector.load %arg2[%c0_31, %c0_32] : memref<128x384xbf16, #tpu.memory_space<vmem>>, vector<128x384xbf16>
    %cst_33 = arith.constant dense<0.000000e+00> : vector<8x384xf32>
    %110 = tpu.matmul %108, %109, %cst_33 {dimension_numbers = #tpu.dot_dimension_numbers<[1], [0], [0], [1], [0, 0, 1, 1], [], []>} : vector<8x128xbf16>, vector<128x384xbf16>, vector<8x384xf32> -> vector<8x384xf32>
    %111 = vector.extract_strided_slice %107 {offsets = [0, 0], sizes = [8, 128], strides = [1, 1]} : vector<8x384xf32> to vector<8x128xf32>
    %112 = vector.extract_strided_slice %110 {offsets = [0, 0], sizes = [8, 128], strides = [1, 1]} : vector<8x384xf32> to vector<8x128xf32>
    %113 = arith.addf %111, %112 : vector<8x128xf32>
    %114 = arith.negf %113 : vector<8x128xf32>
    %115 = math.exp %114 : vector<8x128xf32>
    %cst_34 = arith.constant 1.000000e+00 : f32
    %116 = vector.broadcast %cst_34 : f32 to vector<8x128xf32>
    %117 = arith.addf %116, %115 : vector<8x128xf32>
    %118 = arith.divf %116, %117 : vector<8x128xf32>
    %119 = vector.extract_strided_slice %107 {offsets = [0, 128], sizes = [8, 128], strides = [1, 1]} : vector<8x384xf32> to vector<8x128xf32>
    %120 = vector.extract_strided_slice %110 {offsets = [0, 128], sizes = [8, 128], strides = [1, 1]} : vector<8x384xf32> to vector<8x128xf32>
    %121 = arith.addf %119, %120 : vector<8x128xf32>
    %122 = arith.negf %121 : vector<8x128xf32>
    %123 = math.exp %122 : vector<8x128xf32>
    %cst_35 = arith.constant 1.000000e+00 : f32
    %124 = vector.broadcast %cst_35 : f32 to vector<8x128xf32>
    %125 = arith.addf %124, %123 : vector<8x128xf32>
    %126 = arith.divf %124, %125 : vector<8x128xf32>
    %127 = vector.extract_strided_slice %107 {offsets = [0, 256], sizes = [8, 128], strides = [1, 1]} : vector<8x384xf32> to vector<8x128xf32>
    %128 = vector.extract_strided_slice %110 {offsets = [0, 256], sizes = [8, 128], strides = [1, 1]} : vector<8x384xf32> to vector<8x128xf32>
    %129 = arith.addf %128, %5 : vector<8x128xf32>
    %130 = arith.mulf %118, %129 : vector<8x128xf32>
    %131 = arith.addf %127, %130 : vector<8x128xf32>
    %132 = math.tanh %131 : vector<8x128xf32>
    %133 = arith.subf %74, %132 : vector<8x128xf32>
    %134 = arith.mulf %126, %133 : vector<8x128xf32>
    %135 = arith.addf %132, %134 : vector<8x128xf32>
    %136 = arith.truncf %74 : vector<8x128xf32> to vector<8x128xbf16>
    %c0_36 = arith.constant 0 : index
    %c0_37 = arith.constant 0 : index
    %137 = vector.load %arg5[%c0_36, %c0_37] : memref<128x384xbf16, #tpu.memory_space<vmem>>, vector<128x384xbf16>
    %cst_38 = arith.constant dense<0.000000e+00> : vector<8x384xf32>
    %138 = tpu.matmul %136, %137, %cst_38 {dimension_numbers = #tpu.dot_dimension_numbers<[1], [0], [0], [1], [0, 0, 1, 1], [], []>} : vector<8x128xbf16>, vector<128x384xbf16>, vector<8x384xf32> -> vector<8x384xf32>
    %139 = arith.addf %138, %2 : vector<8x384xf32>
    %140 = arith.truncf %106 : vector<8x128xf32> to vector<8x128xbf16>
    %c0_39 = arith.constant 0 : index
    %c0_40 = arith.constant 0 : index
    %141 = vector.load %arg6[%c0_39, %c0_40] : memref<128x384xbf16, #tpu.memory_space<vmem>>, vector<128x384xbf16>
    %cst_41 = arith.constant dense<0.000000e+00> : vector<8x384xf32>
    %142 = tpu.matmul %140, %141, %cst_41 {dimension_numbers = #tpu.dot_dimension_numbers<[1], [0], [0], [1], [0, 0, 1, 1], [], []>} : vector<8x128xbf16>, vector<128x384xbf16>, vector<8x384xf32> -> vector<8x384xf32>
    %143 = vector.extract_strided_slice %139 {offsets = [0, 0], sizes = [8, 128], strides = [1, 1]} : vector<8x384xf32> to vector<8x128xf32>
    %144 = vector.extract_strided_slice %142 {offsets = [0, 0], sizes = [8, 128], strides = [1, 1]} : vector<8x384xf32> to vector<8x128xf32>
    %145 = arith.addf %143, %144 : vector<8x128xf32>
    %146 = arith.negf %145 : vector<8x128xf32>
    %147 = math.exp %146 : vector<8x128xf32>
    %cst_42 = arith.constant 1.000000e+00 : f32
    %148 = vector.broadcast %cst_42 : f32 to vector<8x128xf32>
    %149 = arith.addf %148, %147 : vector<8x128xf32>
    %150 = arith.divf %148, %149 : vector<8x128xf32>
    %151 = vector.extract_strided_slice %139 {offsets = [0, 128], sizes = [8, 128], strides = [1, 1]} : vector<8x384xf32> to vector<8x128xf32>
    %152 = vector.extract_strided_slice %142 {offsets = [0, 128], sizes = [8, 128], strides = [1, 1]} : vector<8x384xf32> to vector<8x128xf32>
    %153 = arith.addf %151, %152 : vector<8x128xf32>
    %154 = arith.negf %153 : vector<8x128xf32>
    %155 = math.exp %154 : vector<8x128xf32>
    %cst_43 = arith.constant 1.000000e+00 : f32
    %156 = vector.broadcast %cst_43 : f32 to vector<8x128xf32>
    %157 = arith.addf %156, %155 : vector<8x128xf32>
    %158 = arith.divf %156, %157 : vector<8x128xf32>
    %159 = vector.extract_strided_slice %139 {offsets = [0, 256], sizes = [8, 128], strides = [1, 1]} : vector<8x384xf32> to vector<8x128xf32>
    %160 = vector.extract_strided_slice %142 {offsets = [0, 256], sizes = [8, 128], strides = [1, 1]} : vector<8x384xf32> to vector<8x128xf32>
    %161 = arith.addf %160, %8 : vector<8x128xf32>
    %162 = arith.mulf %150, %161 : vector<8x128xf32>
    %163 = arith.addf %159, %162 : vector<8x128xf32>
    %164 = math.tanh %163 : vector<8x128xf32>
    %165 = arith.subf %106, %164 : vector<8x128xf32>
    %166 = arith.mulf %158, %165 : vector<8x128xf32>
    %167 = arith.addf %164, %166 : vector<8x128xf32>
    %168 = vector.extract_strided_slice %14 {offsets = [24, 0], sizes = [8, 384], strides = [1, 1]} : vector<64x384xf32> to vector<8x384xf32>
    %169 = arith.truncf %135 : vector<8x128xf32> to vector<8x128xbf16>
    %c0_44 = arith.constant 0 : index
    %c0_45 = arith.constant 0 : index
    %170 = vector.load %arg2[%c0_44, %c0_45] : memref<128x384xbf16, #tpu.memory_space<vmem>>, vector<128x384xbf16>
    %cst_46 = arith.constant dense<0.000000e+00> : vector<8x384xf32>
    %171 = tpu.matmul %169, %170, %cst_46 {dimension_numbers = #tpu.dot_dimension_numbers<[1], [0], [0], [1], [0, 0, 1, 1], [], []>} : vector<8x128xbf16>, vector<128x384xbf16>, vector<8x384xf32> -> vector<8x384xf32>
    %172 = vector.extract_strided_slice %168 {offsets = [0, 0], sizes = [8, 128], strides = [1, 1]} : vector<8x384xf32> to vector<8x128xf32>
    %173 = vector.extract_strided_slice %171 {offsets = [0, 0], sizes = [8, 128], strides = [1, 1]} : vector<8x384xf32> to vector<8x128xf32>
    %174 = arith.addf %172, %173 : vector<8x128xf32>
    %175 = arith.negf %174 : vector<8x128xf32>
    %176 = math.exp %175 : vector<8x128xf32>
    %cst_47 = arith.constant 1.000000e+00 : f32
    %177 = vector.broadcast %cst_47 : f32 to vector<8x128xf32>
    %178 = arith.addf %177, %176 : vector<8x128xf32>
    %179 = arith.divf %177, %178 : vector<8x128xf32>
    %180 = vector.extract_strided_slice %168 {offsets = [0, 128], sizes = [8, 128], strides = [1, 1]} : vector<8x384xf32> to vector<8x128xf32>
    %181 = vector.extract_strided_slice %171 {offsets = [0, 128], sizes = [8, 128], strides = [1, 1]} : vector<8x384xf32> to vector<8x128xf32>
    %182 = arith.addf %180, %181 : vector<8x128xf32>
    %183 = arith.negf %182 : vector<8x128xf32>
    %184 = math.exp %183 : vector<8x128xf32>
    %cst_48 = arith.constant 1.000000e+00 : f32
    %185 = vector.broadcast %cst_48 : f32 to vector<8x128xf32>
    %186 = arith.addf %185, %184 : vector<8x128xf32>
    %187 = arith.divf %185, %186 : vector<8x128xf32>
    %188 = vector.extract_strided_slice %168 {offsets = [0, 256], sizes = [8, 128], strides = [1, 1]} : vector<8x384xf32> to vector<8x128xf32>
    %189 = vector.extract_strided_slice %171 {offsets = [0, 256], sizes = [8, 128], strides = [1, 1]} : vector<8x384xf32> to vector<8x128xf32>
    %190 = arith.addf %189, %5 : vector<8x128xf32>
    %191 = arith.mulf %179, %190 : vector<8x128xf32>
    %192 = arith.addf %188, %191 : vector<8x128xf32>
    %193 = math.tanh %192 : vector<8x128xf32>
    %194 = arith.subf %135, %193 : vector<8x128xf32>
    %195 = arith.mulf %187, %194 : vector<8x128xf32>
    %196 = arith.addf %193, %195 : vector<8x128xf32>
    %197 = arith.truncf %135 : vector<8x128xf32> to vector<8x128xbf16>
    %c0_49 = arith.constant 0 : index
    %c0_50 = arith.constant 0 : index
    %198 = vector.load %arg5[%c0_49, %c0_50] : memref<128x384xbf16, #tpu.memory_space<vmem>>, vector<128x384xbf16>
    %cst_51 = arith.constant dense<0.000000e+00> : vector<8x384xf32>
    %199 = tpu.matmul %197, %198, %cst_51 {dimension_numbers = #tpu.dot_dimension_numbers<[1], [0], [0], [1], [0, 0, 1, 1], [], []>} : vector<8x128xbf16>, vector<128x384xbf16>, vector<8x384xf32> -> vector<8x384xf32>
    %200 = arith.addf %199, %2 : vector<8x384xf32>
    %201 = arith.truncf %167 : vector<8x128xf32> to vector<8x128xbf16>
    %c0_52 = arith.constant 0 : index
    %c0_53 = arith.constant 0 : index
    %202 = vector.load %arg6[%c0_52, %c0_53] : memref<128x384xbf16, #tpu.memory_space<vmem>>, vector<128x384xbf16>
    %cst_54 = arith.constant dense<0.000000e+00> : vector<8x384xf32>
    %203 = tpu.matmul %201, %202, %cst_54 {dimension_numbers = #tpu.dot_dimension_numbers<[1], [0], [0], [1], [0, 0, 1, 1], [], []>} : vector<8x128xbf16>, vector<128x384xbf16>, vector<8x384xf32> -> vector<8x384xf32>
    %204 = vector.extract_strided_slice %200 {offsets = [0, 0], sizes = [8, 128], strides = [1, 1]} : vector<8x384xf32> to vector<8x128xf32>
    %205 = vector.extract_strided_slice %203 {offsets = [0, 0], sizes = [8, 128], strides = [1, 1]} : vector<8x384xf32> to vector<8x128xf32>
    %206 = arith.addf %204, %205 : vector<8x128xf32>
    %207 = arith.negf %206 : vector<8x128xf32>
    %208 = math.exp %207 : vector<8x128xf32>
    %cst_55 = arith.constant 1.000000e+00 : f32
    %209 = vector.broadcast %cst_55 : f32 to vector<8x128xf32>
    %210 = arith.addf %209, %208 : vector<8x128xf32>
    %211 = arith.divf %209, %210 : vector<8x128xf32>
    %212 = vector.extract_strided_slice %200 {offsets = [0, 128], sizes = [8, 128], strides = [1, 1]} : vector<8x384xf32> to vector<8x128xf32>
    %213 = vector.extract_strided_slice %203 {offsets = [0, 128], sizes = [8, 128], strides = [1, 1]} : vector<8x384xf32> to vector<8x128xf32>
    %214 = arith.addf %212, %213 : vector<8x128xf32>
    %215 = arith.negf %214 : vector<8x128xf32>
    %216 = math.exp %215 : vector<8x128xf32>
    %cst_56 = arith.constant 1.000000e+00 : f32
    %217 = vector.broadcast %cst_56 : f32 to vector<8x128xf32>
    %218 = arith.addf %217, %216 : vector<8x128xf32>
    %219 = arith.divf %217, %218 : vector<8x128xf32>
    %220 = vector.extract_strided_slice %200 {offsets = [0, 256], sizes = [8, 128], strides = [1, 1]} : vector<8x384xf32> to vector<8x128xf32>
    %221 = vector.extract_strided_slice %203 {offsets = [0, 256], sizes = [8, 128], strides = [1, 1]} : vector<8x384xf32> to vector<8x128xf32>
    %222 = arith.addf %221, %8 : vector<8x128xf32>
    %223 = arith.mulf %211, %222 : vector<8x128xf32>
    %224 = arith.addf %220, %223 : vector<8x128xf32>
    %225 = math.tanh %224 : vector<8x128xf32>
    %226 = arith.subf %167, %225 : vector<8x128xf32>
    %227 = arith.mulf %219, %226 : vector<8x128xf32>
    %228 = arith.addf %225, %227 : vector<8x128xf32>
    %229 = vector.extract_strided_slice %14 {offsets = [32, 0], sizes = [8, 384], strides = [1, 1]} : vector<64x384xf32> to vector<8x384xf32>
    %230 = arith.truncf %196 : vector<8x128xf32> to vector<8x128xbf16>
    %c0_57 = arith.constant 0 : index
    %c0_58 = arith.constant 0 : index
    %231 = vector.load %arg2[%c0_57, %c0_58] : memref<128x384xbf16, #tpu.memory_space<vmem>>, vector<128x384xbf16>
    %cst_59 = arith.constant dense<0.000000e+00> : vector<8x384xf32>
    %232 = tpu.matmul %230, %231, %cst_59 {dimension_numbers = #tpu.dot_dimension_numbers<[1], [0], [0], [1], [0, 0, 1, 1], [], []>} : vector<8x128xbf16>, vector<128x384xbf16>, vector<8x384xf32> -> vector<8x384xf32>
    %233 = vector.extract_strided_slice %229 {offsets = [0, 0], sizes = [8, 128], strides = [1, 1]} : vector<8x384xf32> to vector<8x128xf32>
    %234 = vector.extract_strided_slice %232 {offsets = [0, 0], sizes = [8, 128], strides = [1, 1]} : vector<8x384xf32> to vector<8x128xf32>
    %235 = arith.addf %233, %234 : vector<8x128xf32>
    %236 = arith.negf %235 : vector<8x128xf32>
    %237 = math.exp %236 : vector<8x128xf32>
    %cst_60 = arith.constant 1.000000e+00 : f32
    %238 = vector.broadcast %cst_60 : f32 to vector<8x128xf32>
    %239 = arith.addf %238, %237 : vector<8x128xf32>
    %240 = arith.divf %238, %239 : vector<8x128xf32>
    %241 = vector.extract_strided_slice %229 {offsets = [0, 128], sizes = [8, 128], strides = [1, 1]} : vector<8x384xf32> to vector<8x128xf32>
    %242 = vector.extract_strided_slice %232 {offsets = [0, 128], sizes = [8, 128], strides = [1, 1]} : vector<8x384xf32> to vector<8x128xf32>
    %243 = arith.addf %241, %242 : vector<8x128xf32>
    %244 = arith.negf %243 : vector<8x128xf32>
    %245 = math.exp %244 : vector<8x128xf32>
    %cst_61 = arith.constant 1.000000e+00 : f32
    %246 = vector.broadcast %cst_61 : f32 to vector<8x128xf32>
    %247 = arith.addf %246, %245 : vector<8x128xf32>
    %248 = arith.divf %246, %247 : vector<8x128xf32>
    %249 = vector.extract_strided_slice %229 {offsets = [0, 256], sizes = [8, 128], strides = [1, 1]} : vector<8x384xf32> to vector<8x128xf32>
    %250 = vector.extract_strided_slice %232 {offsets = [0, 256], sizes = [8, 128], strides = [1, 1]} : vector<8x384xf32> to vector<8x128xf32>
    %251 = arith.addf %250, %5 : vector<8x128xf32>
    %252 = arith.mulf %240, %251 : vector<8x128xf32>
    %253 = arith.addf %249, %252 : vector<8x128xf32>
    %254 = math.tanh %253 : vector<8x128xf32>
    %255 = arith.subf %196, %254 : vector<8x128xf32>
    %256 = arith.mulf %248, %255 : vector<8x128xf32>
    %257 = arith.addf %254, %256 : vector<8x128xf32>
    %258 = arith.truncf %196 : vector<8x128xf32> to vector<8x128xbf16>
    %c0_62 = arith.constant 0 : index
    %c0_63 = arith.constant 0 : index
    %259 = vector.load %arg5[%c0_62, %c0_63] : memref<128x384xbf16, #tpu.memory_space<vmem>>, vector<128x384xbf16>
    %cst_64 = arith.constant dense<0.000000e+00> : vector<8x384xf32>
    %260 = tpu.matmul %258, %259, %cst_64 {dimension_numbers = #tpu.dot_dimension_numbers<[1], [0], [0], [1], [0, 0, 1, 1], [], []>} : vector<8x128xbf16>, vector<128x384xbf16>, vector<8x384xf32> -> vector<8x384xf32>
    %261 = arith.addf %260, %2 : vector<8x384xf32>
    %262 = arith.truncf %228 : vector<8x128xf32> to vector<8x128xbf16>
    %c0_65 = arith.constant 0 : index
    %c0_66 = arith.constant 0 : index
    %263 = vector.load %arg6[%c0_65, %c0_66] : memref<128x384xbf16, #tpu.memory_space<vmem>>, vector<128x384xbf16>
    %cst_67 = arith.constant dense<0.000000e+00> : vector<8x384xf32>
    %264 = tpu.matmul %262, %263, %cst_67 {dimension_numbers = #tpu.dot_dimension_numbers<[1], [0], [0], [1], [0, 0, 1, 1], [], []>} : vector<8x128xbf16>, vector<128x384xbf16>, vector<8x384xf32> -> vector<8x384xf32>
    %265 = vector.extract_strided_slice %261 {offsets = [0, 0], sizes = [8, 128], strides = [1, 1]} : vector<8x384xf32> to vector<8x128xf32>
    %266 = vector.extract_strided_slice %264 {offsets = [0, 0], sizes = [8, 128], strides = [1, 1]} : vector<8x384xf32> to vector<8x128xf32>
    %267 = arith.addf %265, %266 : vector<8x128xf32>
    %268 = arith.negf %267 : vector<8x128xf32>
    %269 = math.exp %268 : vector<8x128xf32>
    %cst_68 = arith.constant 1.000000e+00 : f32
    %270 = vector.broadcast %cst_68 : f32 to vector<8x128xf32>
    %271 = arith.addf %270, %269 : vector<8x128xf32>
    %272 = arith.divf %270, %271 : vector<8x128xf32>
    %273 = vector.extract_strided_slice %261 {offsets = [0, 128], sizes = [8, 128], strides = [1, 1]} : vector<8x384xf32> to vector<8x128xf32>
    %274 = vector.extract_strided_slice %264 {offsets = [0, 128], sizes = [8, 128], strides = [1, 1]} : vector<8x384xf32> to vector<8x128xf32>
    %275 = arith.addf %273, %274 : vector<8x128xf32>
    %276 = arith.negf %275 : vector<8x128xf32>
    %277 = math.exp %276 : vector<8x128xf32>
    %cst_69 = arith.constant 1.000000e+00 : f32
    %278 = vector.broadcast %cst_69 : f32 to vector<8x128xf32>
    %279 = arith.addf %278, %277 : vector<8x128xf32>
    %280 = arith.divf %278, %279 : vector<8x128xf32>
    %281 = vector.extract_strided_slice %261 {offsets = [0, 256], sizes = [8, 128], strides = [1, 1]} : vector<8x384xf32> to vector<8x128xf32>
    %282 = vector.extract_strided_slice %264 {offsets = [0, 256], sizes = [8, 128], strides = [1, 1]} : vector<8x384xf32> to vector<8x128xf32>
    %283 = arith.addf %282, %8 : vector<8x128xf32>
    %284 = arith.mulf %272, %283 : vector<8x128xf32>
    %285 = arith.addf %281, %284 : vector<8x128xf32>
    %286 = math.tanh %285 : vector<8x128xf32>
    %287 = arith.subf %228, %286 : vector<8x128xf32>
    %288 = arith.mulf %280, %287 : vector<8x128xf32>
    %289 = arith.addf %286, %288 : vector<8x128xf32>
    %290 = vector.extract_strided_slice %14 {offsets = [40, 0], sizes = [8, 384], strides = [1, 1]} : vector<64x384xf32> to vector<8x384xf32>
    %291 = arith.truncf %257 : vector<8x128xf32> to vector<8x128xbf16>
    %c0_70 = arith.constant 0 : index
    %c0_71 = arith.constant 0 : index
    %292 = vector.load %arg2[%c0_70, %c0_71] : memref<128x384xbf16, #tpu.memory_space<vmem>>, vector<128x384xbf16>
    %cst_72 = arith.constant dense<0.000000e+00> : vector<8x384xf32>
    %293 = tpu.matmul %291, %292, %cst_72 {dimension_numbers = #tpu.dot_dimension_numbers<[1], [0], [0], [1], [0, 0, 1, 1], [], []>} : vector<8x128xbf16>, vector<128x384xbf16>, vector<8x384xf32> -> vector<8x384xf32>
    %294 = vector.extract_strided_slice %290 {offsets = [0, 0], sizes = [8, 128], strides = [1, 1]} : vector<8x384xf32> to vector<8x128xf32>
    %295 = vector.extract_strided_slice %293 {offsets = [0, 0], sizes = [8, 128], strides = [1, 1]} : vector<8x384xf32> to vector<8x128xf32>
    %296 = arith.addf %294, %295 : vector<8x128xf32>
    %297 = arith.negf %296 : vector<8x128xf32>
    %298 = math.exp %297 : vector<8x128xf32>
    %cst_73 = arith.constant 1.000000e+00 : f32
    %299 = vector.broadcast %cst_73 : f32 to vector<8x128xf32>
    %300 = arith.addf %299, %298 : vector<8x128xf32>
    %301 = arith.divf %299, %300 : vector<8x128xf32>
    %302 = vector.extract_strided_slice %290 {offsets = [0, 128], sizes = [8, 128], strides = [1, 1]} : vector<8x384xf32> to vector<8x128xf32>
    %303 = vector.extract_strided_slice %293 {offsets = [0, 128], sizes = [8, 128], strides = [1, 1]} : vector<8x384xf32> to vector<8x128xf32>
    %304 = arith.addf %302, %303 : vector<8x128xf32>
    %305 = arith.negf %304 : vector<8x128xf32>
    %306 = math.exp %305 : vector<8x128xf32>
    %cst_74 = arith.constant 1.000000e+00 : f32
    %307 = vector.broadcast %cst_74 : f32 to vector<8x128xf32>
    %308 = arith.addf %307, %306 : vector<8x128xf32>
    %309 = arith.divf %307, %308 : vector<8x128xf32>
    %310 = vector.extract_strided_slice %290 {offsets = [0, 256], sizes = [8, 128], strides = [1, 1]} : vector<8x384xf32> to vector<8x128xf32>
    %311 = vector.extract_strided_slice %293 {offsets = [0, 256], sizes = [8, 128], strides = [1, 1]} : vector<8x384xf32> to vector<8x128xf32>
    %312 = arith.addf %311, %5 : vector<8x128xf32>
    %313 = arith.mulf %301, %312 : vector<8x128xf32>
    %314 = arith.addf %310, %313 : vector<8x128xf32>
    %315 = math.tanh %314 : vector<8x128xf32>
    %316 = arith.subf %257, %315 : vector<8x128xf32>
    %317 = arith.mulf %309, %316 : vector<8x128xf32>
    %318 = arith.addf %315, %317 : vector<8x128xf32>
    %319 = arith.truncf %257 : vector<8x128xf32> to vector<8x128xbf16>
    %c0_75 = arith.constant 0 : index
    %c0_76 = arith.constant 0 : index
    %320 = vector.load %arg5[%c0_75, %c0_76] : memref<128x384xbf16, #tpu.memory_space<vmem>>, vector<128x384xbf16>
    %cst_77 = arith.constant dense<0.000000e+00> : vector<8x384xf32>
    %321 = tpu.matmul %319, %320, %cst_77 {dimension_numbers = #tpu.dot_dimension_numbers<[1], [0], [0], [1], [0, 0, 1, 1], [], []>} : vector<8x128xbf16>, vector<128x384xbf16>, vector<8x384xf32> -> vector<8x384xf32>
    %322 = arith.addf %321, %2 : vector<8x384xf32>
    %323 = arith.truncf %289 : vector<8x128xf32> to vector<8x128xbf16>
    %c0_78 = arith.constant 0 : index
    %c0_79 = arith.constant 0 : index
    %324 = vector.load %arg6[%c0_78, %c0_79] : memref<128x384xbf16, #tpu.memory_space<vmem>>, vector<128x384xbf16>
    %cst_80 = arith.constant dense<0.000000e+00> : vector<8x384xf32>
    %325 = tpu.matmul %323, %324, %cst_80 {dimension_numbers = #tpu.dot_dimension_numbers<[1], [0], [0], [1], [0, 0, 1, 1], [], []>} : vector<8x128xbf16>, vector<128x384xbf16>, vector<8x384xf32> -> vector<8x384xf32>
    %326 = vector.extract_strided_slice %322 {offsets = [0, 0], sizes = [8, 128], strides = [1, 1]} : vector<8x384xf32> to vector<8x128xf32>
    %327 = vector.extract_strided_slice %325 {offsets = [0, 0], sizes = [8, 128], strides = [1, 1]} : vector<8x384xf32> to vector<8x128xf32>
    %328 = arith.addf %326, %327 : vector<8x128xf32>
    %329 = arith.negf %328 : vector<8x128xf32>
    %330 = math.exp %329 : vector<8x128xf32>
    %cst_81 = arith.constant 1.000000e+00 : f32
    %331 = vector.broadcast %cst_81 : f32 to vector<8x128xf32>
    %332 = arith.addf %331, %330 : vector<8x128xf32>
    %333 = arith.divf %331, %332 : vector<8x128xf32>
    %334 = vector.extract_strided_slice %322 {offsets = [0, 128], sizes = [8, 128], strides = [1, 1]} : vector<8x384xf32> to vector<8x128xf32>
    %335 = vector.extract_strided_slice %325 {offsets = [0, 128], sizes = [8, 128], strides = [1, 1]} : vector<8x384xf32> to vector<8x128xf32>
    %336 = arith.addf %334, %335 : vector<8x128xf32>
    %337 = arith.negf %336 : vector<8x128xf32>
    %338 = math.exp %337 : vector<8x128xf32>
    %cst_82 = arith.constant 1.000000e+00 : f32
    %339 = vector.broadcast %cst_82 : f32 to vector<8x128xf32>
    %340 = arith.addf %339, %338 : vector<8x128xf32>
    %341 = arith.divf %339, %340 : vector<8x128xf32>
    %342 = vector.extract_strided_slice %322 {offsets = [0, 256], sizes = [8, 128], strides = [1, 1]} : vector<8x384xf32> to vector<8x128xf32>
    %343 = vector.extract_strided_slice %325 {offsets = [0, 256], sizes = [8, 128], strides = [1, 1]} : vector<8x384xf32> to vector<8x128xf32>
    %344 = arith.addf %343, %8 : vector<8x128xf32>
    %345 = arith.mulf %333, %344 : vector<8x128xf32>
    %346 = arith.addf %342, %345 : vector<8x128xf32>
    %347 = math.tanh %346 : vector<8x128xf32>
    %348 = arith.subf %289, %347 : vector<8x128xf32>
    %349 = arith.mulf %341, %348 : vector<8x128xf32>
    %350 = arith.addf %347, %349 : vector<8x128xf32>
    %351 = vector.extract_strided_slice %14 {offsets = [48, 0], sizes = [8, 384], strides = [1, 1]} : vector<64x384xf32> to vector<8x384xf32>
    %352 = arith.truncf %318 : vector<8x128xf32> to vector<8x128xbf16>
    %c0_83 = arith.constant 0 : index
    %c0_84 = arith.constant 0 : index
    %353 = vector.load %arg2[%c0_83, %c0_84] : memref<128x384xbf16, #tpu.memory_space<vmem>>, vector<128x384xbf16>
    %cst_85 = arith.constant dense<0.000000e+00> : vector<8x384xf32>
    %354 = tpu.matmul %352, %353, %cst_85 {dimension_numbers = #tpu.dot_dimension_numbers<[1], [0], [0], [1], [0, 0, 1, 1], [], []>} : vector<8x128xbf16>, vector<128x384xbf16>, vector<8x384xf32> -> vector<8x384xf32>
    %355 = vector.extract_strided_slice %351 {offsets = [0, 0], sizes = [8, 128], strides = [1, 1]} : vector<8x384xf32> to vector<8x128xf32>
    %356 = vector.extract_strided_slice %354 {offsets = [0, 0], sizes = [8, 128], strides = [1, 1]} : vector<8x384xf32> to vector<8x128xf32>
    %357 = arith.addf %355, %356 : vector<8x128xf32>
    %358 = arith.negf %357 : vector<8x128xf32>
    %359 = math.exp %358 : vector<8x128xf32>
    %cst_86 = arith.constant 1.000000e+00 : f32
    %360 = vector.broadcast %cst_86 : f32 to vector<8x128xf32>
    %361 = arith.addf %360, %359 : vector<8x128xf32>
    %362 = arith.divf %360, %361 : vector<8x128xf32>
    %363 = vector.extract_strided_slice %351 {offsets = [0, 128], sizes = [8, 128], strides = [1, 1]} : vector<8x384xf32> to vector<8x128xf32>
    %364 = vector.extract_strided_slice %354 {offsets = [0, 128], sizes = [8, 128], strides = [1, 1]} : vector<8x384xf32> to vector<8x128xf32>
    %365 = arith.addf %363, %364 : vector<8x128xf32>
    %366 = arith.negf %365 : vector<8x128xf32>
    %367 = math.exp %366 : vector<8x128xf32>
    %cst_87 = arith.constant 1.000000e+00 : f32
    %368 = vector.broadcast %cst_87 : f32 to vector<8x128xf32>
    %369 = arith.addf %368, %367 : vector<8x128xf32>
    %370 = arith.divf %368, %369 : vector<8x128xf32>
    %371 = vector.extract_strided_slice %351 {offsets = [0, 256], sizes = [8, 128], strides = [1, 1]} : vector<8x384xf32> to vector<8x128xf32>
    %372 = vector.extract_strided_slice %354 {offsets = [0, 256], sizes = [8, 128], strides = [1, 1]} : vector<8x384xf32> to vector<8x128xf32>
    %373 = arith.addf %372, %5 : vector<8x128xf32>
    %374 = arith.mulf %362, %373 : vector<8x128xf32>
    %375 = arith.addf %371, %374 : vector<8x128xf32>
    %376 = math.tanh %375 : vector<8x128xf32>
    %377 = arith.subf %318, %376 : vector<8x128xf32>
    %378 = arith.mulf %370, %377 : vector<8x128xf32>
    %379 = arith.addf %376, %378 : vector<8x128xf32>
    %380 = arith.truncf %318 : vector<8x128xf32> to vector<8x128xbf16>
    %c0_88 = arith.constant 0 : index
    %c0_89 = arith.constant 0 : index
    %381 = vector.load %arg5[%c0_88, %c0_89] : memref<128x384xbf16, #tpu.memory_space<vmem>>, vector<128x384xbf16>
    %cst_90 = arith.constant dense<0.000000e+00> : vector<8x384xf32>
    %382 = tpu.matmul %380, %381, %cst_90 {dimension_numbers = #tpu.dot_dimension_numbers<[1], [0], [0], [1], [0, 0, 1, 1], [], []>} : vector<8x128xbf16>, vector<128x384xbf16>, vector<8x384xf32> -> vector<8x384xf32>
    %383 = arith.addf %382, %2 : vector<8x384xf32>
    %384 = arith.truncf %350 : vector<8x128xf32> to vector<8x128xbf16>
    %c0_91 = arith.constant 0 : index
    %c0_92 = arith.constant 0 : index
    %385 = vector.load %arg6[%c0_91, %c0_92] : memref<128x384xbf16, #tpu.memory_space<vmem>>, vector<128x384xbf16>
    %cst_93 = arith.constant dense<0.000000e+00> : vector<8x384xf32>
    %386 = tpu.matmul %384, %385, %cst_93 {dimension_numbers = #tpu.dot_dimension_numbers<[1], [0], [0], [1], [0, 0, 1, 1], [], []>} : vector<8x128xbf16>, vector<128x384xbf16>, vector<8x384xf32> -> vector<8x384xf32>
    %387 = vector.extract_strided_slice %383 {offsets = [0, 0], sizes = [8, 128], strides = [1, 1]} : vector<8x384xf32> to vector<8x128xf32>
    %388 = vector.extract_strided_slice %386 {offsets = [0, 0], sizes = [8, 128], strides = [1, 1]} : vector<8x384xf32> to vector<8x128xf32>
    %389 = arith.addf %387, %388 : vector<8x128xf32>
    %390 = arith.negf %389 : vector<8x128xf32>
    %391 = math.exp %390 : vector<8x128xf32>
    %cst_94 = arith.constant 1.000000e+00 : f32
    %392 = vector.broadcast %cst_94 : f32 to vector<8x128xf32>
    %393 = arith.addf %392, %391 : vector<8x128xf32>
    %394 = arith.divf %392, %393 : vector<8x128xf32>
    %395 = vector.extract_strided_slice %383 {offsets = [0, 128], sizes = [8, 128], strides = [1, 1]} : vector<8x384xf32> to vector<8x128xf32>
    %396 = vector.extract_strided_slice %386 {offsets = [0, 128], sizes = [8, 128], strides = [1, 1]} : vector<8x384xf32> to vector<8x128xf32>
    %397 = arith.addf %395, %396 : vector<8x128xf32>
    %398 = arith.negf %397 : vector<8x128xf32>
    %399 = math.exp %398 : vector<8x128xf32>
    %cst_95 = arith.constant 1.000000e+00 : f32
    %400 = vector.broadcast %cst_95 : f32 to vector<8x128xf32>
    %401 = arith.addf %400, %399 : vector<8x128xf32>
    %402 = arith.divf %400, %401 : vector<8x128xf32>
    %403 = vector.extract_strided_slice %383 {offsets = [0, 256], sizes = [8, 128], strides = [1, 1]} : vector<8x384xf32> to vector<8x128xf32>
    %404 = vector.extract_strided_slice %386 {offsets = [0, 256], sizes = [8, 128], strides = [1, 1]} : vector<8x384xf32> to vector<8x128xf32>
    %405 = arith.addf %404, %8 : vector<8x128xf32>
    %406 = arith.mulf %394, %405 : vector<8x128xf32>
    %407 = arith.addf %403, %406 : vector<8x128xf32>
    %408 = math.tanh %407 : vector<8x128xf32>
    %409 = arith.subf %350, %408 : vector<8x128xf32>
    %410 = arith.mulf %402, %409 : vector<8x128xf32>
    %411 = arith.addf %408, %410 : vector<8x128xf32>
    %412 = vector.extract_strided_slice %14 {offsets = [56, 0], sizes = [8, 384], strides = [1, 1]} : vector<64x384xf32> to vector<8x384xf32>
    %413 = arith.truncf %379 : vector<8x128xf32> to vector<8x128xbf16>
    %c0_96 = arith.constant 0 : index
    %c0_97 = arith.constant 0 : index
    %414 = vector.load %arg2[%c0_96, %c0_97] : memref<128x384xbf16, #tpu.memory_space<vmem>>, vector<128x384xbf16>
    %cst_98 = arith.constant dense<0.000000e+00> : vector<8x384xf32>
    %415 = tpu.matmul %413, %414, %cst_98 {dimension_numbers = #tpu.dot_dimension_numbers<[1], [0], [0], [1], [0, 0, 1, 1], [], []>} : vector<8x128xbf16>, vector<128x384xbf16>, vector<8x384xf32> -> vector<8x384xf32>
    %416 = vector.extract_strided_slice %412 {offsets = [0, 0], sizes = [8, 128], strides = [1, 1]} : vector<8x384xf32> to vector<8x128xf32>
    %417 = vector.extract_strided_slice %415 {offsets = [0, 0], sizes = [8, 128], strides = [1, 1]} : vector<8x384xf32> to vector<8x128xf32>
    %418 = arith.addf %416, %417 : vector<8x128xf32>
    %419 = arith.negf %418 : vector<8x128xf32>
    %420 = math.exp %419 : vector<8x128xf32>
    %cst_99 = arith.constant 1.000000e+00 : f32
    %421 = vector.broadcast %cst_99 : f32 to vector<8x128xf32>
    %422 = arith.addf %421, %420 : vector<8x128xf32>
    %423 = arith.divf %421, %422 : vector<8x128xf32>
    %424 = vector.extract_strided_slice %412 {offsets = [0, 128], sizes = [8, 128], strides = [1, 1]} : vector<8x384xf32> to vector<8x128xf32>
    %425 = vector.extract_strided_slice %415 {offsets = [0, 128], sizes = [8, 128], strides = [1, 1]} : vector<8x384xf32> to vector<8x128xf32>
    %426 = arith.addf %424, %425 : vector<8x128xf32>
    %427 = arith.negf %426 : vector<8x128xf32>
    %428 = math.exp %427 : vector<8x128xf32>
    %cst_100 = arith.constant 1.000000e+00 : f32
    %429 = vector.broadcast %cst_100 : f32 to vector<8x128xf32>
    %430 = arith.addf %429, %428 : vector<8x128xf32>
    %431 = arith.divf %429, %430 : vector<8x128xf32>
    %432 = vector.extract_strided_slice %412 {offsets = [0, 256], sizes = [8, 128], strides = [1, 1]} : vector<8x384xf32> to vector<8x128xf32>
    %433 = vector.extract_strided_slice %415 {offsets = [0, 256], sizes = [8, 128], strides = [1, 1]} : vector<8x384xf32> to vector<8x128xf32>
    %434 = arith.addf %433, %5 : vector<8x128xf32>
    %435 = arith.mulf %423, %434 : vector<8x128xf32>
    %436 = arith.addf %432, %435 : vector<8x128xf32>
    %437 = math.tanh %436 : vector<8x128xf32>
    %438 = arith.subf %379, %437 : vector<8x128xf32>
    %439 = arith.mulf %431, %438 : vector<8x128xf32>
    %440 = arith.addf %437, %439 : vector<8x128xf32>
    %441 = arith.truncf %379 : vector<8x128xf32> to vector<8x128xbf16>
    %c0_101 = arith.constant 0 : index
    %c0_102 = arith.constant 0 : index
    %442 = vector.load %arg5[%c0_101, %c0_102] : memref<128x384xbf16, #tpu.memory_space<vmem>>, vector<128x384xbf16>
    %cst_103 = arith.constant dense<0.000000e+00> : vector<8x384xf32>
    %443 = tpu.matmul %441, %442, %cst_103 {dimension_numbers = #tpu.dot_dimension_numbers<[1], [0], [0], [1], [0, 0, 1, 1], [], []>} : vector<8x128xbf16>, vector<128x384xbf16>, vector<8x384xf32> -> vector<8x384xf32>
    %444 = arith.addf %443, %2 : vector<8x384xf32>
    %445 = arith.truncf %411 : vector<8x128xf32> to vector<8x128xbf16>
    %c0_104 = arith.constant 0 : index
    %c0_105 = arith.constant 0 : index
    %446 = vector.load %arg6[%c0_104, %c0_105] : memref<128x384xbf16, #tpu.memory_space<vmem>>, vector<128x384xbf16>
    %cst_106 = arith.constant dense<0.000000e+00> : vector<8x384xf32>
    %447 = tpu.matmul %445, %446, %cst_106 {dimension_numbers = #tpu.dot_dimension_numbers<[1], [0], [0], [1], [0, 0, 1, 1], [], []>} : vector<8x128xbf16>, vector<128x384xbf16>, vector<8x384xf32> -> vector<8x384xf32>
    %448 = vector.extract_strided_slice %444 {offsets = [0, 0], sizes = [8, 128], strides = [1, 1]} : vector<8x384xf32> to vector<8x128xf32>
    %449 = vector.extract_strided_slice %447 {offsets = [0, 0], sizes = [8, 128], strides = [1, 1]} : vector<8x384xf32> to vector<8x128xf32>
    %450 = arith.addf %448, %449 : vector<8x128xf32>
    %451 = arith.negf %450 : vector<8x128xf32>
    %452 = math.exp %451 : vector<8x128xf32>
    %cst_107 = arith.constant 1.000000e+00 : f32
    %453 = vector.broadcast %cst_107 : f32 to vector<8x128xf32>
    %454 = arith.addf %453, %452 : vector<8x128xf32>
    %455 = arith.divf %453, %454 : vector<8x128xf32>
    %456 = vector.extract_strided_slice %444 {offsets = [0, 128], sizes = [8, 128], strides = [1, 1]} : vector<8x384xf32> to vector<8x128xf32>
    %457 = vector.extract_strided_slice %447 {offsets = [0, 128], sizes = [8, 128], strides = [1, 1]} : vector<8x384xf32> to vector<8x128xf32>
    %458 = arith.addf %456, %457 : vector<8x128xf32>
    %459 = arith.negf %458 : vector<8x128xf32>
    %460 = math.exp %459 : vector<8x128xf32>
    %cst_108 = arith.constant 1.000000e+00 : f32
    %461 = vector.broadcast %cst_108 : f32 to vector<8x128xf32>
    %462 = arith.addf %461, %460 : vector<8x128xf32>
    %463 = arith.divf %461, %462 : vector<8x128xf32>
    %464 = vector.extract_strided_slice %444 {offsets = [0, 256], sizes = [8, 128], strides = [1, 1]} : vector<8x384xf32> to vector<8x128xf32>
    %465 = vector.extract_strided_slice %447 {offsets = [0, 256], sizes = [8, 128], strides = [1, 1]} : vector<8x384xf32> to vector<8x128xf32>
    %466 = arith.addf %465, %8 : vector<8x128xf32>
    %467 = arith.mulf %455, %466 : vector<8x128xf32>
    %468 = arith.addf %464, %467 : vector<8x128xf32>
    %469 = math.tanh %468 : vector<8x128xf32>
    %470 = arith.subf %411, %469 : vector<8x128xf32>
    %471 = arith.mulf %463, %470 : vector<8x128xf32>
    %472 = arith.addf %469, %471 : vector<8x128xf32>
    %473 = arith.truncf %440 : vector<8x128xf32> to vector<8x128xbf16>
    %c0_109 = arith.constant 0 : index
    %c0_110 = arith.constant 0 : index
    %474 = vector.load %arg5[%c0_109, %c0_110] : memref<128x384xbf16, #tpu.memory_space<vmem>>, vector<128x384xbf16>
    %cst_111 = arith.constant dense<0.000000e+00> : vector<8x384xf32>
    %475 = tpu.matmul %473, %474, %cst_111 {dimension_numbers = #tpu.dot_dimension_numbers<[1], [0], [0], [1], [0, 0, 1, 1], [], []>} : vector<8x128xbf16>, vector<128x384xbf16>, vector<8x384xf32> -> vector<8x384xf32>
    %476 = arith.addf %475, %2 : vector<8x384xf32>
    %477 = arith.truncf %472 : vector<8x128xf32> to vector<8x128xbf16>
    %c0_112 = arith.constant 0 : index
    %c0_113 = arith.constant 0 : index
    %478 = vector.load %arg6[%c0_112, %c0_113] : memref<128x384xbf16, #tpu.memory_space<vmem>>, vector<128x384xbf16>
    %cst_114 = arith.constant dense<0.000000e+00> : vector<8x384xf32>
    %479 = tpu.matmul %477, %478, %cst_114 {dimension_numbers = #tpu.dot_dimension_numbers<[1], [0], [0], [1], [0, 0, 1, 1], [], []>} : vector<8x128xbf16>, vector<128x384xbf16>, vector<8x384xf32> -> vector<8x384xf32>
    %480 = vector.extract_strided_slice %476 {offsets = [0, 0], sizes = [8, 128], strides = [1, 1]} : vector<8x384xf32> to vector<8x128xf32>
    %481 = vector.extract_strided_slice %479 {offsets = [0, 0], sizes = [8, 128], strides = [1, 1]} : vector<8x384xf32> to vector<8x128xf32>
    %482 = arith.addf %480, %481 : vector<8x128xf32>
    %483 = arith.negf %482 : vector<8x128xf32>
    %484 = math.exp %483 : vector<8x128xf32>
    %cst_115 = arith.constant 1.000000e+00 : f32
    %485 = vector.broadcast %cst_115 : f32 to vector<8x128xf32>
    %486 = arith.addf %485, %484 : vector<8x128xf32>
    %487 = arith.divf %485, %486 : vector<8x128xf32>
    %488 = vector.extract_strided_slice %476 {offsets = [0, 128], sizes = [8, 128], strides = [1, 1]} : vector<8x384xf32> to vector<8x128xf32>
    %489 = vector.extract_strided_slice %479 {offsets = [0, 128], sizes = [8, 128], strides = [1, 1]} : vector<8x384xf32> to vector<8x128xf32>
    %490 = arith.addf %488, %489 : vector<8x128xf32>
    %491 = arith.negf %490 : vector<8x128xf32>
    %492 = math.exp %491 : vector<8x128xf32>
    %cst_116 = arith.constant 1.000000e+00 : f32
    %493 = vector.broadcast %cst_116 : f32 to vector<8x128xf32>
    %494 = arith.addf %493, %492 : vector<8x128xf32>
    %495 = arith.divf %493, %494 : vector<8x128xf32>
    %496 = vector.extract_strided_slice %476 {offsets = [0, 256], sizes = [8, 128], strides = [1, 1]} : vector<8x384xf32> to vector<8x128xf32>
    %497 = vector.extract_strided_slice %479 {offsets = [0, 256], sizes = [8, 128], strides = [1, 1]} : vector<8x384xf32> to vector<8x128xf32>
    %498 = arith.addf %497, %8 : vector<8x128xf32>
    %499 = arith.mulf %487, %498 : vector<8x128xf32>
    %500 = arith.addf %496, %499 : vector<8x128xf32>
    %501 = math.tanh %500 : vector<8x128xf32>
    %502 = arith.subf %472, %501 : vector<8x128xf32>
    %503 = arith.mulf %495, %502 : vector<8x128xf32>
    %504 = arith.addf %501, %503 : vector<8x128xf32>
    %505 = arith.truncf %504 : vector<8x128xf32> to vector<8x128xbf16>
    %c0_117 = arith.constant 0 : index
    %c0_118 = arith.constant 0 : index
    %506 = vector.load %arg9[%c0_117, %c0_118] : memref<128x128xbf16, #tpu.memory_space<vmem>>, vector<128x128xbf16>
    %cst_119 = arith.constant dense<0.000000e+00> : vector<8x128xf32>
    %507 = tpu.matmul %505, %506, %cst_119 {dimension_numbers = #tpu.dot_dimension_numbers<[1], [0], [0], [1], [0, 0, 1, 1], [], []>} : vector<8x128xbf16>, vector<128x128xbf16>, vector<8x128xf32> -> vector<8x128xf32>
    %c0_120 = arith.constant 0 : index
    %c0_121 = arith.constant 0 : index
    %508 = vector.load %arg10[%c0_120, %c0_121] : memref<1x128xf32, #tpu.memory_space<vmem>>, vector<1x128xf32>
    %509 = vector.broadcast %508 : vector<1x128xf32> to vector<8x128xf32>
    %510 = arith.addf %507, %509 : vector<8x128xf32>
    %c0_122 = arith.constant 0 : index
    %c0_123 = arith.constant 0 : index
    %511 = vector.load %arg11[%c0_122, %c0_123] : memref<8x128xf32, #tpu.memory_space<vmem>>, vector<8x128xf32>
    tpu.vector_store %arg11[%c0_122, %c0_123], %510 {strides = array<i32>} : memref<8x128xf32, #tpu.memory_space<vmem>>, vector<8x128xf32>,
    return
  }
}

</mosaic_0001>

<bundles_post_ra>
// kernel: tpu_custom_call.1
= control target key start
LH: loop header
LB: loop body
LE: loop exit
PB: predicated region body
PF: predicated region fallthrough
CT: control target
= control target key end

     0   :  { %16 = vsyncpa [#allocation3], 0  ;;  %s6542_s0 = inlined_call_operand.vmem [shape: bf16[64,8], index: 0, kind: input, shape index: {}]   ;;  %s6543_s1 = inlined_call_operand.hbm [shape: bf16[8,384], index: 1, kind: input, shape index: {}]   ;;  %s6544_s2 = inlined_call_operand.hbm [shape: bf16[128,384], index: 2, kind: input, shape index: {}]   ;;  %s6545_s3 = inlined_call_operand.vmem [shape: f32[1,384], index: 3, kind: input, shape index: {}]   ;;  %s6546_s4 = inlined_call_operand.hbm [shape: f32[1,128], index: 4, kind: input, shape index: {}]   ;;  %s6547_s5 = inlined_call_operand.hbm [shape: bf16[128,384], index: 5, kind: input, shape index: {}]   ;;  %s6548_s6 = inlined_call_operand.hbm [shape: bf16[128,384], index: 6, kind: input, shape index: {}]   ;;  %s6549_s7 = inlined_call_operand.vmem [shape: f32[1,384], index: 7, kind: input, shape index: {}]   ;;  %s6550_s8 = inlined_call_operand.hbm [shape: f32[1,128], index: 8, kind: input, shape index: {}]   ;;  %s6551_s9 = inlined_call_operand.vmem [shape: bf16[128,128], index: 9, kind: input, shape index: {}]   ;;  %s6552_s10 = inlined_call_operand.vmem [shape: f32[1,128], index: 10, kind: input, shape index: {}]   ;;  %s6553_s11 = inlined_call_operand.hbm [shape: f32[8,128], index: 11, kind: output, shape index: {}]  }
   0x1   :  { %17 = vsyncpa [#allocation6], 0 }
   0x2   :  { %18 = vsyncpa [#allocation9], 0 }
   0x3   :  { %19 = vsyncpa [#allocation12], 0 }
   0x4   :  { %20 = vsyncpa [#allocation4], 0  ;;  %s4784_s17 = smov [#allocation5]   ;;  %s4620_s21 = scalar_lea.hbm %s6544_s2, 3072 }
   0x5   :  { %s38_s18 = sshll.u32 %s4784_s17, 4  ;;  %p4621_p0 = scmp.ne.s32.totalorder %s6544_s2, %s4620_s21  ;;  %s39_s18 = int_to_ptr.vmem [resolvable:$true] %s38_s18 }
   0x6   :  { %p4624_p1 = scmp.lt.u32.totalorder %s4620_s21, %s6544_s2 }
   0x8   :  { %p4626_p2 = pnand %p4624_p1, %p4621_p0 }
   0xa   :  { %4629 = shalt.err (!%p4626_p2)
}
   0xb   :  { %s4630_s26 = scalar_lea.vmem %s39_s18, 3072  ;;  %p4635_p4 = scmp.lt.s32.totalorder %s39_s18, %s39_s18 }
   0xc   :  { %p4631_p3 = scmp.ne.s32.totalorder %s39_s18, %s4630_s26  ;;  %p4636_p5 = scmp.lt.s32.totalorder %s4630_s26, %s4630_s26 }
   0xe   :  { %p4637_p6 = por %p4636_p5, %p4635_p4 }
  0x10   :  { %p4638_p7 = pnand %p4637_p6, %p4631_p3 }
  0x12   :  { %4641 = shalt.err (!%p4638_p7)
}
  0x13   :  { %s4785_s27 = smov 192   ;;  %s4786_s28 = smov 12  }
  0x14   :  { %44 = dma.hbm_to_vmem [thread:$0]  %s6544_s2, 3072, %s39_s18, [#allocation6], %s4785_s27, %s4785_s27, %s4786_s28  }
  0x15   :  { %s4787_s12 = smov [#allocation8]   ;;  %s4788_s14 = smov [#allocation2]  }
  0x16   :  { %s62_s13 = sshll.u32 %s4787_s12, 4  ;;  %s29_s15 = sshll.u32 %s4788_s14, 4  ;;  %s63_s13 = int_to_ptr.vmem [resolvable:$true] %s62_s13  ;;  %s30_s15 = int_to_ptr.vmem [resolvable:$true] %s29_s15 }
  0x17   :  { %s4642_s19 = scalar_lea.hbm %s6547_s5, 3072 }
  0x18   :  { %p4643_p8 = scmp.ne.s32.totalorder %s6547_s5, %s4642_s19  ;;  %p4646_p9 = scmp.lt.u32.totalorder %s4642_s19, %s6547_s5 }
  0x1a   :  { %p4648_p10 = pnand %p4646_p9, %p4643_p8 }
  0x1c   :  { %4651 = shalt.err (!%p4648_p10)
}
  0x1d   :  { %s4652_s2 = scalar_lea.vmem %s63_s13, 3072  ;;  %p4657_p12 = scmp.lt.s32.totalorder %s63_s13, %s63_s13 }
  0x1e   :  { %p4653_p11 = scmp.ne.s32.totalorder %s63_s13, %s4652_s2  ;;  %p4658_p13 = scmp.lt.s32.totalorder %s4652_s2, %s4652_s2 }
  0x20   :  { %p4659_p0 = por %p4658_p13, %p4657_p12 }
  0x22   :  { %p4660_p1 = pnand %p4659_p0, %p4653_p11 }
  0x24   :  { %4663 = shalt.err (!%p4660_p1)
}
  0x25   :  { %68 = dma.hbm_to_vmem [thread:$0]  %s6547_s5, 3072, %s63_s13, [#allocation9], %s4785_s27, %s4785_s27, %s4786_s28  }
  0x26   :  { %s4664_s29 = scalar_lea.hbm %s6543_s1, 192 }
  0x27   :  { %p4665_p2 = scmp.ne.s32.totalorder %s6543_s1, %s4664_s29  ;;  %p4668_p3 = scmp.lt.u32.totalorder %s4664_s29, %s6543_s1 }
  0x29   :  { %p4670_p4 = pnand %p4668_p3, %p4665_p2 }
  0x2b   :  { %4673 = shalt.err (!%p4670_p4)
}
  0x2c   :  { %s4674_s17 = scalar_lea.vmem %s30_s15, 192  ;;  %p4679_p6 = scmp.lt.s32.totalorder %s30_s15, %s30_s15 }
  0x2d   :  { %p4675_p5 = scmp.ne.s32.totalorder %s30_s15, %s4674_s17  ;;  %p4680_p7 = scmp.lt.s32.totalorder %s4674_s17, %s4674_s17 }
  0x2f   :  { %p4681_p8 = por %p4680_p7, %p4679_p6 }
  0x31   :  { %p4682_p9 = pnand %p4681_p8, %p4675_p5 }
  0x33   :  { %4685 = shalt.err (!%p4682_p9)
}
  0x34   :  { %32 = dma.hbm_to_vmem [thread:$0]  %s6543_s1, 192, %s30_s15, [#allocation3]  }
  0x35   :  { %s4789_s19 = smov [#allocation7]   ;;  %s4790_s21 = smov [#allocation10]  }
  0x36   :  { %s53_s20 = sshll.u32 %s4789_s19, 4  ;;  %s74_s22 = sshll.u32 %s4790_s21, 4  ;;  %s54_s20 = int_to_ptr.vmem [resolvable:$true] %s53_s20  ;;  %s75_s22 = int_to_ptr.vmem [resolvable:$true] %s74_s22 }
  0x37   :  { %s4686_s18 = scalar_lea.hbm %s6546_s4, 16 }
  0x38   :  { %p4687_p10 = scmp.ne.s32.totalorder %s6546_s4, %s4686_s18  ;;  %p4690_p11 = scmp.lt.u32.totalorder %s4686_s18, %s6546_s4 }
  0x3a   :  { %p4692_p12 = pnand %p4690_p11, %p4687_p10 }
  0x3c   :  { %4695 = shalt.err (!%p4692_p12)
}
  0x3d   :  { %s4696_s1 = scalar_lea.vmem %s54_s20, 16  ;;  %s4700_s15 = scalar_lea.vmem %s54_s20, 32 }
  0x3e   :  { %p4697_p13 = scmp.ne.s32.totalorder %s54_s20, %s4696_s1  ;;  %p4701_p0 = scmp.lt.s32.totalorder %s54_s20, %s54_s20 }
  0x3f   :  { %p4702_p1 = scmp.lt.s32.totalorder %s4700_s15, %s4696_s1 }
  0x41   :  { %p4703_p2 = por %p4702_p1, %p4701_p0 }
  0x43   :  { %p4704_p3 = pnand %p4703_p2, %p4697_p13 }
  0x45   :  { %4707 = shalt.err (!%p4704_p3)
}
  0x46   :  { %56 = dma.hbm_to_vmem [thread:$0]  %s6546_s4, 16, %s54_s20, [#allocation6]  }
  0x47   :  { %s4708_s17 = scalar_lea.hbm %s6548_s6, 3072 }
  0x48   :  { %p4709_p4 = scmp.ne.s32.totalorder %s6548_s6, %s4708_s17  ;;  %p4712_p5 = scmp.lt.u32.totalorder %s4708_s17, %s6548_s6 }
  0x4a   :  { %p4714_p6 = pnand %p4712_p5, %p4709_p4 }
  0x4c   :  { %4717 = shalt.err (!%p4714_p6)
}
  0x4d   :  { %s4718_s23 = scalar_lea.vmem %s75_s22, 3072  ;;  %p4723_p8 = scmp.lt.s32.totalorder %s75_s22, %s75_s22 }
  0x4e   :  { %p4719_p7 = scmp.ne.s32.totalorder %s75_s22, %s4718_s23  ;;  %p4724_p9 = scmp.lt.s32.totalorder %s4718_s23, %s4718_s23 }
  0x50   :  { %p4725_p10 = por %p4724_p9, %p4723_p8 }
  0x52   :  { %p4726_p11 = pnand %p4725_p10, %p4719_p7 }
  0x54   :  { %4729 = shalt.err (!%p4726_p11)
}
  0x55   :  { %80 = dma.hbm_to_vmem [thread:$0]  %s6548_s6, 3072, %s75_s22, [#allocation9], %s4785_s27, %s4785_s27, %s4786_s28  }
  0x56   :  { %s4791_s2 = smov [#allocation11]   ;;  %s4730_s26 = scalar_lea.hbm %s6550_s8, 16 }
  0x57   :  { %s89_s18 = sshll.u32 %s4791_s2, 4  ;;  %p4731_p12 = scmp.ne.s32.totalorder %s6550_s8, %s4730_s26  ;;  %s90_s18 = int_to_ptr.vmem [resolvable:$true] %s89_s18 }
  0x58   :  { %p4734_p13 = scmp.lt.u32.totalorder %s4730_s26, %s6550_s8 }
  0x5a   :  { %p4736_p0 = pnand %p4734_p13, %p4731_p12 }
  0x5c   :  { %4739 = shalt.err (!%p4736_p0)
}
  0x5d   :  { %s4740_s12 = scalar_lea.vmem %s90_s18, 16  ;;  %s4744_s6 = scalar_lea.vmem %s90_s18, 32 }
  0x5e   :  { %p4741_p1 = scmp.ne.s32.totalorder %s90_s18, %s4740_s12  ;;  %p4745_p2 = scmp.lt.s32.totalorder %s90_s18, %s90_s18 }
  0x5f   :  { %p4746_p3 = scmp.lt.s32.totalorder %s4744_s6, %s4740_s12 }
  0x61   :  { %p4747_p4 = por %p4746_p3, %p4745_p2 }
  0x63   :  { %p4748_p5 = pnand %p4747_p4, %p4741_p1 }
  0x65   :  { %4751 = shalt.err (!%p4748_p5)
}
  0x66   :  { %92 = dma.hbm_to_vmem [thread:$0]  %s6550_s8, 16, %s90_s18, [#allocation12]  }
  0x67   :  { %4774 = dma.done.wait [#allocation3], 192  }
  0x68   :  { %4775 = vsyncadd [#allocation3], 4294967104 }
  0x69   :  { %4776 = dma.done.wait [#allocation6], 3088  }
  0x6a   :  { %4777 = vsyncadd [#allocation6], 4294964208 }
  0x6b   :  { %4778 = dma.done.wait [#allocation9], 6144  }
  0x6c   :  { %4779 = vsyncadd [#allocation9], 4294961152 }
  0x6d   :  { %4780 = dma.done.wait [#allocation12], 16  }
  0x6e   :  { %4781 = vsyncadd [#allocation12], 4294967280  ;;  %v6557_v0 = vmov 0   ;;  %v155_v1 = vld [vmem:[#allocation2] sm:$0xff]  ;;  %vm215_vm0 = vcmask 1043456   ;;  %vm202_vm1 = vcmask 64512   ;;  %v118_v37 = vlaneseq }
  0x6f   :  { %257 = vmatprep.mubr.bf16.mxu0 %v6557_v0  ;;  %v3276_v2 = vcombine.high %v155_v1, %v155_v1  ;;  %v3275_v3 = vcombine.low %v155_v1, %v155_v1  ;;  %v4203_v4 = vld [vmem:[%s6542_s0] sm:$0xff]   ;;  %v4941_v5 = vld [vmem:[#allocation5 + $0x4] ss:$12 sps:$4 sm:$0xff]   ;;  %v4946_v7 = vld [vmem:[#allocation5] ss:$12 sps:$4 sm:$0xff]   ;;  %v6559_v16 = vmov 0.0  }
  0x70   :  { %3632 = vmatprep.mubr.msk.bf16.mxu1 %vm202_vm1, %v4203_v4  ;;  %v4949_v8 = vld [vmem:[#allocation5 + $0x1c] ss:$12 sps:$4 sm:$0xff]   ;;  %v4953_v9 = vld [vmem:[#allocation5 + $0x18] ss:$12 sps:$4 sm:$0xff]   ;;  %v4957_v10 = vld [vmem:[#allocation5 + $0x34] ss:$12 sps:$4 sm:$0xff]  }
  0x71   :  { %3278 = vmatprep.subr.msk.bf16.mxu0 %vm215_vm0, %v3276_v2  ;;  %v217_v6 = vsel %vm215_vm0, %v3275_v3, 0  ;;  %v4221_v11 = vld [vmem:[#allocation2 + $0x8] ss:$0 sps:$4 sm:$0xff]   ;;  %v4968_v15 = vld [vmem:[#allocation5 + $0x4c] ss:$12 sps:$4 sm:$0xff]   ;;  %v4217_v19 = vld [vmem:[%s6542_s0 + $0x10] sm:$0xff]  }
  0x72   :  { %226 = vmatpush1.bf16.msra.mxu0 %v217_v6  ;;  %v4210_v12 = vld [vmem:[%s6542_s0 + $0x8] sm:$0xff]   ;;  %4188 = vmatprep.subr.msk.bf16.mxu1 %vm215_vm0, %v4221_v11  ;;  %v223_v14 = vsel %vm215_vm0, %v4221_v11, 0  ;;  %v4972_v17 = vld [vmem:[#allocation5 + $0x8] ss:$12 sps:$4 sm:$0xff]   ;;  %v4982_v20 = vld [vmem:[#allocation5 + $0x64] ss:$12 sps:$4 sm:$0xff]  }
  0x73   :  { %523 = vmatprep.subr.bf16.mxu0 %v4941_v5  ;;  %v4962_v13 = vld [vmem:[#allocation5 + $0x30] ss:$12 sps:$4 sm:$0xff]   ;;  %3631 = vmatpush3.bf16.msra.mxu1 %v223_v14  ;;  %v4975_v18 = vld [vmem:[#allocation5 + $0x48] ss:$12 sps:$4 sm:$0xff]   ;;  %v4986_v21 = vld [vmem:[#allocation5 + $0x20] ss:$12 sps:$4 sm:$0xff]  }
  0x74   :  { %3640 = vmatprep.subr.bf16.mxu1 %v6559_v16  ;;  %v4991_v22 = vld [vmem:[#allocation5 + $0x60] ss:$12 sps:$4 sm:$0xff]   ;;  %v4994_v23 = vld [vmem:[#allocation5 + $0x7c] ss:$12 sps:$4 sm:$0xff]   ;;  %v4996_v24 = vld [vmem:[#allocation5 + $0x78] ss:$12 sps:$4 sm:$0xff]  }
  0x75   :  { %3279 = vmatmul.mubr.msk.bf16.vlgmr.msra.gmra.mrb[0].mxu0 %vm202_vm1, %v4203_v4  ;;  %v4999_v25 = vld [vmem:[#allocation5 + $0x38] ss:$12 sps:$4 sm:$0xff]   ;;  %v4225_v26 = vld [vmem:[%s6542_s0 + $0x18] sm:$0xff]   ;;  %v5005_v27 = vld [vmem:[#allocation5 + $0x94] ss:$12 sps:$4 sm:$0xff]   ;;  %vm4794_vm2 = vmmov 0  }
  0x76   :  { %524 = vmatpush1.bf16.msra.mxu0 %v4946_v7  ;;  %267 = vmatprep.mubr.bf16.mxu0 %v6557_v0  ;;  %v5010_v28 = vld [vmem:[#allocation5 + $0x50] ss:$12 sps:$4 sm:$0xff]   ;;  %v5019_v30 = vld [vmem:[#allocation5 + $0xac] ss:$12 sps:$4 sm:$0xff]   ;;  %v5023_v31 = vld [vmem:[#allocation5 + $0x68] ss:$12 sps:$4 sm:$0xff]  }
  0x77   :  { %525 = vmatprep.subr.bf16.mxu0 %v4949_v8  ;;  %3633 = vmatmul.mubr.msk.bf16.vlgmr.msra.gmra.mrb[0].mxu1 %vm202_vm1, %v4210_v12  ;;  %v5014_v29 = vld [vmem:[#allocation5 + $0x90] ss:$12 sps:$4 sm:$0xff]   ;;  %v5026_v32 = vld [vmem:[#allocation5 + $0xa8] ss:$12 sps:$4 sm:$0xff]   ;;  %v5033_v33 = vld [vmem:[#allocation5 + $0x80] ss:$12 sps:$4 sm:$0xff]  }
  0x78   :  { %3641 = vmatpush3.bf16.msra.mxu1 %v4972_v17  ;;  %3636 = vmatprep.mubr.msk.bf16.mxu1 %vm202_vm1, %v4217_v19  ;;  %v5039_v34 = vld [vmem:[#allocation5 + $0x98] ss:$12 sps:$4 sm:$0xff]   ;;  %v5045_v35 = vld [vmem:[#allocation5 + $0xb0] ss:$12 sps:$4 sm:$0xff]   ;;  %v5089_v38 = vshrl.u32 %v118_v37, 7  ;;  %s4795_s14 = smov [#allocation13]  }
  0x79   :  { %3642 = vmatprep.subr.bf16.mxu1 %v6559_v16  ;;  %v5086_v36 = vld [vmem:[#allocation8 + $0x4] ss:$12 sps:$4 sm:$0xff]   ;;  %s3257_s8 = sshll.u32 %s4795_s14, 4  ;;  %s3258_s8 = int_to_ptr.vmem [resolvable:$true] %s3257_s8 }
  0x7a   :  { %526 = vmatpush1.bf16.msra.mxu0 %v4953_v9  ;;  %v6556_v39 = vsub.s32 0, %v5089_v38  ;;  %v157_v40 = vld [vmem:[%s6545_s3] sm:$0x7]  ;;  %v6555_v41 = vsub.s32 1, %v5089_v38  ;;  %v6554_v49 = vsub.s32 2, %v5089_v38  ;;  %s4752_s16 = scalar_lea.vmem %s3258_s8, 128  ;;  %p4757_p7 = scmp.lt.s32.totalorder %s3258_s8, %s3258_s8 }
  0x7b   :  { %527 = vmatprep.subr.bf16.mxu0 %v4957_v10  ;;  %p4753_p6 = scmp.ne.s32.totalorder %s3258_s8, %s4752_s16  ;;  %p4758_p8 = scmp.lt.s32.totalorder %s4752_s16, %s4752_s16 }
  0x7c   :  { %3643 = vmatpush3.bf16.msra.mxu1 %v4986_v21  ;;  %v162_v43 = vrot.slane %v157_v40, %v6556_v39  ;;  %v166_v45 = vrot.slane %v157_v40, %v6555_v41  ;;  %v5107_v51 = vrot.slane %v157_v40, %v6554_v49 }
  0x7d   :  { %3280 = vmatmul.mubr.msk.bf16.gmra.mrb[4].mxu0 %vm202_vm1, %v4210_v12  ;;  %3644 = vmatprep.subr.bf16.mxu1 %v6559_v16  ;;  %p4759_p9 = por %p4758_p8, %p4757_p7 }
  0x7e   :  { %528 = vmatpush1.bf16.msra.mxu0 %v4962_v13  ;;  %277 = vmatprep.mubr.bf16.mxu0 %v6557_v0 }
  0x7f   :  { %529 = vmatprep.subr.bf16.mxu0 %v4968_v15  ;;  %3637 = vmatmul.mubr.msk.bf16.gmra.mrb[4].mxu1 %vm202_vm1, %v4225_v26  ;;  %p4760_p10 = pnand %p4759_p9, %p4753_p6 }
  0x80   :  { %3645 = vmatpush3.bf16.msra.mxu1 %v4999_v25  ;;  %3656 = vmatprep.mubr.msk.bf16.mxu1 %vm4794_vm2, %v6559_v16 }
  0x81   :  { %3646 = vmatprep.subr.bf16.mxu1 %v6559_v16 }
  0x82   :  { %530 = vmatpush1.bf16.msra.mxu0 %v4975_v18 }
  0x83   :  { %531 = vmatprep.subr.bf16.mxu0 %v4982_v20 }
  0x84   :  { %3647 = vmatpush3.bf16.msra.mxu1 %v5010_v28 }
  0x85   :  { %3281 = vmatmul.mubr.msk.bf16.gmra.mrb[8].mxu0 %vm202_vm1, %v4217_v19  ;;  %3648 = vmatprep.subr.bf16.mxu1 %v6559_v16 }
  0x86   :  { %532 = vmatpush1.bf16.msra.mxu0 %v4991_v22  ;;  %287 = vmatprep.mubr.bf16.mxu0 %v6557_v0 }
  0x87   :  { %533 = vmatprep.subr.bf16.mxu0 %v4994_v23 }
  0x88   :  { %3649 = vmatpush3.bf16.msra.mxu1 %v5023_v31 }
  0x89   :  { %3650 = vmatprep.subr.bf16.mxu1 %v6559_v16 }
  0x8a   :  { %534 = vmatpush1.bf16.msra.mxu0 %v4996_v24 }
  0x8b   :  { %535 = vmatprep.subr.bf16.mxu0 %v5005_v27 }
  0x8c   :  { %3651 = vmatpush3.bf16.msra.mxu1 %v5033_v33 }
  0x8d   :  { %3282 = vmatmul.mubr.msk.bf16.gmra.mrb[12].mxu0 %vm202_vm1, %v4225_v26  ;;  %3652 = vmatprep.subr.bf16.mxu1 %v6559_v16 }
  0x8e   :  { %536 = vmatpush1.bf16.msra.mxu0 %v5014_v29  ;;  %555 = vmatprep.mubr.bf16.mxu0 %v6557_v0 }
  0x8f   :  { %537 = vmatprep.subr.bf16.mxu0 %v5019_v30 }
  0x90   :  { %3653 = vmatpush3.bf16.msra.mxu1 %v5039_v34 }
  0x91   :  { %3654 = vmatprep.subr.bf16.mxu1 %v6559_v16 }
  0x92   :  { %538 = vmatpush1.bf16.msra.mxu0 %v5026_v32 }
  0x93   :  { %626 = vmatprep.subr.bf16.mxu0 %v4941_v5 }
  0x94   :  { %3655 = vmatpush3.bf16.msra.mxu1 %v5045_v35 }
  0x95   :  { %556 = vmatmul.mubr.bf16.vlgmr.msra.gmra.mrb[16].mxu0 %v6557_v0  ;;  %3660 = vmatprep.subr.bf16.mxu1 %v6559_v16 }
  0x96   :  { %627 = vmatpush1.bf16.msra.mxu0 %v4946_v7  ;;  %658 = vmatprep.mubr.bf16.mxu0 %v6557_v0 }
  0x97   :  { %628 = vmatprep.subr.bf16.mxu0 %v4949_v8  ;;  %3657 = vmatmul.mubr.bf16.vlgmr.msra.gmra.mrb[8].mxu1 %v6557_v0 }
  0x98   :  { %3661 = vmatpush3.bf16.msra.mxu1 %v4972_v17  ;;  %3676 = vmatprep.mubr.msk.bf16.mxu1 %vm4794_vm2, %v6559_v16 }
  0x99   :  { %3662 = vmatprep.subr.bf16.mxu1 %v6559_v16 }
  0x9a   :  { %629 = vmatpush1.bf16.msra.mxu0 %v4953_v9 }
  0x9b   :  { %630 = vmatprep.subr.bf16.mxu0 %v4957_v10 }
  0x9c   :  { %3663 = vmatpush3.bf16.msra.mxu1 %v4986_v21 }
  0x9d   :  { %3664 = vmatprep.subr.bf16.mxu1 %v6559_v16 }
  0x9e   :  { %631 = vmatpush1.bf16.msra.mxu0 %v4962_v13 }
  0x9f   :  { %632 = vmatprep.subr.bf16.mxu0 %v4968_v15 }
  0xa0   :  { %3665 = vmatpush3.bf16.msra.mxu1 %v4999_v25 }
  0xa1   :  { %3666 = vmatprep.subr.bf16.mxu1 %v6559_v16 }
  0xa2   :  { %633 = vmatpush1.bf16.msra.mxu0 %v4975_v18 }
  0xa3   :  { %634 = vmatprep.subr.bf16.mxu0 %v4982_v20 }
  0xa4   :  { %3667 = vmatpush3.bf16.msra.mxu1 %v5010_v28 }
  0xa5   :  { %3668 = vmatprep.subr.bf16.mxu1 %v6559_v16 }
  0xa6   :  { %635 = vmatpush1.bf16.msra.mxu0 %v4991_v22 }
  0xa7   :  { %636 = vmatprep.subr.bf16.mxu0 %v4994_v23 }
  0xa8   :  { %3669 = vmatpush3.bf16.msra.mxu1 %v5023_v31 }
  0xa9   :  { %3670 = vmatprep.subr.bf16.mxu1 %v6559_v16 }
  0xaa   :  { %637 = vmatpush1.bf16.msra.mxu0 %v4996_v24 }
  0xab   :  { %638 = vmatprep.subr.bf16.mxu0 %v5005_v27 }
  0xac   :  { %3671 = vmatpush3.bf16.msra.mxu1 %v5033_v33 }
  0xad   :  { %3672 = vmatprep.subr.bf16.mxu1 %v6559_v16 }
  0xae   :  { %639 = vmatpush1.bf16.msra.mxu0 %v5014_v29 }
  0xaf   :  { %640 = vmatprep.subr.bf16.mxu0 %v5019_v30 }
  0xb0   :  { %3673 = vmatpush3.bf16.msra.mxu1 %v5039_v34 }
  0xb1   :  { %3674 = vmatprep.subr.bf16.mxu1 %v6559_v16 }
  0xb2   :  { %641 = vmatpush1.bf16.msra.mxu0 %v5026_v32 }
  0xb3   :  { %888 = vmatprep.subr.bf16.mxu0 %v5086_v36 }
  0xb4   :  { %3675 = vmatpush3.bf16.msra.mxu1 %v5045_v35 }
  0xb5   :  { %3680 = vmatprep.subr.bf16.mxu1 %v6559_v16 }
 0x148   :  { %v259_v42 = vpop.f32.mrb[0].mxu0 }
 0x149   :  { %v261_v44 = vpop.f32.mrb[1].mxu0  ;;  %v260_v49 = vadd.f32 %v259_v42, %v162_v43 }
 0x14a   :  { %v263_v46 = vpop.f32.mrb[2].mxu0  ;;  %v3634_v57 = vpop.f32.mrb[0].mxu1  ;;  %v262_v41 = vadd.f32 %v261_v44, %v166_v45 }
 0x14b   :  { %v5100_v47 = vadd.f32 %v263_v46, %v162_v43  ;;  %v265_v48 = vpop.f32.mrb[3].mxu0  ;;  %v5116_v60 = vadd.f32 %v3634_v57, %v5107_v51  ;;  %v332_v61 = vpop.f32.mrb[1].mxu1 }
 0x14c   :  { %v5103_v50 = vadd.f32 %v265_v48, %v166_v45  ;;  %v3635_v63 = vpop.f32.mrb[2].mxu1 }
 0x14d   :  { %6718 = vst [vmem:[#allocation22_spill] sm:$0xff] %v5116_v60  ;;  %v5121_v1 = vadd.f32 %v3635_v63, %v5107_v51  ;;  %v335_v2 = vpop.f32.mrb[3].mxu1  ;;  %v5252_v60 = vld [vmem:[#allocation10 + $0x18] ss:$12 sps:$4 sm:$0xff]  }
 0x14e   :  { %v5124_v3 = vadd.f32 %v335_v2, %v5107_v51  ;;  %6739 = vst [vmem:[#allocation41_spill] sm:$0xff] %v5252_v60 }
 0x14f   :  { %6720 = vst [vmem:[#allocation24_spill] sm:$0xff] %v5121_v1  ;;  %v5243_v1 = vld [vmem:[#allocation10] ss:$12 sps:$4 sm:$0xff]  }
 0x150   :  { %v269_v52 = vpop.f32.mrb[4].mxu0  ;;  %6736 = vst [vmem:[#allocation38_spill] sm:$0xff] %v5243_v1 }
 0x151   :  { %v5109_v53 = vadd.f32 %v269_v52, %v162_v43  ;;  %v271_v54 = vpop.f32.mrb[5].mxu0 }
 0x152   :  { %v5111_v55 = vadd.f32 %v271_v54, %v166_v45  ;;  %v273_v56 = vpop.f32.mrb[6].mxu0  ;;  %v3638_v19 = vpop.f32.mrb[4].mxu1 }
 0x153   :  { %6715 = vst [vmem:[#allocation19_spill] sm:$0xff] %v5109_v53  ;;  %v5113_v58 = vadd.f32 %v273_v56, %v162_v43  ;;  %v275_v59 = vpop.f32.mrb[7].mxu0  ;;  %v5133_v40 = vadd.f32 %v3638_v19, %v5107_v51  ;;  %v348_v46 = vpop.f32.mrb[5].mxu1  ;;  %v5258_v53 = vld [vmem:[#allocation10 + $0x34] ss:$12 sps:$4 sm:$0xff]  }
 0x154   :  { %6716 = vst [vmem:[#allocation20_spill] sm:$0xff] %v5111_v55  ;;  %v5118_v62 = vadd.f32 %v275_v59, %v166_v45  ;;  %v5138_v52 = vadd.f32 %v348_v46, %v5107_v51  ;;  %v3639_v54 = vpop.f32.mrb[6].mxu1  ;;  %v5255_v55 = vld [vmem:[#allocation10 + $0x20] ss:$12 sps:$4 sm:$0xff]   ;;  %6741 = vst [vmem:[#allocation43_spill] sm:$0xff] %v5258_v53 }
 0x155   :  { %6717 = vst [vmem:[#allocation21_spill] sm:$0xff] %v5113_v58  ;;  %6724 = vst [vmem:[#allocation28_spill] sm:$0xff] %v5133_v40  ;;  %v5141_v56 = vadd.f32 %v3639_v54, %v5107_v51  ;;  %v351_v57 = vpop.f32.mrb[7].mxu1  ;;  %v5248_v58 = vld [vmem:[#allocation10 + $0x1c] ss:$12 sps:$4 sm:$0xff]  }
 0x156   :  { %6719 = vst [vmem:[#allocation23_spill] sm:$0xff] %v5118_v62  ;;  %6726 = vst [vmem:[#allocation30_spill] sm:$0xff] %v5138_v52  ;;  %v5144_v59 = vadd.f32 %v351_v57, %v5107_v51  ;;  %v5233_v52 = vld [vmem:[#allocation8 + $0xa8] ss:$12 sps:$4 sm:$0xff]  }
 0x157   :  { %6727 = vst [vmem:[#allocation31_spill] sm:$0xff] %v5141_v56  ;;  %v5245_v62 = vld [vmem:[#allocation10 + $0x8] ss:$12 sps:$4 sm:$0xff]   ;;  %6738 = vst [vmem:[#allocation40_spill] sm:$0xff] %v5248_v58 }
 0x158   :  { %v279_v4 = vpop.f32.mrb[8].mxu0  ;;  %6728 = vst [vmem:[#allocation32_spill] sm:$0xff] %v5144_v59  ;;  %6737 = vst [vmem:[#allocation39_spill] sm:$0xff] %v5245_v62 }
 0x159   :  { %v5126_v6 = vadd.f32 %v279_v4, %v162_v43  ;;  %v281_v11 = vpop.f32.mrb[9].mxu0  ;;  %6740 = vst [vmem:[#allocation42_spill] sm:$0xff] %v5255_v55 }
 0x15a   :  { %v5128_v12 = vadd.f32 %v281_v11, %v166_v45  ;;  %v283_v14 = vpop.f32.mrb[10].mxu0 }
 0x15b   :  { %6721 = vst [vmem:[#allocation25_spill] sm:$0xff] %v5126_v6  ;;  %v5130_v26 = vadd.f32 %v283_v14, %v162_v43  ;;  %v285_v37 = vpop.f32.mrb[11].mxu0  ;;  %v5239_v6 = vld [vmem:[#allocation10 + $0x4] ss:$12 sps:$4 sm:$0xff]  }
 0x15c   :  { %6722 = vst [vmem:[#allocation26_spill] sm:$0xff] %v5128_v12  ;;  %v5135_v48 = vadd.f32 %v285_v37, %v166_v45  ;;  %v5235_v12 = vld [vmem:[#allocation8 + $0xb0] ss:$12 sps:$4 sm:$0xff]   ;;  %6735 = vst [vmem:[#allocation37_spill] sm:$0xff] %v5239_v6 }
 0x15d   :  { %6723 = vst [vmem:[#allocation27_spill] sm:$0xff] %v5130_v26  ;;  %v5229_v26 = vld [vmem:[#allocation8 + $0xac] ss:$12 sps:$4 sm:$0xff]  }
 0x15e   :  { %6725 = vst [vmem:[#allocation29_spill] sm:$0xff] %v5135_v48  ;;  %v5225_v48 = vld [vmem:[#allocation8 + $0x98] ss:$12 sps:$4 sm:$0xff]  }
 0x160   :  { %v289_v63 = vpop.f32.mrb[12].mxu0 }
 0x161   :  { %v5146_v2 = vadd.f32 %v289_v63, %v162_v43  ;;  %v291_v4 = vpop.f32.mrb[13].mxu0 }
 0x162   :  { %v5148_v11 = vadd.f32 %v291_v4, %v166_v45  ;;  %v293_v14 = vpop.f32.mrb[14].mxu0 }
 0x163   :  { %6729 = vst [vmem:[#allocation33_spill] sm:$0xff] %v5146_v2  ;;  %v5150_v19 = vadd.f32 %v293_v14, %v162_v43  ;;  %v295_v37 = vpop.f32.mrb[15].mxu0 }
 0x164   :  { %6730 = vst [vmem:[#allocation34_spill] sm:$0xff] %v5148_v11  ;;  %v5152_v46 = vadd.f32 %v295_v37, %v166_v45  ;;  %v5154_v37 = vld [vmem:[#allocation7] ss:$0 sm:$0xff] }
 0x165   :  { %6731 = vst [vmem:[#allocation35_spill] sm:$0xff] %v5150_v19 }
 0x166   :  { %6732 = vst [vmem:[#allocation36_spill] sm:$0xff] %v5152_v46  ;;  %v5223_v46 = vld [vmem:[#allocation8 + $0x90] ss:$12 sps:$4 sm:$0xff]  }
 0x168   :  { %v557_v54 = vpop.f32.mrb[16].mxu0 }
 0x169   :  { %v604_v39 = vadd.f32 %v557_v54, %v260_v49  ;;  %v559_v0 = vpop.f32.mrb[17].mxu0  ;;  %v5166_v54 = vld [vmem:[#allocation8 + $0x1c] ss:$12 sps:$4 sm:$0xff]  }
 0x16a   :  { %v611_v16 = vadd.f32 %v559_v0, %v262_v41  ;;  %v561_v57 = vpop.f32.mrb[18].mxu0  ;;  %v598_v63 = vpop.f32.mrb[8].mxu1  ;;  %v333_v0 = vadd.f32 %v332_v61, %v5107_v51  ;;  %v5170_v51 = vld [vmem:[#allocation8 + $0x18] ss:$12 sps:$4 sm:$0xff]   ;;  %v5172_v61 = vld [vmem:[#allocation8 + $0x20] ss:$12 sps:$4 sm:$0xff]  }
 0x16b   :  { %v3311_v56 = vmul.f32 -1.442695, %v604_v39  ;;  %v562_v40 = vpop.f32.mrb[19].mxu0  ;;  %v3658_v2 = vpop.f32.mrb[9].mxu1  ;;  %v618_v42 = vadd.f32 %v5154_v37, %v598_v63  ;;  %v6733_v57 = vmov 0.0  }
 0x16c   :  { %v601_v4 = vpop.f32.mrb[10].mxu1  ;;  %v3312_v11 = vmul.f32 -1.442695, %v611_v16  ;;  %v5160_v2 = vld [vmem:[#allocation8] ss:$12 sps:$4 sm:$0xff]  }
 0x16d   :  { %4312 = vpow2.f32 %v3311_v56  ;;  %v3659_v59 = vpop.f32.mrb[11].mxu1  ;;  %v5176_v63 = vld [vmem:[#allocation8 + $0x34] ss:$12 sps:$4 sm:$0xff]   ;;  %v6734_v4 = vmov 0  }
 0x16e   :  { %4314 = vpow2.f32 %v3312_v11  ;;  %v5162_v11 = vld [vmem:[#allocation8 + $0x8] ss:$12 sps:$4 sm:$0xff]  }
 0x177   :  { %v4313_v14 = vpop.eup %4312 }
 0x178   :  { %v608_v19 = vadd.f32 1.0, %v4313_v14  ;;  %v4315_v43 = vpop.eup %4314  ;;  %v5183_v14 = vld [vmem:[#allocation8 + $0x30] ss:$12 sps:$4 sm:$0xff]  }
 0x179   :  { %v615_v41 = vadd.f32 1.0, %v4315_v43  ;;  %v5189_v43 = vld [vmem:[#allocation8 + $0x4c] ss:$12 sps:$4 sm:$0xff]  }
 0x17a   :  { %4316 = vrcp.f32 %v608_v19 }
 0x184   :  { %v4317_v44 = vpop.eup %4316 }
 0x185   :  { %v619_v39 = vmul.f32 %v4317_v44, %v618_v42  ;;  %v5185_v42 = vld [vmem:[#allocation8 + $0x38] ss:$12 sps:$4 sm:$0xff]   ;;  %v5193_v44 = vld [vmem:[#allocation8 + $0x48] ss:$12 sps:$4 sm:$0xff]  }
 0x187   :  { %v620_v45 = vadd.f32 %v619_v39, %v333_v0  ;;  %v5195_v0 = vld [vmem:[#allocation8 + $0x50] ss:$12 sps:$4 sm:$0xff]  }
 0x188   :  { %v5199_v39 = vld [vmem:[#allocation8 + $0x64] ss:$12 sps:$4 sm:$0xff]  }
 0x189   :  { %4318 = vtanh.f32 %v620_v45  ;;  %v5205_v45 = vld [vmem:[#allocation8 + $0x68] ss:$12 sps:$4 sm:$0xff]  }
 0x18a   :  { %4320 = vrcp.f32 %v615_v41  ;;  %v5203_v41 = vld [vmem:[#allocation8 + $0x60] ss:$12 sps:$4 sm:$0xff]  }
 0x193   :  { %v4319_v49 = vpop.eup %4318 }
 0x194   :  { %v622_v16 = vsub.f32 0.0, %v4319_v49  ;;  %v4321_v40 = vpop.eup %4320 }
 0x196   :  { %v623_v56 = vmul.f32 %v4321_v40, %v622_v16  ;;  %v5213_v16 = vld [vmem:[#allocation8 + $0x78] ss:$12 sps:$4 sm:$0xff]   ;;  %v5215_v40 = vld [vmem:[#allocation8 + $0x80] ss:$12 sps:$4 sm:$0xff]  }
 0x198   :  { %v5158_v59 = vadd.f32 %v4319_v49, %v623_v56  ;;  %v5209_v49 = vld [vmem:[#allocation8 + $0x7c] ss:$12 sps:$4 sm:$0xff]   ;;  %v5219_v56 = vld [vmem:[#allocation8 + $0x94] ss:$12 sps:$4 sm:$0xff]  }
 0x19a   :  { %v625_v19 = vpack.c.bf16 %v5158_v59, %v5158_v59 }
 0x19c   :  { %659 = vmatmul.mubr.bf16.vlgmr.msra.gmra.mrb[20].mxu0 %v625_v19  ;;  %3677 = vmatmul.mubr.bf16.vlgmr.msra.gmra.mrb[12].mxu1 %v625_v19 }
 0x19d   :  { %889 = vmatpush1.bf16.msra.mxu0 %v5160_v2  ;;  %3681 = vmatpush3.bf16.msra.mxu1 %v5162_v11 }
 0x19e   :  { %890 = vmatprep.subr.bf16.mxu0 %v5166_v54  ;;  %3682 = vmatprep.subr.bf16.mxu1 %v6733_v57 }
 0x19f   :  { %920 = vmatprep.mubr.bf16.mxu0 %v6734_v4  ;;  %3696 = vmatprep.mubr.msk.bf16.mxu1 %vm4794_vm2, %v6733_v57 }
 0x1a1   :  { %891 = vmatpush1.bf16.msra.mxu0 %v5170_v51  ;;  %3683 = vmatpush3.bf16.msra.mxu1 %v5172_v61 }
 0x1a2   :  { %892 = vmatprep.subr.bf16.mxu0 %v5176_v63  ;;  %3684 = vmatprep.subr.bf16.mxu1 %v6733_v57 }
 0x1a5   :  { %893 = vmatpush1.bf16.msra.mxu0 %v5183_v14  ;;  %3685 = vmatpush3.bf16.msra.mxu1 %v5185_v42 }
 0x1a6   :  { %894 = vmatprep.subr.bf16.mxu0 %v5189_v43  ;;  %3686 = vmatprep.subr.bf16.mxu1 %v6733_v57 }
 0x1a9   :  { %895 = vmatpush1.bf16.msra.mxu0 %v5193_v44  ;;  %3687 = vmatpush3.bf16.msra.mxu1 %v5195_v0 }
 0x1aa   :  { %896 = vmatprep.subr.bf16.mxu0 %v5199_v39  ;;  %3688 = vmatprep.subr.bf16.mxu1 %v6733_v57 }
 0x1ad   :  { %897 = vmatpush1.bf16.msra.mxu0 %v5203_v41  ;;  %3689 = vmatpush3.bf16.msra.mxu1 %v5205_v45 }
 0x1ae   :  { %898 = vmatprep.subr.bf16.mxu0 %v5209_v49  ;;  %3690 = vmatprep.subr.bf16.mxu1 %v6733_v57 }
 0x1b1   :  { %899 = vmatpush1.bf16.msra.mxu0 %v5213_v16  ;;  %3691 = vmatpush3.bf16.msra.mxu1 %v5215_v40 }
 0x1b2   :  { %900 = vmatprep.subr.bf16.mxu0 %v5219_v56  ;;  %3692 = vmatprep.subr.bf16.mxu1 %v6733_v57 }
 0x1b5   :  { %901 = vmatpush1.bf16.msra.mxu0 %v5223_v46  ;;  %3693 = vmatpush3.bf16.msra.mxu1 %v5225_v48 }
 0x1b6   :  { %902 = vmatprep.subr.bf16.mxu0 %v5229_v26  ;;  %3694 = vmatprep.subr.bf16.mxu1 %v6733_v57 }
 0x1b9   :  { %903 = vmatpush1.bf16.msra.mxu0 %v5233_v52  ;;  %3695 = vmatpush3.bf16.msra.mxu1 %v5235_v12 }
 0x1ba   :  { %1129 = vmatprep.subr.bf16.mxu0 %v5239_v6  ;;  %3700 = vmatprep.subr.bf16.mxu1 %v6733_v57  ;;  %v5278_v6 = vld [vmem:[#allocation10 + $0x50] ss:$12 sps:$4 sm:$0xff]  }
 0x1bb   :  { %6746 = vst [vmem:[#allocation48_spill] sm:$0xff] %v5278_v6 }
 0x1bc   :  { %921 = vmatmul.mubr.bf16.vlgmr.msra.gmra.mrb[24].mxu0 %v625_v19  ;;  %3697 = vmatmul.mubr.bf16.vlgmr.msra.gmra.mrb[16].mxu1 %v625_v19  ;;  %v5265_v19 = vld [vmem:[#allocation10 + $0x30] ss:$12 sps:$4 sm:$0xff]  }
 0x1bd   :  { %1130 = vmatpush1.bf16.msra.mxu0 %v5243_v1  ;;  %3701 = vmatpush3.bf16.msra.mxu1 %v5245_v62  ;;  %6742 = vst [vmem:[#allocation44_spill] sm:$0xff] %v5265_v19  ;;  %v5268_v62 = vld [vmem:[#allocation10 + $0x38] ss:$12 sps:$4 sm:$0xff]   ;;  %v5275_v1 = vld [vmem:[#allocation10 + $0x48] ss:$12 sps:$4 sm:$0xff]  }
 0x1be   :  { %1131 = vmatprep.subr.bf16.mxu0 %v5248_v58  ;;  %3702 = vmatprep.subr.bf16.mxu1 %v6733_v57  ;;  %6743 = vst [vmem:[#allocation45_spill] sm:$0xff] %v5268_v62  ;;  %v5271_v58 = vld [vmem:[#allocation10 + $0x4c] ss:$12 sps:$4 sm:$0xff]   ;;  %6745 = vst [vmem:[#allocation47_spill] sm:$0xff] %v5275_v1 }
 0x1bf   :  { %1161 = vmatprep.mubr.bf16.mxu0 %v6734_v4  ;;  %3716 = vmatprep.mubr.msk.bf16.mxu1 %vm4794_vm2, %v6733_v57  ;;  %6744 = vst [vmem:[#allocation46_spill] sm:$0xff] %v5271_v58 }
 0x1c1   :  { %1132 = vmatpush1.bf16.msra.mxu0 %v5252_v60  ;;  %3703 = vmatpush3.bf16.msra.mxu1 %v5255_v55  ;;  %v5281_v60 = vld [vmem:[#allocation10 + $0x64] ss:$12 sps:$4 sm:$0xff]   ;;  %v5288_v55 = vld [vmem:[#allocation10 + $0x68] ss:$12 sps:$4 sm:$0xff]  }
 0x1c2   :  { %1133 = vmatprep.subr.bf16.mxu0 %v5258_v53  ;;  %3704 = vmatprep.subr.bf16.mxu1 %v6733_v57  ;;  %6747 = vst [vmem:[#allocation49_spill] sm:$0xff] %v5281_v60  ;;  %v5285_v53 = vld [vmem:[#allocation10 + $0x60] ss:$12 sps:$4 sm:$0xff]   ;;  %6749 = vst [vmem:[#allocation51_spill] sm:$0xff] %v5288_v55 }
 0x1c3   :  { %6748 = vst [vmem:[#allocation50_spill] sm:$0xff] %v5285_v53 }
 0x1c5   :  { %1134 = vmatpush1.bf16.msra.mxu0 %v5265_v19  ;;  %3705 = vmatpush3.bf16.msra.mxu1 %v5268_v62  ;;  %v5291_v19 = vld [vmem:[#allocation10 + $0x7c] ss:$12 sps:$4 sm:$0xff]   ;;  %v5298_v62 = vld [vmem:[#allocation10 + $0x80] ss:$12 sps:$4 sm:$0xff]  }
 0x1c6   :  { %1135 = vmatprep.subr.bf16.mxu0 %v5271_v58  ;;  %3706 = vmatprep.subr.bf16.mxu1 %v6733_v57  ;;  %6750 = vst [vmem:[#allocation52_spill] sm:$0xff] %v5291_v19  ;;  %v5295_v58 = vld [vmem:[#allocation10 + $0x78] ss:$12 sps:$4 sm:$0xff]   ;;  %6752 = vst [vmem:[#allocation54_spill] sm:$0xff] %v5298_v62 }
 0x1c7   :  { %6751 = vst [vmem:[#allocation53_spill] sm:$0xff] %v5295_v58 }
 0x1c9   :  { %1136 = vmatpush1.bf16.msra.mxu0 %v5275_v1  ;;  %3707 = vmatpush3.bf16.msra.mxu1 %v5278_v6  ;;  %v5301_v1 = vld [vmem:[#allocation10 + $0x94] ss:$12 sps:$4 sm:$0xff]   ;;  %v5308_v6 = vld [vmem:[#allocation10 + $0x98] ss:$12 sps:$4 sm:$0xff]  }
 0x1ca   :  { %1137 = vmatprep.subr.bf16.mxu0 %v5281_v60  ;;  %3708 = vmatprep.subr.bf16.mxu1 %v6733_v57  ;;  %6753 = vst [vmem:[#allocation55_spill] sm:$0xff] %v5301_v1  ;;  %v5305_v60 = vld [vmem:[#allocation10 + $0x90] ss:$12 sps:$4 sm:$0xff]   ;;  %6755 = vst [vmem:[#allocation57_spill] sm:$0xff] %v5308_v6 }
 0x1cb   :  { %6754 = vst [vmem:[#allocation56_spill] sm:$0xff] %v5305_v60 }
 0x1cd   :  { %1138 = vmatpush1.bf16.msra.mxu0 %v5285_v53  ;;  %3709 = vmatpush3.bf16.msra.mxu1 %v5288_v55  ;;  %v5311_v53 = vld [vmem:[#allocation10 + $0xac] ss:$12 sps:$4 sm:$0xff]   ;;  %v5318_v55 = vld [vmem:[#allocation10 + $0xb0] ss:$12 sps:$4 sm:$0xff]  }
 0x1ce   :  { %1139 = vmatprep.subr.bf16.mxu0 %v5291_v19  ;;  %3710 = vmatprep.subr.bf16.mxu1 %v6733_v57  ;;  %6756 = vst [vmem:[#allocation58_spill] sm:$0xff] %v5311_v53  ;;  %v5315_v19 = vld [vmem:[#allocation10 + $0xa8] ss:$12 sps:$4 sm:$0xff]   ;;  %6758 = vst [vmem:[#allocation60_spill] sm:$0xff] %v5318_v55 }
 0x1cf   :  { %6757 = vst [vmem:[#allocation59_spill] sm:$0xff] %v5315_v19 }
 0x1d1   :  { %1140 = vmatpush1.bf16.msra.mxu0 %v5295_v58  ;;  %3711 = vmatpush3.bf16.msra.mxu1 %v5298_v62 }
 0x1d2   :  { %1141 = vmatprep.subr.bf16.mxu0 %v5301_v1  ;;  %3712 = vmatprep.subr.bf16.mxu1 %v6733_v57 }
 0x1d5   :  { %1142 = vmatpush1.bf16.msra.mxu0 %v5305_v60  ;;  %3713 = vmatpush3.bf16.msra.mxu1 %v5308_v6 }
 0x1d6   :  { %1143 = vmatprep.subr.bf16.mxu0 %v5311_v53  ;;  %3714 = vmatprep.subr.bf16.mxu1 %v6733_v57 }
 0x1d9   :  { %1144 = vmatpush1.bf16.msra.mxu0 %v5315_v19  ;;  %3715 = vmatpush3.bf16.msra.mxu1 %v5318_v55 }
 0x1da   :  { %1232 = vmatprep.subr.bf16.mxu0 %v4941_v5  ;;  %3720 = vmatprep.subr.bf16.mxu1 %v6733_v57 }
 0x1dc   :  { %1162 = vmatmul.mubr.bf16.vlgmr.msra.gmra.mrb[24].mxu0 %v6734_v4  ;;  %3717 = vmatmul.mubr.bf16.vlgmr.msra.gmra.mrb[20].mxu1 %v6734_v4 }
 0x1dd   :  { %1233 = vmatpush1.bf16.msra.mxu0 %v4946_v7  ;;  %3721 = vmatpush3.bf16.msra.mxu1 %v4972_v17 }
 0x1de   :  { %1234 = vmatprep.subr.bf16.mxu0 %v4949_v8  ;;  %3722 = vmatprep.subr.bf16.mxu1 %v6733_v57 }
 0x1df   :  { %1264 = vmatprep.mubr.bf16.mxu0 %v6734_v4  ;;  %3736 = vmatprep.mubr.msk.bf16.mxu1 %vm4794_vm2, %v6733_v57 }
 0x1e1   :  { %1235 = vmatpush1.bf16.msra.mxu0 %v4953_v9  ;;  %3723 = vmatpush3.bf16.msra.mxu1 %v4986_v21 }
 0x1e2   :  { %1236 = vmatprep.subr.bf16.mxu0 %v4957_v10  ;;  %3724 = vmatprep.subr.bf16.mxu1 %v6733_v57 }
 0x1e5   :  { %1237 = vmatpush1.bf16.msra.mxu0 %v4962_v13  ;;  %3725 = vmatpush3.bf16.msra.mxu1 %v4999_v25 }
 0x1e6   :  { %1238 = vmatprep.subr.bf16.mxu0 %v4968_v15  ;;  %3726 = vmatprep.subr.bf16.mxu1 %v6733_v57 }
 0x1e9   :  { %1239 = vmatpush1.bf16.msra.mxu0 %v4975_v18  ;;  %3727 = vmatpush3.bf16.msra.mxu1 %v5010_v28 }
 0x1ea   :  { %1240 = vmatprep.subr.bf16.mxu0 %v4982_v20  ;;  %3728 = vmatprep.subr.bf16.mxu1 %v6733_v57 }
 0x1ed   :  { %1241 = vmatpush1.bf16.msra.mxu0 %v4991_v22  ;;  %3729 = vmatpush3.bf16.msra.mxu1 %v5023_v31 }
 0x1ee   :  { %1242 = vmatprep.subr.bf16.mxu0 %v4994_v23  ;;  %3730 = vmatprep.subr.bf16.mxu1 %v6733_v57 }
 0x1f1   :  { %1243 = vmatpush1.bf16.msra.mxu0 %v4996_v24  ;;  %3731 = vmatpush3.bf16.msra.mxu1 %v5033_v33 }
 0x1f2   :  { %1244 = vmatprep.subr.bf16.mxu0 %v5005_v27  ;;  %3732 = vmatprep.subr.bf16.mxu1 %v6733_v57 }
 0x1f5   :  { %1245 = vmatpush1.bf16.msra.mxu0 %v5014_v29  ;;  %3733 = vmatpush3.bf16.msra.mxu1 %v5039_v34 }
 0x1f6   :  { %1246 = vmatprep.subr.bf16.mxu0 %v5019_v30  ;;  %3734 = vmatprep.subr.bf16.mxu1 %v6733_v57 }
 0x1f9   :  { %1247 = vmatpush1.bf16.msra.mxu0 %v5026_v32  ;;  %3735 = vmatpush3.bf16.msra.mxu1 %v5045_v35 }
 0x1fa   :  { %1334 = vmatprep.subr.bf16.mxu0 %v5086_v36  ;;  %3740 = vmatprep.subr.bf16.mxu1 %v6733_v57 }
 0x26f   :  { %v660_v5 = vpop.f32.mrb[20].mxu0  ;;  %v701_v7 = vpop.f32.mrb[12].mxu1 }
 0x270   :  { %v707_v8 = vadd.f32 %v660_v5, %v5100_v47  ;;  %v662_v9 = vpop.f32.mrb[21].mxu0  ;;  %v3678_v10 = vpop.f32.mrb[13].mxu1  ;;  %v721_v27 = vadd.f32 %v5154_v37, %v701_v7 }
 0x271   :  { %v714_v13 = vadd.f32 %v662_v9, %v5103_v50  ;;  %v664_v15 = vpop.f32.mrb[22].mxu0  ;;  %v704_v17 = vpop.f32.mrb[14].mxu1 }
 0x272   :  { %v3313_v18 = vmul.f32 -1.442695, %v707_v8  ;;  %v665_v20 = vpop.f32.mrb[23].mxu0  ;;  %v3679_v21 = vpop.f32.mrb[15].mxu1 }
 0x273   :  { %v3314_v22 = vmul.f32 -1.442695, %v714_v13 }
 0x274   :  { %4322 = vpow2.f32 %v3313_v18 }
 0x275   :  { %4324 = vpow2.f32 %v3314_v22 }
 0x27e   :  { %v4323_v23 = vpop.eup %4322 }
 0x27f   :  { %v711_v24 = vadd.f32 1.0, %v4323_v23  ;;  %v4325_v25 = vpop.eup %4324 }
 0x280   :  { %v718_v31 = vadd.f32 1.0, %v4325_v25 }
 0x281   :  { %4326 = vrcp.f32 %v711_v24 }
 0x28b   :  { %v4327_v28 = vpop.eup %4326 }
 0x28c   :  { %v722_v29 = vmul.f32 %v4327_v28, %v721_v27 }
 0x28e   :  { %v723_v30 = vadd.f32 %v722_v29, %v5124_v3  ;;  %v116_v3 = vld [vmem:[%s6549_s7] sm:$0x7]  ;;  %v6760_v29 = vsub.s32 1, %v5089_v38 }
 0x28f   :  { %v5367_v32 = vpop.f32.mrb[16].mxu1 }
 0x290   :  { %4328 = vtanh.f32 %v723_v30  ;;  %v3698_v33 = vpop.f32.mrb[17].mxu1  ;;  %v5403_v30 = vrot.slane %v116_v3, %v6760_v29  ;;  %v6769_v29 = vld [vmem:[#allocation44_spill] sm:$0xff] }
 0x291   :  { %v966_v47 = vpop.f32.mrb[18].mxu1  ;;  %4330 = vrcp.f32 %v718_v31 }
 0x292   :  { %v3699_v50 = vpop.f32.mrb[19].mxu1 }
 0x29a   :  { %v4329_v5 = vpop.eup %4328 }
 0x29b   :  { %v725_v8 = vsub.f32 %v5158_v59, %v4329_v5  ;;  %v4331_v9 = vpop.eup %4330  ;;  %v6759_v59 = vsub.s32 0, %v5089_v38 }
 0x29d   :  { %v726_v10 = vmul.f32 %v4331_v9, %v725_v8  ;;  %v5392_v15 = vrot.slane %v116_v3, %v6759_v59  ;;  %v6762_v8 = vld [vmem:[#allocation38_spill] sm:$0xff]  ;;  %v6763_v9 = vld [vmem:[#allocation39_spill] sm:$0xff]  ;;  %v6764_v59 = vld [vmem:[#allocation40_spill] sm:$0xff] }
 0x29f   :  { %v5370_v13 = vadd.f32 %v4329_v5, %v726_v10  ;;  %v6761_v5 = vld [vmem:[#allocation37_spill] sm:$0xff] }
 0x2a0   :  { %v5424_v10 = vld [vmem:[#allocation11] ss:$0 sm:$0xff] }
 0x2a1   :  { %v1231_v7 = vpack.c.bf16 %v5370_v13, %v5370_v13 }
 0x2a3   :  { %1265 = vmatmul.mubr.bf16.vlgmr.msra.gmra.mrb[28].mxu0 %v1231_v7  ;;  %3737 = vmatmul.mubr.bf16.vlgmr.msra.gmra.mrb[24].mxu1 %v1231_v7 }
 0x2a4   :  { %1335 = vmatpush1.bf16.msra.mxu0 %v5160_v2  ;;  %3741 = vmatpush3.bf16.msra.mxu1 %v5162_v11 }
 0x2a5   :  { %1336 = vmatprep.subr.bf16.mxu0 %v5166_v54  ;;  %3742 = vmatprep.subr.bf16.mxu1 %v6733_v57 }
 0x2a6   :  { %1366 = vmatprep.mubr.bf16.mxu0 %v6734_v4  ;;  %3756 = vmatprep.mubr.msk.bf16.mxu1 %vm4794_vm2, %v6733_v57 }
 0x2a8   :  { %1337 = vmatpush1.bf16.msra.mxu0 %v5170_v51  ;;  %3743 = vmatpush3.bf16.msra.mxu1 %v5172_v61 }
 0x2a9   :  { %1338 = vmatprep.subr.bf16.mxu0 %v5176_v63  ;;  %3744 = vmatprep.subr.bf16.mxu1 %v6733_v57 }
 0x2ac   :  { %1339 = vmatpush1.bf16.msra.mxu0 %v5183_v14  ;;  %3745 = vmatpush3.bf16.msra.mxu1 %v5185_v42 }
 0x2ad   :  { %1340 = vmatprep.subr.bf16.mxu0 %v5189_v43  ;;  %3746 = vmatprep.subr.bf16.mxu1 %v6733_v57 }
 0x2af   :  { %v1163_v17 = vpop.f32.mrb[24].mxu0  ;;  %v1204_v18 = vpop.f32.mrb[20].mxu1 }
 0x2b0   :  { %v4140_v20 = vadd.f32 %v1163_v17, %v5392_v15  ;;  %v1165_v21 = vpop.f32.mrb[25].mxu0  ;;  %1341 = vmatpush1.bf16.msra.mxu0 %v5193_v44  ;;  %3747 = vmatpush3.bf16.msra.mxu1 %v5195_v0  ;;  %v3718_v22 = vpop.f32.mrb[21].mxu1  ;;  %v6765_v17 = vsub.s32 2, %v5089_v38  ;;  %v6770_v38 = vld [vmem:[#allocation45_spill] sm:$0xff] }
 0x2b1   :  { %v1167_v23 = vpop.f32.mrb[26].mxu0  ;;  %1342 = vmatprep.subr.bf16.mxu0 %v5199_v39  ;;  %3748 = vmatprep.subr.bf16.mxu1 %v6733_v57  ;;  %v1207_v24 = vpop.f32.mrb[22].mxu1  ;;  %v4141_v31 = vadd.f32 %v1165_v21, %v5403_v30  ;;  %v6766_v21 = vld [vmem:[#allocation41_spill] sm:$0xff]  ;;  %v6767_v22 = vld [vmem:[#allocation42_spill] sm:$0xff] }
 0x2b2   :  { %v3363_v25 = vmul.f32 -1.442695, %v4140_v20  ;;  %v1168_v27 = vpop.f32.mrb[27].mxu0  ;;  %v3719_v28 = vpop.f32.mrb[23].mxu1  ;;  %v5433_v20 = vrot.slane %v116_v3, %v6765_v17  ;;  %v6768_v23 = vld [vmem:[#allocation43_spill] sm:$0xff]  ;;  %v6771_v3 = vld [vmem:[#allocation46_spill] sm:$0xff] }
 0x2b3   :  { %v3364_v33 = vmul.f32 -1.442695, %v4141_v31  ;;  %v6776_v17 = vld [vmem:[#allocation51_spill] sm:$0xff] }
 0x2b4   :  { %4332 = vpow2.f32 %v3363_v25  ;;  %1343 = vmatpush1.bf16.msra.mxu0 %v5203_v41  ;;  %3749 = vmatpush3.bf16.msra.mxu1 %v5205_v45  ;;  %v964_v27 = vadd.f32 %v5367_v32, %v5433_v20  ;;  %v6775_v32 = vld [vmem:[#allocation50_spill] sm:$0xff] }
 0x2b5   :  { %1344 = vmatprep.subr.bf16.mxu0 %v5209_v49  ;;  %3750 = vmatprep.subr.bf16.mxu1 %v6733_v57  ;;  %4334 = vpow2.f32 %v3364_v33  ;;  %v6772_v33 = vld [vmem:[#allocation47_spill] sm:$0xff] }
 0x2b8   :  { %1345 = vmatpush1.bf16.msra.mxu0 %v5213_v16  ;;  %3751 = vmatpush3.bf16.msra.mxu1 %v5215_v40 }
 0x2b9   :  { %1346 = vmatprep.subr.bf16.mxu0 %v5219_v56  ;;  %3752 = vmatprep.subr.bf16.mxu1 %v6733_v57 }
 0x2bc   :  { %1347 = vmatpush1.bf16.msra.mxu0 %v5223_v46  ;;  %3753 = vmatpush3.bf16.msra.mxu1 %v5225_v48 }
 0x2bd   :  { %1348 = vmatprep.subr.bf16.mxu0 %v5229_v26  ;;  %3754 = vmatprep.subr.bf16.mxu1 %v6733_v57 }
 0x2be   :  { %v4333_v47 = vpop.eup %4332 }
 0x2bf   :  { %v1214_v50 = vadd.f32 1.0, %v4333_v47  ;;  %v4335_v24 = vpop.eup %4334  ;;  %v6773_v47 = vld [vmem:[#allocation48_spill] sm:$0xff] }
 0x2c0   :  { %1349 = vmatpush1.bf16.msra.mxu0 %v5233_v52  ;;  %3755 = vmatpush3.bf16.msra.mxu1 %v5235_v12 }
 0x2c1   :  { %4336 = vrcp.f32 %v1214_v50  ;;  %1416 = vmatprep.subr.bf16.mxu0 %v6761_v5  ;;  %3760 = vmatprep.subr.bf16.mxu1 %v6733_v57  ;;  %v6774_v50 = vld [vmem:[#allocation49_spill] sm:$0xff] }
 0x2c3   :  { %1367 = vmatmul.mubr.bf16.vlgmr.msra.gmra.mrb[32].mxu0 %v1231_v7  ;;  %3757 = vmatmul.mubr.bf16.vlgmr.msra.gmra.mrb[28].mxu1 %v1231_v7  ;;  %v1224_v7 = vadd.f32 %v5424_v10, %v1204_v18  ;;  %v1221_v18 = vadd.f32 1.0, %v4335_v24 }
 0x2c4   :  { %1417 = vmatpush1.bf16.msra.mxu0 %v6762_v8  ;;  %3761 = vmatpush3.bf16.msra.mxu1 %v6763_v9 }
 0x2c5   :  { %1418 = vmatprep.subr.bf16.mxu0 %v6764_v59  ;;  %3762 = vmatprep.subr.bf16.mxu1 %v6733_v57 }
 0x2c6   :  { %1448 = vmatprep.mubr.bf16.mxu0 %v6734_v4  ;;  %3776 = vmatprep.mubr.msk.bf16.mxu1 %vm4794_vm2, %v6733_v57 }
 0x2c8   :  { %1419 = vmatpush1.bf16.msra.mxu0 %v6766_v21  ;;  %3763 = vmatpush3.bf16.msra.mxu1 %v6767_v22 }
 0x2c9   :  { %1420 = vmatprep.subr.bf16.mxu0 %v6768_v23  ;;  %3764 = vmatprep.subr.bf16.mxu1 %v6733_v57 }
 0x2cb   :  { %v4337_v25 = vpop.eup %4336 }
 0x2cc   :  { %v1225_v28 = vmul.f32 %v4337_v25, %v1224_v7  ;;  %1421 = vmatpush1.bf16.msra.mxu0 %v6769_v29  ;;  %3765 = vmatpush3.bf16.msra.mxu1 %v6770_v38  ;;  %v6777_v7 = vld [vmem:[#allocation52_spill] sm:$0xff] }
 0x2cd   :  { %1422 = vmatprep.subr.bf16.mxu0 %v6771_v3  ;;  %3766 = vmatprep.subr.bf16.mxu1 %v6733_v57 }
 0x2ce   :  { %v1226_v31 = vadd.f32 %v1225_v28, %v964_v27 }
 0x2d0   :  { %4338 = vtanh.f32 %v1226_v31  ;;  %1423 = vmatpush1.bf16.msra.mxu0 %v6772_v33  ;;  %3767 = vmatpush3.bf16.msra.mxu1 %v6773_v47 }
 0x2d1   :  { %1424 = vmatprep.subr.bf16.mxu0 %v6774_v50  ;;  %3768 = vmatprep.subr.bf16.mxu1 %v6733_v57  ;;  %4340 = vrcp.f32 %v1221_v18 }
 0x2d4   :  { %1425 = vmatpush1.bf16.msra.mxu0 %v6775_v32  ;;  %3769 = vmatpush3.bf16.msra.mxu1 %v6776_v17 }
 0x2d5   :  { %1426 = vmatprep.subr.bf16.mxu0 %v6777_v7  ;;  %3770 = vmatprep.subr.bf16.mxu1 %v6733_v57 }
 0x2d8   :  { %1427 = vmatpush1.bf16.msra.mxu0 %v5295_v58  ;;  %3771 = vmatpush3.bf16.msra.mxu1 %v5298_v62 }
 0x2d9   :  { %1428 = vmatprep.subr.bf16.mxu0 %v5301_v1  ;;  %3772 = vmatprep.subr.bf16.mxu1 %v6733_v57  ;;  %v5468_v1 = vld [vmem:[#allocation5 + $0x4] ss:$12 sps:$4 sm:$0xff]  }
 0x2da   :  { %v4339_v24 = vpop.eup %4338  ;;  %6779 = vst [vmem:[#allocation38_spill] sm:$0xff] %v5468_v1 }
 0x2db   :  { %v1228_v25 = vsub.f32 0.0, %v4339_v24  ;;  %v4341_v27 = vpop.eup %4340 }
 0x2dc   :  { %1429 = vmatpush1.bf16.msra.mxu0 %v5305_v60  ;;  %3773 = vmatpush3.bf16.msra.mxu1 %v5308_v6 }
 0x2dd   :  { %1430 = vmatprep.subr.bf16.mxu0 %v5311_v53  ;;  %3774 = vmatprep.subr.bf16.mxu1 %v6733_v57  ;;  %v1229_v28 = vmul.f32 %v4341_v27, %v1228_v25  ;;  %v5472_v53 = vld [vmem:[#allocation5] ss:$12 sps:$4 sm:$0xff]   ;;  %v5478_v25 = vld [vmem:[#allocation5 + $0x1c] ss:$12 sps:$4 sm:$0xff]   ;;  %v5485_v27 = vld [vmem:[#allocation5 + $0x18] ss:$12 sps:$4 sm:$0xff]  }
 0x2de   :  { %6780 = vst [vmem:[#allocation39_spill] sm:$0xff] %v5472_v53  ;;  %6782 = vst [vmem:[#allocation41_spill] sm:$0xff] %v5478_v25 }
 0x2df   :  { %v5462_v18 = vadd.f32 %v4339_v24, %v1229_v28  ;;  %v5475_v24 = vld [vmem:[#allocation5 + $0x8] ss:$12 sps:$4 sm:$0xff]   ;;  %6783 = vst [vmem:[#allocation42_spill] sm:$0xff] %v5485_v27  ;;  %v5488_v28 = vld [vmem:[#allocation5 + $0x20] ss:$12 sps:$4 sm:$0xff]  }
 0x2e0   :  { %1431 = vmatpush1.bf16.msra.mxu0 %v5315_v19  ;;  %3775 = vmatpush3.bf16.msra.mxu1 %v5318_v55  ;;  %6781 = vst [vmem:[#allocation40_spill] sm:$0xff] %v5475_v24  ;;  %6784 = vst [vmem:[#allocation43_spill] sm:$0xff] %v5488_v28  ;;  %v6802_v55 = vld [vmem:[#allocation20_spill] sm:$0xff] }
 0x2e1   :  { %6778 = vst [vmem:[#allocation37_spill] sm:$0xff] %v5462_v18  ;;  %v1415_v31 = vpack.c.bf16 %v5462_v18, %v5462_v18  ;;  %1519 = vmatprep.subr.bf16.mxu0 %v5468_v1  ;;  %3780 = vmatprep.subr.bf16.mxu1 %v6733_v57 }
 0x2e3   :  { %1449 = vmatmul.mubr.bf16.vlgmr.msra.gmra.mrb[32].mxu0 %v1415_v31  ;;  %3777 = vmatmul.mubr.bf16.vlgmr.msra.gmra.mrb[32].mxu1 %v1415_v31  ;;  %v5491_v31 = vld [vmem:[#allocation5 + $0x34] ss:$12 sps:$4 sm:$0xff]  }
 0x2e4   :  { %1520 = vmatpush1.bf16.msra.mxu0 %v5472_v53  ;;  %3781 = vmatpush3.bf16.msra.mxu1 %v5475_v24  ;;  %6785 = vst [vmem:[#allocation44_spill] sm:$0xff] %v5491_v31  ;;  %v5498_v24 = vld [vmem:[#allocation5 + $0x38] ss:$12 sps:$4 sm:$0xff]  }
 0x2e5   :  { %1521 = vmatprep.subr.bf16.mxu0 %v5478_v25  ;;  %3782 = vmatprep.subr.bf16.mxu1 %v6733_v57  ;;  %v5495_v25 = vld [vmem:[#allocation5 + $0x30] ss:$12 sps:$4 sm:$0xff]   ;;  %6787 = vst [vmem:[#allocation46_spill] sm:$0xff] %v5498_v24  ;;  %v5501_v53 = vld [vmem:[#allocation5 + $0x4c] ss:$12 sps:$4 sm:$0xff]  }
 0x2e6   :  { %1551 = vmatprep.mubr.bf16.mxu0 %v6734_v4  ;;  %3796 = vmatprep.mubr.msk.bf16.mxu1 %vm4794_vm2, %v6733_v57  ;;  %6786 = vst [vmem:[#allocation45_spill] sm:$0xff] %v5495_v25  ;;  %6788 = vst [vmem:[#allocation47_spill] sm:$0xff] %v5501_v53 }
 0x2e8   :  { %1522 = vmatpush1.bf16.msra.mxu0 %v5485_v27  ;;  %3783 = vmatpush3.bf16.msra.mxu1 %v5488_v28  ;;  %v5505_v28 = vld [vmem:[#allocation5 + $0x48] ss:$12 sps:$4 sm:$0xff]   ;;  %v5511_v27 = vld [vmem:[#allocation5 + $0x64] ss:$12 sps:$4 sm:$0xff]  }
 0x2e9   :  { %1523 = vmatprep.subr.bf16.mxu0 %v5491_v31  ;;  %3784 = vmatprep.subr.bf16.mxu1 %v6733_v57  ;;  %6789 = vst [vmem:[#allocation48_spill] sm:$0xff] %v5505_v28  ;;  %v5508_v31 = vld [vmem:[#allocation5 + $0x50] ss:$12 sps:$4 sm:$0xff]   ;;  %6791 = vst [vmem:[#allocation61_spill] sm:$0xff] %v5511_v27 }
 0x2ea   :  { %6790 = vst [vmem:[#allocation49_spill] sm:$0xff] %v5508_v31 }
 0x2ec   :  { %1524 = vmatpush1.bf16.msra.mxu0 %v5495_v25  ;;  %3785 = vmatpush3.bf16.msra.mxu1 %v5498_v24  ;;  %v5515_v24 = vld [vmem:[#allocation5 + $0x60] ss:$12 sps:$4 sm:$0xff]   ;;  %v5521_v25 = vld [vmem:[#allocation5 + $0x7c] ss:$12 sps:$4 sm:$0xff]  }
 0x2ed   :  { %1525 = vmatprep.subr.bf16.mxu0 %v5501_v53  ;;  %3786 = vmatprep.subr.bf16.mxu1 %v6733_v57  ;;  %6792 = vst [vmem:[#allocation62_spill] sm:$0xff] %v5515_v24  ;;  %v5518_v53 = vld [vmem:[#allocation5 + $0x68] ss:$12 sps:$4 sm:$0xff]   ;;  %6794 = vst [vmem:[#allocation64_spill] sm:$0xff] %v5521_v25 }
 0x2ee   :  { %6793 = vst [vmem:[#allocation63_spill] sm:$0xff] %v5518_v53 }
 0x2f0   :  { %1526 = vmatpush1.bf16.msra.mxu0 %v5505_v28  ;;  %3787 = vmatpush3.bf16.msra.mxu1 %v5508_v31  ;;  %v5525_v31 = vld [vmem:[#allocation5 + $0x78] ss:$12 sps:$4 sm:$0xff]   ;;  %v5531_v28 = vld [vmem:[#allocation5 + $0x94] ss:$12 sps:$4 sm:$0xff]  }
 0x2f1   :  { %1527 = vmatprep.subr.bf16.mxu0 %v5511_v27  ;;  %3788 = vmatprep.subr.bf16.mxu1 %v6733_v57  ;;  %6795 = vst [vmem:[#allocation65_spill] sm:$0xff] %v5525_v31  ;;  %v5528_v27 = vld [vmem:[#allocation5 + $0x80] ss:$12 sps:$4 sm:$0xff]   ;;  %6797 = vst [vmem:[#allocation67_spill] sm:$0xff] %v5531_v28 }
 0x2f2   :  { %6796 = vst [vmem:[#allocation66_spill] sm:$0xff] %v5528_v27 }
 0x2f4   :  { %1528 = vmatpush1.bf16.msra.mxu0 %v5515_v24  ;;  %3789 = vmatpush3.bf16.msra.mxu1 %v5518_v53  ;;  %v5535_v53 = vld [vmem:[#allocation5 + $0x90] ss:$12 sps:$4 sm:$0xff]  }
 0x2f5   :  { %1529 = vmatprep.subr.bf16.mxu0 %v5521_v25  ;;  %3790 = vmatprep.subr.bf16.mxu1 %v6733_v57  ;;  %6798 = vst [vmem:[#allocation68_spill] sm:$0xff] %v5535_v53  ;;  %v5539_v25 = vld [vmem:[#allocation5 + $0xac] ss:$12 sps:$4 sm:$0xff]  }
 0x2f6   :  { %6799 = vst [vmem:[#allocation69_spill] sm:$0xff] %v5539_v25 }
 0x2f8   :  { %1530 = vmatpush1.bf16.msra.mxu0 %v5525_v31  ;;  %3791 = vmatpush3.bf16.msra.mxu1 %v5528_v27  ;;  %v5543_v31 = vld [vmem:[#allocation5 + $0xa8] ss:$12 sps:$4 sm:$0xff]   ;;  %v6801_v27 = vld [vmem:[#allocation19_spill] sm:$0xff] }
 0x2f9   :  { %1531 = vmatprep.subr.bf16.mxu0 %v5531_v28  ;;  %3792 = vmatprep.subr.bf16.mxu1 %v6733_v57  ;;  %6800 = vst [vmem:[#allocation70_spill] sm:$0xff] %v5543_v31 }
 0x2fc   :  { %1532 = vmatpush1.bf16.msra.mxu0 %v5535_v53  ;;  %3793 = vmatpush3.bf16.msra.mxu1 %v5039_v34 }
 0x2fd   :  { %1533 = vmatprep.subr.bf16.mxu0 %v5539_v25  ;;  %3794 = vmatprep.subr.bf16.mxu1 %v6733_v57 }
 0x300   :  { %1534 = vmatpush1.bf16.msra.mxu0 %v5543_v31  ;;  %3795 = vmatpush3.bf16.msra.mxu1 %v5045_v35 }
 0x301   :  { %1621 = vmatprep.subr.bf16.mxu0 %v5086_v36  ;;  %3800 = vmatprep.subr.bf16.mxu1 %v6733_v57 }
 0x376   :  { %v1266_v28 = vpop.f32.mrb[28].mxu0  ;;  %v1307_v53 = vpop.f32.mrb[24].mxu1 }
 0x377   :  { %v1313_v34 = vadd.f32 %v1266_v28, %v6801_v27  ;;  %v1268_v24 = vpop.f32.mrb[29].mxu0  ;;  %v3738_v1 = vpop.f32.mrb[25].mxu1  ;;  %v1327_v7 = vadd.f32 %v5154_v37, %v1307_v53  ;;  %v6803_v28 = vld [vmem:[#allocation22_spill] sm:$0xff] }
 0x378   :  { %v1320_v25 = vadd.f32 %v1268_v24, %v6802_v55  ;;  %v1270_v19 = vpop.f32.mrb[30].mxu0  ;;  %v1310_v6 = vpop.f32.mrb[26].mxu1 }
 0x379   :  { %v3365_v60 = vmul.f32 -1.442695, %v1313_v34  ;;  %v1271_v18 = vpop.f32.mrb[31].mxu0  ;;  %v3739_v62 = vpop.f32.mrb[27].mxu1  ;;  %v6819_v34 = vld [vmem:[#allocation41_spill] sm:$0xff] }
 0x37a   :  { %v3366_v31 = vmul.f32 -1.442695, %v1320_v25 }
 0x37b   :  { %4342 = vpow2.f32 %v3365_v60 }
 0x37c   :  { %4344 = vpow2.f32 %v3366_v31  ;;  %v6818_v31 = vld [vmem:[#allocation40_spill] sm:$0xff] }
 0x385   :  { %v4343_v35 = vpop.eup %4342 }
 0x386   :  { %v1317_v58 = vadd.f32 1.0, %v4343_v35  ;;  %v4345_v36 = vpop.eup %4344  ;;  %v6820_v35 = vld [vmem:[#allocation42_spill] sm:$0xff] }
 0x387   :  { %v1324_v32 = vadd.f32 1.0, %v4345_v36  ;;  %v6821_v36 = vld [vmem:[#allocation43_spill] sm:$0xff] }
 0x388   :  { %4346 = vrcp.f32 %v1317_v58 }
 0x392   :  { %v4347_v17 = vpop.eup %4346 }
 0x393   :  { %v1328_v27 = vmul.f32 %v4347_v17, %v1327_v7  ;;  %v6816_v17 = vld [vmem:[#allocation38_spill] sm:$0xff]  ;;  %v6817_v7 = vld [vmem:[#allocation39_spill] sm:$0xff] }
 0x395   :  { %v1329_v1 = vadd.f32 %v1328_v27, %v6803_v28  ;;  %v6822_v27 = vld [vmem:[#allocation44_spill] sm:$0xff]  ;;  %v6823_v28 = vld [vmem:[#allocation45_spill] sm:$0xff] }
 0x396   :  { %v5553_v55 = vpop.f32.mrb[28].mxu1 }
 0x397   :  { %4348 = vtanh.f32 %v1329_v1  ;;  %v3758_v6 = vpop.f32.mrb[29].mxu1  ;;  %v6824_v1 = vld [vmem:[#allocation46_spill] sm:$0xff] }
 0x398   :  { %v1412_v19 = vpop.f32.mrb[30].mxu1  ;;  %4350 = vrcp.f32 %v1324_v32  ;;  %v6826_v6 = vld [vmem:[#allocation48_spill] sm:$0xff] }
 0x399   :  { %v3759_v60 = vpop.f32.mrb[31].mxu1  ;;  %v6827_v19 = vld [vmem:[#allocation49_spill] sm:$0xff] }
 0x39a   :  { %v6828_v60 = vld [vmem:[#allocation61_spill] sm:$0xff] }
 0x3a1   :  { %v4349_v62 = vpop.eup %4348 }
 0x3a2   :  { %v1331_v18 = vsub.f32 %v5370_v13, %v4349_v62  ;;  %v4351_v24 = vpop.eup %4350  ;;  %v6807_v13 = vld [vmem:[#allocation53_spill] sm:$0xff] }
 0x3a4   :  { %v1332_v58 = vmul.f32 %v4351_v24, %v1331_v18  ;;  %v6830_v18 = vld [vmem:[#allocation63_spill] sm:$0xff]  ;;  %v6831_v24 = vld [vmem:[#allocation64_spill] sm:$0xff] }
 0x3a6   :  { %v5556_v25 = vadd.f32 %v4349_v62, %v1332_v58  ;;  %v6829_v62 = vld [vmem:[#allocation62_spill] sm:$0xff]  ;;  %v6832_v58 = vld [vmem:[#allocation65_spill] sm:$0xff] }
 0x3a8   :  { %v1518_v53 = vpack.c.bf16 %v5556_v25, %v5556_v25 }
 0x3aa   :  { %1552 = vmatmul.mubr.bf16.vlgmr.msra.gmra.mrb[36].mxu0 %v1518_v53  ;;  %3797 = vmatmul.mubr.bf16.vlgmr.msra.gmra.mrb[36].mxu1 %v1518_v53 }
 0x3ab   :  { %1622 = vmatpush1.bf16.msra.mxu0 %v5160_v2  ;;  %3801 = vmatpush3.bf16.msra.mxu1 %v5162_v11 }
 0x3ac   :  { %1623 = vmatprep.subr.bf16.mxu0 %v5166_v54  ;;  %3802 = vmatprep.subr.bf16.mxu1 %v6733_v57 }
 0x3ad   :  { %1653 = vmatprep.mubr.bf16.mxu0 %v6734_v4  ;;  %3816 = vmatprep.mubr.msk.bf16.mxu1 %vm4794_vm2, %v6733_v57 }
 0x3af   :  { %1624 = vmatpush1.bf16.msra.mxu0 %v5170_v51  ;;  %3803 = vmatpush3.bf16.msra.mxu1 %v5172_v61 }
 0x3b0   :  { %1625 = vmatprep.subr.bf16.mxu0 %v5176_v63  ;;  %3804 = vmatprep.subr.bf16.mxu1 %v6733_v57 }
 0x3b3   :  { %1626 = vmatpush1.bf16.msra.mxu0 %v5183_v14  ;;  %3805 = vmatpush3.bf16.msra.mxu1 %v5185_v42 }
 0x3b4   :  { %1627 = vmatprep.subr.bf16.mxu0 %v5189_v43  ;;  %3806 = vmatprep.subr.bf16.mxu1 %v6733_v57 }
 0x3b6   :  { %v1450_v37 = vpop.f32.mrb[32].mxu0  ;;  %v1491_v2 = vpop.f32.mrb[32].mxu1 }
 0x3b7   :  { %v4142_v11 = vadd.f32 %v1450_v37, %v5392_v15  ;;  %v1452_v54 = vpop.f32.mrb[33].mxu0  ;;  %v3778_v51 = vpop.f32.mrb[33].mxu1  ;;  %1628 = vmatpush1.bf16.msra.mxu0 %v5193_v44  ;;  %3807 = vmatpush3.bf16.msra.mxu1 %v5195_v0  ;;  %v6834_v37 = vld [vmem:[#allocation67_spill] sm:$0xff] }
 0x3b8   :  { %v1454_v61 = vpop.f32.mrb[34].mxu0  ;;  %v1494_v63 = vpop.f32.mrb[34].mxu1  ;;  %1629 = vmatprep.subr.bf16.mxu0 %v5199_v39  ;;  %3808 = vmatprep.subr.bf16.mxu1 %v6733_v57  ;;  %v4143_v44 = vadd.f32 %v1452_v54, %v5403_v30  ;;  %v6836_v54 = vld [vmem:[#allocation69_spill] sm:$0xff]  ;;  %v6837_v51 = vld [vmem:[#allocation70_spill] sm:$0xff] }
 0x3b9   :  { %v3367_v14 = vmul.f32 -1.442695, %v4142_v11  ;;  %v1455_v42 = vpop.f32.mrb[35].mxu0  ;;  %v3779_v43 = vpop.f32.mrb[35].mxu1  ;;  %v5668_v11 = vld [vmem:[#allocation5 + $0x98] ss:$12 sps:$4 sm:$0xff]  }
 0x3ba   :  { %v3368_v0 = vmul.f32 -1.442695, %v4143_v44  ;;  %v5674_v61 = vld [vmem:[#allocation5 + $0xb0] ss:$12 sps:$4 sm:$0xff]  }
 0x3bb   :  { %4352 = vpow2.f32 %v3367_v14  ;;  %1630 = vmatpush1.bf16.msra.mxu0 %v5203_v41  ;;  %3809 = vmatpush3.bf16.msra.mxu1 %v5205_v45  ;;  %v5677_v63 = vld [vmem:[#allocation8 + $0x4] ss:$12 sps:$4 sm:$0xff]   ;;  %v6838_v43 = vld [vmem:[#allocation21_spill] sm:$0xff] }
 0x3bc   :  { %1631 = vmatprep.subr.bf16.mxu0 %v5209_v49  ;;  %3810 = vmatprep.subr.bf16.mxu1 %v6733_v57  ;;  %4354 = vpow2.f32 %v3368_v0 }
 0x3bf   :  { %1632 = vmatpush1.bf16.msra.mxu0 %v5213_v16  ;;  %3811 = vmatpush3.bf16.msra.mxu1 %v5215_v40  ;;  %v6804_v16 = vld [vmem:[#allocation50_spill] sm:$0xff]  ;;  %v6805_v40 = vld [vmem:[#allocation51_spill] sm:$0xff] }
 0x3c0   :  { %1633 = vmatprep.subr.bf16.mxu0 %v5219_v56  ;;  %3812 = vmatprep.subr.bf16.mxu1 %v6733_v57  ;;  %v6806_v56 = vld [vmem:[#allocation52_spill] sm:$0xff] }
 0x3c3   :  { %1634 = vmatpush1.bf16.msra.mxu0 %v5223_v46  ;;  %3813 = vmatpush3.bf16.msra.mxu1 %v5225_v48 }
 0x3c4   :  { %1635 = vmatprep.subr.bf16.mxu0 %v5229_v26  ;;  %3814 = vmatprep.subr.bf16.mxu1 %v6733_v57  ;;  %v1511_v26 = vadd.f32 %v5424_v10, %v1491_v2  ;;  %v6835_v2 = vld [vmem:[#allocation68_spill] sm:$0xff] }
 0x3c5   :  { %v4353_v39 = vpop.eup %4352 }
 0x3c6   :  { %v1501_v41 = vadd.f32 1.0, %v4353_v39 }
 0x3c7   :  { %1636 = vmatpush1.bf16.msra.mxu0 %v5233_v52  ;;  %3815 = vmatpush3.bf16.msra.mxu1 %v5235_v12  ;;  %v4355_v12 = vpop.eup %4354  ;;  %v1410_v52 = vadd.f32 %v5553_v55, %v5433_v20  ;;  %v6825_v55 = vld [vmem:[#allocation47_spill] sm:$0xff] }
 0x3c8   :  { %4356 = vrcp.f32 %v1501_v41  ;;  %1703 = vmatprep.subr.bf16.mxu0 %v6761_v5  ;;  %3820 = vmatprep.subr.bf16.mxu1 %v6733_v57  ;;  %v1508_v49 = vadd.f32 1.0, %v4355_v12  ;;  %v6808_v5 = vld [vmem:[#allocation54_spill] sm:$0xff]  ;;  %v6839_v41 = vld [vmem:[#allocation23_spill] sm:$0xff] }
 0x3ca   :  { %1654 = vmatmul.mubr.bf16.vlgmr.msra.gmra.mrb[40].mxu0 %v1518_v53  ;;  %3817 = vmatmul.mubr.bf16.vlgmr.msra.gmra.mrb[40].mxu1 %v1518_v53  ;;  %v6833_v53 = vld [vmem:[#allocation66_spill] sm:$0xff] }
 0x3cb   :  { %1704 = vmatpush1.bf16.msra.mxu0 %v6762_v8  ;;  %3821 = vmatpush3.bf16.msra.mxu1 %v6763_v9  ;;  %v6809_v8 = vld [vmem:[#allocation55_spill] sm:$0xff] }
 0x3cc   :  { %1705 = vmatprep.subr.bf16.mxu0 %v6764_v59  ;;  %3822 = vmatprep.subr.bf16.mxu1 %v6733_v57  ;;  %v6810_v59 = vld [vmem:[#allocation37_spill] sm:$0xff] }
 0x3cd   :  { %1735 = vmatprep.mubr.bf16.mxu0 %v6734_v4  ;;  %3836 = vmatprep.mubr.msk.bf16.mxu1 %vm4794_vm2, %v6733_v57 }
 0x3cf   :  { %1706 = vmatpush1.bf16.msra.mxu0 %v6766_v21  ;;  %3823 = vmatpush3.bf16.msra.mxu1 %v6767_v22 }
 0x3d0   :  { %1707 = vmatprep.subr.bf16.mxu0 %v6768_v23  ;;  %3824 = vmatprep.subr.bf16.mxu1 %v6733_v57  ;;  %v6811_v23 = vld [vmem:[#allocation56_spill] sm:$0xff] }
 0x3d2   :  { %v4357_v48 = vpop.eup %4356 }
 0x3d3   :  { %v1512_v46 = vmul.f32 %v4357_v48, %v1511_v26  ;;  %1708 = vmatpush1.bf16.msra.mxu0 %v6769_v29  ;;  %3825 = vmatpush3.bf16.msra.mxu1 %v6770_v38  ;;  %v6812_v29 = vld [vmem:[#allocation57_spill] sm:$0xff]  ;;  %v6813_v38 = vld [vmem:[#allocation58_spill] sm:$0xff] }
 0x3d4   :  { %1709 = vmatprep.subr.bf16.mxu0 %v6771_v3  ;;  %3826 = vmatprep.subr.bf16.mxu1 %v6733_v57 }
 0x3d5   :  { %v1513_v45 = vadd.f32 %v1512_v46, %v1410_v52 }
 0x3d7   :  { %4358 = vtanh.f32 %v1513_v45  ;;  %1710 = vmatpush1.bf16.msra.mxu0 %v6772_v33  ;;  %3827 = vmatpush3.bf16.msra.mxu1 %v6773_v47  ;;  %v6814_v47 = vld [vmem:[#allocation59_spill] sm:$0xff] }
 0x3d8   :  { %1711 = vmatprep.subr.bf16.mxu0 %v6774_v50  ;;  %3828 = vmatprep.subr.bf16.mxu1 %v6733_v57  ;;  %4360 = vrcp.f32 %v1508_v49  ;;  %v6815_v50 = vld [vmem:[#allocation60_spill] sm:$0xff] }
 0x3db   :  { %1712 = vmatpush1.bf16.msra.mxu0 %v6804_v16  ;;  %3829 = vmatpush3.bf16.msra.mxu1 %v6805_v40 }
 0x3dc   :  { %1713 = vmatprep.subr.bf16.mxu0 %v6806_v56  ;;  %3830 = vmatprep.subr.bf16.mxu1 %v6733_v57 }
 0x3df   :  { %1714 = vmatpush1.bf16.msra.mxu0 %v6807_v13  ;;  %3831 = vmatpush3.bf16.msra.mxu1 %v6808_v5  ;;  %v5683_v13 = vld [vmem:[#allocation7] ss:$0 sm:$0xff] }
 0x3e0   :  { %1715 = vmatprep.subr.bf16.mxu0 %v6809_v8  ;;  %3832 = vmatprep.subr.bf16.mxu1 %v6733_v57 }
 0x3e1   :  { %v4359_v9 = vpop.eup %4358 }
 0x3e2   :  { %v1515_v21 = vsub.f32 %v6810_v59, %v4359_v9  ;;  %v4361_v22 = vpop.eup %4360  ;;  %v6840_v59 = vld [vmem:[#allocation24_spill] sm:$0xff] }
 0x3e3   :  { %1716 = vmatpush1.bf16.msra.mxu0 %v6811_v23  ;;  %3833 = vmatpush3.bf16.msra.mxu1 %v6812_v29 }
 0x3e4   :  { %1717 = vmatprep.subr.bf16.mxu0 %v6813_v38  ;;  %3834 = vmatprep.subr.bf16.mxu1 %v6733_v57  ;;  %v1516_v3 = vmul.f32 %v4361_v22, %v1515_v21 }
 0x3e6   :  { %v5632_v33 = vadd.f32 %v4359_v9, %v1516_v3 }
 0x3e7   :  { %1718 = vmatpush1.bf16.msra.mxu0 %v6814_v47  ;;  %3835 = vmatpush3.bf16.msra.mxu1 %v6815_v50 }
 0x3e8   :  { %v1702_v32 = vpack.c.bf16 %v5632_v33, %v5632_v33  ;;  %1806 = vmatprep.subr.bf16.mxu0 %v6816_v17  ;;  %3840 = vmatprep.subr.bf16.mxu1 %v6733_v57 }
 0x3ea   :  { %1736 = vmatmul.mubr.bf16.vlgmr.msra.gmra.mrb[40].mxu0 %v1702_v32  ;;  %3837 = vmatmul.mubr.bf16.vlgmr.msra.gmra.mrb[44].mxu1 %v1702_v32 }
 0x3eb   :  { %1807 = vmatpush1.bf16.msra.mxu0 %v6817_v7  ;;  %3841 = vmatpush3.bf16.msra.mxu1 %v6818_v31 }
 0x3ec   :  { %1808 = vmatprep.subr.bf16.mxu0 %v6819_v34  ;;  %3842 = vmatprep.subr.bf16.mxu1 %v6733_v57 }
 0x3ed   :  { %1838 = vmatprep.mubr.bf16.mxu0 %v6734_v4  ;;  %3856 = vmatprep.mubr.msk.bf16.mxu1 %vm4794_vm2, %v6733_v57 }
 0x3ef   :  { %1809 = vmatpush1.bf16.msra.mxu0 %v6820_v35  ;;  %3843 = vmatpush3.bf16.msra.mxu1 %v6821_v36 }
 0x3f0   :  { %1810 = vmatprep.subr.bf16.mxu0 %v6822_v27  ;;  %3844 = vmatprep.subr.bf16.mxu1 %v6733_v57 }
 0x3f3   :  { %1811 = vmatpush1.bf16.msra.mxu0 %v6823_v28  ;;  %3845 = vmatpush3.bf16.msra.mxu1 %v6824_v1 }
 0x3f4   :  { %1812 = vmatprep.subr.bf16.mxu0 %v6825_v55  ;;  %3846 = vmatprep.subr.bf16.mxu1 %v6733_v57 }
 0x3f7   :  { %1813 = vmatpush1.bf16.msra.mxu0 %v6826_v6  ;;  %3847 = vmatpush3.bf16.msra.mxu1 %v6827_v19 }
 0x3f8   :  { %1814 = vmatprep.subr.bf16.mxu0 %v6828_v60  ;;  %3848 = vmatprep.subr.bf16.mxu1 %v6733_v57 }
 0x3fb   :  { %1815 = vmatpush1.bf16.msra.mxu0 %v6829_v62  ;;  %3849 = vmatpush3.bf16.msra.mxu1 %v6830_v18 }
 0x3fc   :  { %1816 = vmatprep.subr.bf16.mxu0 %v6831_v24  ;;  %3850 = vmatprep.subr.bf16.mxu1 %v6733_v57 }
 0x3ff   :  { %1817 = vmatpush1.bf16.msra.mxu0 %v6832_v58  ;;  %3851 = vmatpush3.bf16.msra.mxu1 %v6833_v53 }
 0x400   :  { %1818 = vmatprep.subr.bf16.mxu0 %v6834_v37  ;;  %3852 = vmatprep.subr.bf16.mxu1 %v6733_v57 }
 0x403   :  { %1819 = vmatpush1.bf16.msra.mxu0 %v6835_v2  ;;  %3853 = vmatpush3.bf16.msra.mxu1 %v5668_v11 }
 0x404   :  { %1820 = vmatprep.subr.bf16.mxu0 %v6836_v54  ;;  %3854 = vmatprep.subr.bf16.mxu1 %v6733_v57 }
 0x407   :  { %1821 = vmatpush1.bf16.msra.mxu0 %v6837_v51  ;;  %3855 = vmatpush3.bf16.msra.mxu1 %v5674_v61 }
 0x408   :  { %1908 = vmatprep.subr.bf16.mxu0 %v5677_v63  ;;  %3860 = vmatprep.subr.bf16.mxu1 %v6733_v57 }
 0x47d   :  { %v1553_v14 = vpop.f32.mrb[36].mxu0  ;;  %v1594_v42 = vpop.f32.mrb[36].mxu1 }
 0x47e   :  { %v1600_v44 = vadd.f32 %v1553_v14, %v6838_v43  ;;  %v1555_v0 = vpop.f32.mrb[37].mxu0  ;;  %v3798_v39 = vpop.f32.mrb[37].mxu1  ;;  %v1614_v5 = vadd.f32 %v5683_v13, %v1594_v42 }
 0x47f   :  { %v1607_v12 = vadd.f32 %v1555_v0, %v6839_v41  ;;  %v1557_v26 = vpop.f32.mrb[38].mxu0  ;;  %v1597_v48 = vpop.f32.mrb[38].mxu1  ;;  %v5701_v0 = vld [vmem:[#allocation8 + $0x8] ss:$12 sps:$4 sm:$0xff]   ;;  %v5711_v39 = vld [vmem:[#allocation8 + $0x18] ss:$12 sps:$4 sm:$0xff]  }
 0x480   :  { %v3369_v52 = vmul.f32 -1.442695, %v1600_v44  ;;  %v1558_v46 = vpop.f32.mrb[39].mxu0  ;;  %v3799_v45 = vpop.f32.mrb[39].mxu1  ;;  %v5698_v44 = vld [vmem:[#allocation8] ss:$12 sps:$4 sm:$0xff]  }
 0x481   :  { %v3370_v49 = vmul.f32 -1.442695, %v1607_v12  ;;  %v5714_v41 = vld [vmem:[#allocation8 + $0x20] ss:$12 sps:$4 sm:$0xff]   ;;  %v5721_v26 = vld [vmem:[#allocation8 + $0x30] ss:$12 sps:$4 sm:$0xff]  }
 0x482   :  { %4362 = vpow2.f32 %v3369_v52  ;;  %v5717_v12 = vld [vmem:[#allocation8 + $0x34] ss:$12 sps:$4 sm:$0xff]   ;;  %v5724_v48 = vld [vmem:[#allocation8 + $0x38] ss:$12 sps:$4 sm:$0xff]  }
 0x483   :  { %4364 = vpow2.f32 %v3370_v49  ;;  %v5727_v52 = vld [vmem:[#allocation8 + $0x4c] ss:$12 sps:$4 sm:$0xff]  }
 0x48c   :  { %v4363_v16 = vpop.eup %4362 }
 0x48d   :  { %v1604_v40 = vadd.f32 1.0, %v4363_v16  ;;  %v4365_v56 = vpop.eup %4364 }
 0x48e   :  { %v1611_v22 = vadd.f32 1.0, %v4365_v56  ;;  %v5734_v56 = vld [vmem:[#allocation8 + $0x48] ss:$12 sps:$4 sm:$0xff]  }
 0x48f   :  { %4366 = vrcp.f32 %v1604_v40 }
 0x499   :  { %v4367_v8 = vpop.eup %4366 }
 0x49a   :  { %v1615_v9 = vmul.f32 %v4367_v8, %v1614_v5  ;;  %v5737_v5 = vld [vmem:[#allocation8 + $0x50] ss:$12 sps:$4 sm:$0xff]  }
 0x49c   :  { %v1616_v21 = vadd.f32 %v1615_v9, %v6840_v59  ;;  %v5740_v59 = vld [vmem:[#allocation8 + $0x64] ss:$12 sps:$4 sm:$0xff]  }
 0x49d   :  { %v5687_v23 = vpop.f32.mrb[40].mxu1 }
 0x49e   :  { %4368 = vtanh.f32 %v1616_v21  ;;  %v3818_v29 = vpop.f32.mrb[41].mxu1 }
 0x49f   :  { %v1699_v38 = vpop.f32.mrb[42].mxu1  ;;  %4370 = vrcp.f32 %v1611_v22 }
 0x4a0   :  { %v3819_v3 = vpop.f32.mrb[43].mxu1  ;;  %v5744_v38 = vld [vmem:[#allocation8 + $0x60] ss:$12 sps:$4 sm:$0xff]  }
 0x4a1   :  { %v5747_v3 = vld [vmem:[#allocation8 + $0x68] ss:$12 sps:$4 sm:$0xff]  }
 0x4a8   :  { %v4369_v47 = vpop.eup %4368 }
 0x4a9   :  { %v1618_v50 = vsub.f32 %v5556_v25, %v4369_v47  ;;  %v4371_v32 = vpop.eup %4370  ;;  %v5704_v25 = vld [vmem:[#allocation8 + $0x1c] ss:$12 sps:$4 sm:$0xff]  }
 0x4ab   :  { %v1619_v14 = vmul.f32 %v4371_v32, %v1618_v50  ;;  %v5755_v32 = vld [vmem:[#allocation8 + $0x78] ss:$12 sps:$4 sm:$0xff]  }
 0x4ad   :  { %v5690_v43 = vadd.f32 %v4369_v47, %v1619_v14  ;;  %v5750_v47 = vld [vmem:[#allocation8 + $0x7c] ss:$12 sps:$4 sm:$0xff]   ;;  %v5758_v14 = vld [vmem:[#allocation8 + $0x80] ss:$12 sps:$4 sm:$0xff]  }
 0x4af   :  { %v5694_v42 = vpack.c.bf16 %v5690_v43, %v5690_v43 }
 0x4b1   :  { %1839 = vmatmul.mubr.bf16.vlgmr.msra.gmra.mrb[44].mxu0 %v5694_v42  ;;  %3857 = vmatmul.mubr.bf16.vlgmr.msra.gmra.mrb[48].mxu1 %v5694_v42 }
 0x4b2   :  { %1909 = vmatpush1.bf16.msra.mxu0 %v5698_v44  ;;  %3861 = vmatpush3.bf16.msra.mxu1 %v5701_v0 }
 0x4b3   :  { %1910 = vmatprep.subr.bf16.mxu0 %v5704_v25  ;;  %3862 = vmatprep.subr.bf16.mxu1 %v6733_v57 }
 0x4b4   :  { %1940 = vmatprep.mubr.bf16.mxu0 %v6734_v4  ;;  %3876 = vmatprep.mubr.msk.bf16.mxu1 %vm4794_vm2, %v6733_v57 }
 0x4b6   :  { %1911 = vmatpush1.bf16.msra.mxu0 %v5711_v39  ;;  %3863 = vmatpush3.bf16.msra.mxu1 %v5714_v41 }
 0x4b7   :  { %1912 = vmatprep.subr.bf16.mxu0 %v5717_v12  ;;  %3864 = vmatprep.subr.bf16.mxu1 %v6733_v57 }
 0x4ba   :  { %1913 = vmatpush1.bf16.msra.mxu0 %v5721_v26  ;;  %3865 = vmatpush3.bf16.msra.mxu1 %v5724_v48 }
 0x4bb   :  { %1914 = vmatprep.subr.bf16.mxu0 %v5727_v52  ;;  %3866 = vmatprep.subr.bf16.mxu1 %v6733_v57 }
 0x4bd   :  { %v1737_v46 = vpop.f32.mrb[40].mxu0  ;;  %v5731_v45 = vpop.f32.mrb[44].mxu1 }
 0x4be   :  { %v4144_v49 = vadd.f32 %v1737_v46, %v5392_v15  ;;  %v1739_v16 = vpop.f32.mrb[41].mxu0  ;;  %v3838_v40 = vpop.f32.mrb[45].mxu1  ;;  %1915 = vmatpush1.bf16.msra.mxu0 %v5734_v56  ;;  %3867 = vmatpush3.bf16.msra.mxu1 %v5737_v5  ;;  %v5761_v46 = vld [vmem:[#allocation8 + $0x94] ss:$12 sps:$4 sm:$0xff]  }
 0x4bf   :  { %v1741_v8 = vpop.f32.mrb[42].mxu0  ;;  %v1781_v9 = vpop.f32.mrb[46].mxu1  ;;  %1916 = vmatprep.subr.bf16.mxu0 %v5740_v59  ;;  %3868 = vmatprep.subr.bf16.mxu1 %v6733_v57  ;;  %v4145_v50 = vadd.f32 %v1739_v16, %v5403_v30  ;;  %v5765_v40 = vld [vmem:[#allocation8 + $0x90] ss:$12 sps:$4 sm:$0xff]   ;;  %v5768_v16 = vld [vmem:[#allocation8 + $0x98] ss:$12 sps:$4 sm:$0xff]  }
 0x4c0   :  { %v3371_v21 = vmul.f32 -1.442695, %v4144_v49  ;;  %v1742_v22 = vpop.f32.mrb[43].mxu0  ;;  %v3839_v29 = vpop.f32.mrb[47].mxu1  ;;  %6841 = vst [vmem:[#allocation19_spill] sm:$0xff] %v5768_v16 }
 0x4c1   :  { %v3372_v49 = vmul.f32 -1.442695, %v4145_v50  ;;  %v5771_v8 = vld [vmem:[#allocation8 + $0xac] ss:$12 sps:$4 sm:$0xff]   ;;  %v5775_v22 = vld [vmem:[#allocation8 + $0xa8] ss:$12 sps:$4 sm:$0xff]  }
 0x4c2   :  { %4372 = vpow2.f32 %v3371_v21  ;;  %1917 = vmatpush1.bf16.msra.mxu0 %v5744_v38  ;;  %3869 = vmatpush3.bf16.msra.mxu1 %v5747_v3  ;;  %6842 = vst [vmem:[#allocation20_spill] sm:$0xff] %v5771_v8  ;;  %6843 = vst [vmem:[#allocation22_spill] sm:$0xff] %v5775_v22  ;;  %v5778_v29 = vld [vmem:[#allocation8 + $0xb0] ss:$12 sps:$4 sm:$0xff]  }
 0x4c3   :  { %1918 = vmatprep.subr.bf16.mxu0 %v5750_v47  ;;  %3870 = vmatprep.subr.bf16.mxu1 %v6733_v57  ;;  %4374 = vpow2.f32 %v3372_v49  ;;  %6844 = vst [vmem:[#allocation50_spill] sm:$0xff] %v5778_v29  ;;  %v5781_v50 = vld [vmem:[#allocation10 + $0x4] ss:$12 sps:$4 sm:$0xff]   ;;  %v5787_v49 = vld [vmem:[#allocation10] ss:$12 sps:$4 sm:$0xff]  }
 0x4c4   :  { %6845 = vst [vmem:[#allocation51_spill] sm:$0xff] %v5781_v50  ;;  %6846 = vst [vmem:[#allocation52_spill] sm:$0xff] %v5787_v49 }
 0x4c6   :  { %1919 = vmatpush1.bf16.msra.mxu0 %v5755_v32  ;;  %3871 = vmatpush3.bf16.msra.mxu1 %v5758_v14 }
 0x4c7   :  { %1920 = vmatprep.subr.bf16.mxu0 %v5761_v46  ;;  %3872 = vmatprep.subr.bf16.mxu1 %v6733_v57 }
 0x4ca   :  { %1921 = vmatpush1.bf16.msra.mxu0 %v5765_v40  ;;  %3873 = vmatpush3.bf16.msra.mxu1 %v5768_v16  ;;  %v5824_v16 = vld [vmem:[#allocation10 + $0x48] ss:$12 sps:$4 sm:$0xff]  }
 0x4cb   :  { %1922 = vmatprep.subr.bf16.mxu0 %v5771_v8  ;;  %3874 = vmatprep.subr.bf16.mxu1 %v6733_v57  ;;  %6852 = vst [vmem:[#allocation57_spill] sm:$0xff] %v5824_v16 }
 0x4cc   :  { %v4373_v9 = vpop.eup %4372 }
 0x4cd   :  { %v1788_v21 = vadd.f32 1.0, %v4373_v9  ;;  %v5790_v9 = vld [vmem:[#allocation10 + $0x8] ss:$12 sps:$4 sm:$0xff]  }
 0x4ce   :  { %1923 = vmatpush1.bf16.msra.mxu0 %v5775_v22  ;;  %3875 = vmatpush3.bf16.msra.mxu1 %v5778_v29  ;;  %6847 = vst [vmem:[#allocation53_spill] sm:$0xff] %v5790_v9  ;;  %v5793_v29 = vld [vmem:[#allocation10 + $0x1c] ss:$12 sps:$4 sm:$0xff]   ;;  %v1697_v22 = vadd.f32 %v5687_v23, %v5433_v20 }
 0x4cf   :  { %4376 = vrcp.f32 %v1788_v21  ;;  %1990 = vmatprep.subr.bf16.mxu0 %v5781_v50  ;;  %3880 = vmatprep.subr.bf16.mxu1 %v6733_v57  ;;  %6848 = vst [vmem:[#allocation54_spill] sm:$0xff] %v5793_v29  ;;  %v5803_v21 = vld [vmem:[#allocation10 + $0x20] ss:$12 sps:$4 sm:$0xff]   ;;  %v5827_v23 = vld [vmem:[#allocation10 + $0x50] ss:$12 sps:$4 sm:$0xff]  }
 0x4d0   :  { %6850 = vst [vmem:[#allocation37_spill] sm:$0xff] %v5803_v21  ;;  %6853 = vst [vmem:[#allocation58_spill] sm:$0xff] %v5827_v23 }
 0x4d1   :  { %1941 = vmatmul.mubr.bf16.vlgmr.msra.gmra.mrb[48].mxu0 %v5694_v42  ;;  %3877 = vmatmul.mubr.bf16.vlgmr.msra.gmra.mrb[52].mxu1 %v5694_v42  ;;  %v5800_v42 = vld [vmem:[#allocation10 + $0x18] ss:$12 sps:$4 sm:$0xff]  }
 0x4d2   :  { %1991 = vmatpush1.bf16.msra.mxu0 %v5787_v49  ;;  %3881 = vmatpush3.bf16.msra.mxu1 %v5790_v9  ;;  %6849 = vst [vmem:[#allocation55_spill] sm:$0xff] %v5800_v42  ;;  %v5806_v9 = vld [vmem:[#allocation10 + $0x34] ss:$12 sps:$4 sm:$0xff]   ;;  %v1798_v49 = vadd.f32 %v5424_v10, %v5731_v45 }
 0x4d3   :  { %1992 = vmatprep.subr.bf16.mxu0 %v5793_v29  ;;  %3882 = vmatprep.subr.bf16.mxu1 %v6733_v57  ;;  %6851 = vst [vmem:[#allocation56_spill] sm:$0xff] %v5806_v9  ;;  %v4375_v29 = vpop.eup %4374 }
 0x4d4   :  { %2022 = vmatprep.mubr.bf16.mxu0 %v6734_v4  ;;  %3896 = vmatprep.mubr.msk.bf16.mxu1 %vm4794_vm2, %v6733_v57  ;;  %v1795_v45 = vadd.f32 1.0, %v4375_v29  ;;  %v5844_v29 = vld [vmem:[#allocation10 + $0x78] ss:$12 sps:$4 sm:$0xff]  }
 0x4d5   :  { %6858 = vst [vmem:[#allocation40_spill] sm:$0xff] %v5844_v29 }
 0x4d6   :  { %1993 = vmatpush1.bf16.msra.mxu0 %v5800_v42  ;;  %3883 = vmatpush3.bf16.msra.mxu1 %v5803_v21  ;;  %v5814_v42 = vld [vmem:[#allocation10 + $0x30] ss:$12 sps:$4 sm:$0xff]   ;;  %v5817_v21 = vld [vmem:[#allocation10 + $0x38] ss:$12 sps:$4 sm:$0xff]  }
 0x4d7   :  { %1994 = vmatprep.subr.bf16.mxu0 %v5806_v9  ;;  %3884 = vmatprep.subr.bf16.mxu1 %v6733_v57  ;;  %v5820_v9 = vld [vmem:[#allocation10 + $0x4c] ss:$12 sps:$4 sm:$0xff]  }
 0x4d9   :  { %v4377_v50 = vpop.eup %4376 }
 0x4da   :  { %v1799_v8 = vmul.f32 %v4377_v50, %v1798_v49  ;;  %1995 = vmatpush1.bf16.msra.mxu0 %v5814_v42  ;;  %3885 = vmatpush3.bf16.msra.mxu1 %v5817_v21  ;;  %v5830_v50 = vld [vmem:[#allocation10 + $0x64] ss:$12 sps:$4 sm:$0xff]   ;;  %v5834_v49 = vld [vmem:[#allocation10 + $0x60] ss:$12 sps:$4 sm:$0xff]  }
 0x4db   :  { %1996 = vmatprep.subr.bf16.mxu0 %v5820_v9  ;;  %3886 = vmatprep.subr.bf16.mxu1 %v6733_v57  ;;  %6854 = vst [vmem:[#allocation59_spill] sm:$0xff] %v5830_v50  ;;  %6855 = vst [vmem:[#allocation60_spill] sm:$0xff] %v5834_v49 }
 0x4dc   :  { %v1800_v10 = vadd.f32 %v1799_v8, %v1697_v22  ;;  %v5837_v8 = vld [vmem:[#allocation10 + $0x68] ss:$12 sps:$4 sm:$0xff]  }
 0x4dd   :  { %6856 = vst [vmem:[#allocation38_spill] sm:$0xff] %v5837_v8  ;;  %v5840_v22 = vld [vmem:[#allocation10 + $0x7c] ss:$12 sps:$4 sm:$0xff]  }
 0x4de   :  { %4378 = vtanh.f32 %v1800_v10  ;;  %1997 = vmatpush1.bf16.msra.mxu0 %v5824_v16  ;;  %3887 = vmatpush3.bf16.msra.mxu1 %v5827_v23  ;;  %6857 = vst [vmem:[#allocation39_spill] sm:$0xff] %v5840_v22  ;;  %v5847_v10 = vld [vmem:[#allocation10 + $0x80] ss:$12 sps:$4 sm:$0xff]   ;;  %v5858_v23 = vld [vmem:[#allocation10 + $0x98] ss:$12 sps:$4 sm:$0xff]  }
 0x4df   :  { %1998 = vmatprep.subr.bf16.mxu0 %v5830_v50  ;;  %3888 = vmatprep.subr.bf16.mxu1 %v6733_v57  ;;  %4380 = vrcp.f32 %v1795_v45  ;;  %6859 = vst [vmem:[#allocation41_spill] sm:$0xff] %v5847_v10  ;;  %v5850_v45 = vld [vmem:[#allocation10 + $0x94] ss:$12 sps:$4 sm:$0xff]   ;;  %v5855_v50 = vld [vmem:[#allocation10 + $0x90] ss:$12 sps:$4 sm:$0xff]   ;;  %6862 = vst [vmem:[#allocation44_spill] sm:$0xff] %v5858_v23 }
 0x4e0   :  { %6860 = vst [vmem:[#allocation42_spill] sm:$0xff] %v5850_v45  ;;  %6861 = vst [vmem:[#allocation43_spill] sm:$0xff] %v5855_v50  ;;  %v5867_v16 = vld [vmem:[#allocation10 + $0xa8] ss:$12 sps:$4 sm:$0xff]  }
 0x4e1   :  { %6864 = vst [vmem:[#allocation46_spill] sm:$0xff] %v5867_v16 }
 0x4e2   :  { %1999 = vmatpush1.bf16.msra.mxu0 %v5834_v49  ;;  %3889 = vmatpush3.bf16.msra.mxu1 %v5837_v8 }
 0x4e3   :  { %2000 = vmatprep.subr.bf16.mxu0 %v5840_v22  ;;  %3890 = vmatprep.subr.bf16.mxu1 %v6733_v57 }
 0x4e6   :  { %2001 = vmatpush1.bf16.msra.mxu0 %v5844_v29  ;;  %3891 = vmatpush3.bf16.msra.mxu1 %v5847_v10  ;;  %v5861_v29 = vld [vmem:[#allocation10 + $0xac] ss:$12 sps:$4 sm:$0xff]  }
 0x4e7   :  { %2002 = vmatprep.subr.bf16.mxu0 %v5850_v45  ;;  %3892 = vmatprep.subr.bf16.mxu1 %v6733_v57  ;;  %6863 = vst [vmem:[#allocation45_spill] sm:$0xff] %v5861_v29 }
 0x4e8   :  { %v4379_v8 = vpop.eup %4378 }
 0x4e9   :  { %v1802_v49 = vsub.f32 %v5632_v33, %v4379_v8  ;;  %v4381_v22 = vpop.eup %4380  ;;  %v5870_v33 = vld [vmem:[#allocation10 + $0xb0] ss:$12 sps:$4 sm:$0xff]  }
 0x4ea   :  { %2003 = vmatpush1.bf16.msra.mxu0 %v5855_v50  ;;  %3893 = vmatpush3.bf16.msra.mxu1 %v5858_v23  ;;  %6865 = vst [vmem:[#allocation47_spill] sm:$0xff] %v5870_v33 }
 0x4eb   :  { %2004 = vmatprep.subr.bf16.mxu0 %v5861_v29  ;;  %3894 = vmatprep.subr.bf16.mxu1 %v6733_v57  ;;  %v1803_v45 = vmul.f32 %v4381_v22, %v1802_v49 }
 0x4ed   :  { %v5865_v10 = vadd.f32 %v4379_v8, %v1803_v45 }
 0x4ee   :  { %2005 = vmatpush1.bf16.msra.mxu0 %v5867_v16  ;;  %3895 = vmatpush3.bf16.msra.mxu1 %v5870_v33 }
 0x4ef   :  { %v1989_v23 = vpack.c.bf16 %v5865_v10, %v5865_v10  ;;  %2093 = vmatprep.subr.bf16.mxu0 %v6816_v17  ;;  %3900 = vmatprep.subr.bf16.mxu1 %v6733_v57 }
 0x4f1   :  { %2023 = vmatmul.mubr.bf16.vlgmr.msra.gmra.mrb[48].mxu0 %v1989_v23  ;;  %3897 = vmatmul.mubr.bf16.vlgmr.msra.gmra.mrb[56].mxu1 %v1989_v23 }
 0x4f2   :  { %2094 = vmatpush1.bf16.msra.mxu0 %v6817_v7  ;;  %3901 = vmatpush3.bf16.msra.mxu1 %v6818_v31  ;;  %v6866_v31 = vld [vmem:[#allocation25_spill] sm:$0xff] }
 0x4f3   :  { %2095 = vmatprep.subr.bf16.mxu0 %v6819_v34  ;;  %3902 = vmatprep.subr.bf16.mxu1 %v6733_v57 }
 0x4f4   :  { %2125 = vmatprep.mubr.bf16.mxu0 %v6734_v4  ;;  %3916 = vmatprep.mubr.msk.bf16.mxu1 %vm4794_vm2, %v6733_v57 }
 0x4f6   :  { %2096 = vmatpush1.bf16.msra.mxu0 %v6820_v35  ;;  %3903 = vmatpush3.bf16.msra.mxu1 %v6821_v36 }
 0x4f7   :  { %2097 = vmatprep.subr.bf16.mxu0 %v6822_v27  ;;  %3904 = vmatprep.subr.bf16.mxu1 %v6733_v57  ;;  %v6867_v27 = vld [vmem:[#allocation26_spill] sm:$0xff] }
 0x4fa   :  { %2098 = vmatpush1.bf16.msra.mxu0 %v6823_v28  ;;  %3905 = vmatpush3.bf16.msra.mxu1 %v6824_v1 }
 0x4fb   :  { %2099 = vmatprep.subr.bf16.mxu0 %v6825_v55  ;;  %3906 = vmatprep.subr.bf16.mxu1 %v6733_v57 }
 0x4fe   :  { %2100 = vmatpush1.bf16.msra.mxu0 %v6826_v6  ;;  %3907 = vmatpush3.bf16.msra.mxu1 %v6827_v19 }
 0x4ff   :  { %2101 = vmatprep.subr.bf16.mxu0 %v6828_v60  ;;  %3908 = vmatprep.subr.bf16.mxu1 %v6733_v57 }
 0x502   :  { %2102 = vmatpush1.bf16.msra.mxu0 %v6829_v62  ;;  %3909 = vmatpush3.bf16.msra.mxu1 %v6830_v18 }
 0x503   :  { %2103 = vmatprep.subr.bf16.mxu0 %v6831_v24  ;;  %3910 = vmatprep.subr.bf16.mxu1 %v6733_v57 }
 0x506   :  { %2104 = vmatpush1.bf16.msra.mxu0 %v6832_v58  ;;  %3911 = vmatpush3.bf16.msra.mxu1 %v6833_v53 }
 0x507   :  { %2105 = vmatprep.subr.bf16.mxu0 %v6834_v37  ;;  %3912 = vmatprep.subr.bf16.mxu1 %v6733_v57 }
 0x50a   :  { %2106 = vmatpush1.bf16.msra.mxu0 %v6835_v2  ;;  %3913 = vmatpush3.bf16.msra.mxu1 %v5668_v11 }
 0x50b   :  { %2107 = vmatprep.subr.bf16.mxu0 %v6836_v54  ;;  %3914 = vmatprep.subr.bf16.mxu1 %v6733_v57  ;;  %v6868_v54 = vld [vmem:[#allocation30_spill] sm:$0xff] }
 0x50e   :  { %2108 = vmatpush1.bf16.msra.mxu0 %v6837_v51  ;;  %3915 = vmatpush3.bf16.msra.mxu1 %v5674_v61 }
 0x50f   :  { %2195 = vmatprep.subr.bf16.mxu0 %v5677_v63  ;;  %3920 = vmatprep.subr.bf16.mxu1 %v6733_v57 }
 0x584   :  { %v1840_v17 = vpop.f32.mrb[44].mxu0  ;;  %v1881_v7 = vpop.f32.mrb[48].mxu1 }
 0x585   :  { %v1887_v34 = vadd.f32 %v1840_v17, %v6866_v31  ;;  %v1842_v35 = vpop.f32.mrb[45].mxu0  ;;  %v3858_v36 = vpop.f32.mrb[49].mxu1  ;;  %v1901_v53 = vadd.f32 %v5683_v13, %v1881_v7 }
 0x586   :  { %v1894_v28 = vadd.f32 %v1842_v35, %v6867_v27  ;;  %v1844_v1 = vpop.f32.mrb[46].mxu0  ;;  %v1884_v55 = vpop.f32.mrb[50].mxu1 }
 0x587   :  { %v3373_v6 = vmul.f32 -1.442695, %v1887_v34  ;;  %v1845_v19 = vpop.f32.mrb[47].mxu0  ;;  %v3859_v60 = vpop.f32.mrb[51].mxu1 }
 0x588   :  { %v3374_v62 = vmul.f32 -1.442695, %v1894_v28 }
 0x589   :  { %4382 = vpow2.f32 %v3373_v6 }
 0x58a   :  { %4384 = vpow2.f32 %v3374_v62 }
 0x593   :  { %v4383_v18 = vpop.eup %4382 }
 0x594   :  { %v1891_v24 = vadd.f32 1.0, %v4383_v18  ;;  %v4385_v58 = vpop.eup %4384 }
 0x595   :  { %v1898_v23 = vadd.f32 1.0, %v4385_v58 }
 0x596   :  { %4386 = vrcp.f32 %v1891_v24 }
 0x5a0   :  { %v4387_v37 = vpop.eup %4386 }
 0x5a1   :  { %v1902_v2 = vmul.f32 %v4387_v37, %v1901_v53  ;;  %v6869_v53 = vld [vmem:[#allocation19_spill] sm:$0xff]  ;;  %v6870_v37 = vld [vmem:[#allocation20_spill] sm:$0xff] }
 0x5a3   :  { %v1903_v51 = vadd.f32 %v1902_v2, %v6868_v54 }
 0x5a4   :  { %v5916_v49 = vpop.f32.mrb[52].mxu1 }
 0x5a5   :  { %4388 = vtanh.f32 %v1903_v51  ;;  %v3878_v8 = vpop.f32.mrb[53].mxu1  ;;  %v6871_v51 = vld [vmem:[#allocation22_spill] sm:$0xff] }
 0x5a6   :  { %v1986_v22 = vpop.f32.mrb[54].mxu1  ;;  %4390 = vrcp.f32 %v1898_v23  ;;  %v6872_v23 = vld [vmem:[#allocation50_spill] sm:$0xff]  ;;  %v6873_v8 = vld [vmem:[#allocation51_spill] sm:$0xff] }
 0x5a7   :  { %v3879_v45 = vpop.f32.mrb[55].mxu1  ;;  %v6874_v22 = vld [vmem:[#allocation52_spill] sm:$0xff] }
 0x5a8   :  { %v6875_v45 = vld [vmem:[#allocation53_spill] sm:$0xff] }
 0x5af   :  { %v4389_v17 = vpop.eup %4388 }
 0x5b0   :  { %v1905_v31 = vsub.f32 %v5690_v43, %v4389_v17  ;;  %v4391_v34 = vpop.eup %4390 }
 0x5b2   :  { %v1906_v35 = vmul.f32 %v4391_v34, %v1905_v31  ;;  %v6877_v31 = vld [vmem:[#allocation55_spill] sm:$0xff]  ;;  %v6878_v34 = vld [vmem:[#allocation37_spill] sm:$0xff] }
 0x5b4   :  { %v5919_v36 = vadd.f32 %v4389_v17, %v1906_v35  ;;  %v6876_v17 = vld [vmem:[#allocation54_spill] sm:$0xff]  ;;  %v6879_v35 = vld [vmem:[#allocation56_spill] sm:$0xff] }
 0x5b6   :  { %v2092_v7 = vpack.c.bf16 %v5919_v36, %v5919_v36 }
 0x5b8   :  { %2126 = vmatmul.mubr.bf16.vlgmr.msra.gmra.mrb[52].mxu0 %v2092_v7  ;;  %3917 = vmatmul.mubr.bf16.vlgmr.msra.gmra.mrb[60].mxu1 %v2092_v7 }
 0x5b9   :  { %2196 = vmatpush1.bf16.msra.mxu0 %v5698_v44  ;;  %3921 = vmatpush3.bf16.msra.mxu1 %v5701_v0 }
 0x5ba   :  { %2197 = vmatprep.subr.bf16.mxu0 %v5704_v25  ;;  %3922 = vmatprep.subr.bf16.mxu1 %v6733_v57 }
 0x5bb   :  { %2227 = vmatprep.mubr.bf16.mxu0 %v6734_v4  ;;  %3936 = vmatprep.mubr.msk.bf16.mxu1 %vm4794_vm2, %v6733_v57 }
 0x5bd   :  { %2198 = vmatpush1.bf16.msra.mxu0 %v5711_v39  ;;  %3923 = vmatpush3.bf16.msra.mxu1 %v5714_v41 }
 0x5be   :  { %2199 = vmatprep.subr.bf16.mxu0 %v5717_v12  ;;  %3924 = vmatprep.subr.bf16.mxu1 %v6733_v57 }
 0x5c1   :  { %2200 = vmatpush1.bf16.msra.mxu0 %v5721_v26  ;;  %3925 = vmatpush3.bf16.msra.mxu1 %v5724_v48 }
 0x5c2   :  { %2201 = vmatprep.subr.bf16.mxu0 %v5727_v52  ;;  %3926 = vmatprep.subr.bf16.mxu1 %v6733_v57 }
 0x5c4   :  { %v2024_v43 = vpop.f32.mrb[48].mxu0  ;;  %v2065_v27 = vpop.f32.mrb[56].mxu1 }
 0x5c5   :  { %v4146_v28 = vadd.f32 %v2024_v43, %v5392_v15  ;;  %v2026_v1 = vpop.f32.mrb[49].mxu0  ;;  %v3898_v55 = vpop.f32.mrb[57].mxu1  ;;  %2202 = vmatpush1.bf16.msra.mxu0 %v5734_v56  ;;  %3927 = vmatpush3.bf16.msra.mxu1 %v5737_v5  ;;  %v5971_v43 = vld [vmem:[#allocation11] ss:$0 sm:$0xff] }
 0x5c6   :  { %v2028_v6 = vpop.f32.mrb[50].mxu0  ;;  %v2068_v19 = vpop.f32.mrb[58].mxu1  ;;  %2203 = vmatprep.subr.bf16.mxu0 %v5740_v59  ;;  %3928 = vmatprep.subr.bf16.mxu1 %v6733_v57  ;;  %v4147_v24 = vadd.f32 %v2026_v1, %v5403_v30  ;;  %v1984_v55 = vadd.f32 %v5916_v49, %v5433_v20  ;;  %v6883_v49 = vld [vmem:[#allocation60_spill] sm:$0xff] }
 0x5c7   :  { %v3375_v60 = vmul.f32 -1.442695, %v4146_v28  ;;  %v2029_v62 = vpop.f32.mrb[51].mxu0  ;;  %v3899_v18 = vpop.f32.mrb[59].mxu1  ;;  %v2085_v28 = vadd.f32 %v5971_v43, %v2065_v27  ;;  %v6882_v27 = vld [vmem:[#allocation59_spill] sm:$0xff] }
 0x5c8   :  { %v3376_v58 = vmul.f32 -1.442695, %v4147_v24  ;;  %v6880_v62 = vld [vmem:[#allocation57_spill] sm:$0xff]  ;;  %v6881_v18 = vld [vmem:[#allocation58_spill] sm:$0xff] }
 0x5c9   :  { %4392 = vpow2.f32 %v3375_v60  ;;  %2204 = vmatpush1.bf16.msra.mxu0 %v5744_v38  ;;  %3929 = vmatpush3.bf16.msra.mxu1 %v5747_v3  ;;  %v6884_v24 = vld [vmem:[#allocation38_spill] sm:$0xff] }
 0x5ca   :  { %2205 = vmatprep.subr.bf16.mxu0 %v5750_v47  ;;  %3930 = vmatprep.subr.bf16.mxu1 %v6733_v57  ;;  %4394 = vpow2.f32 %v3376_v58  ;;  %v6885_v58 = vld [vmem:[#allocation39_spill] sm:$0xff] }
 0x5cd   :  { %2206 = vmatpush1.bf16.msra.mxu0 %v5755_v32  ;;  %3931 = vmatpush3.bf16.msra.mxu1 %v5758_v14 }
 0x5ce   :  { %2207 = vmatprep.subr.bf16.mxu0 %v5761_v46  ;;  %3932 = vmatprep.subr.bf16.mxu1 %v6733_v57 }
 0x5d1   :  { %2208 = vmatpush1.bf16.msra.mxu0 %v5765_v40  ;;  %3933 = vmatpush3.bf16.msra.mxu1 %v6869_v53 }
 0x5d2   :  { %2209 = vmatprep.subr.bf16.mxu0 %v6870_v37  ;;  %3934 = vmatprep.subr.bf16.mxu1 %v6733_v57 }
 0x5d3   :  { %v4393_v2 = vpop.eup %4392 }
 0x5d4   :  { %v2075_v54 = vadd.f32 1.0, %v4393_v2  ;;  %v6886_v2 = vld [vmem:[#allocation40_spill] sm:$0xff] }
 0x5d5   :  { %2210 = vmatpush1.bf16.msra.mxu0 %v6871_v51  ;;  %3935 = vmatpush3.bf16.msra.mxu1 %v6872_v23 }
 0x5d6   :  { %4396 = vrcp.f32 %v2075_v54  ;;  %2277 = vmatprep.subr.bf16.mxu0 %v6873_v8  ;;  %3940 = vmatprep.subr.bf16.mxu1 %v6733_v57  ;;  %v6887_v54 = vld [vmem:[#allocation41_spill] sm:$0xff] }
 0x5d8   :  { %2228 = vmatmul.mubr.bf16.vlgmr.msra.gmra.mrb[56].mxu0 %v2092_v7  ;;  %3937 = vmatmul.mubr.bf16.vlgmr.msra.gmra.mrb[64].mxu1 %v2092_v7  ;;  %v4395_v7 = vpop.eup %4394 }
 0x5d9   :  { %2278 = vmatpush1.bf16.msra.mxu0 %v6874_v22  ;;  %3941 = vmatpush3.bf16.msra.mxu1 %v6875_v45  ;;  %v2082_v60 = vadd.f32 1.0, %v4395_v7  ;;  %v6888_v7 = vld [vmem:[#allocation42_spill] sm:$0xff] }
 0x5da   :  { %2279 = vmatprep.subr.bf16.mxu0 %v6876_v17  ;;  %3942 = vmatprep.subr.bf16.mxu1 %v6733_v57 }
 0x5db   :  { %2309 = vmatprep.mubr.bf16.mxu0 %v6734_v4  ;;  %3956 = vmatprep.mubr.msk.bf16.mxu1 %vm4794_vm2, %v6733_v57 }
 0x5dd   :  { %2280 = vmatpush1.bf16.msra.mxu0 %v6877_v31  ;;  %3943 = vmatpush3.bf16.msra.mxu1 %v6878_v34 }
 0x5de   :  { %2281 = vmatprep.subr.bf16.mxu0 %v6879_v35  ;;  %3944 = vmatprep.subr.bf16.mxu1 %v6733_v57 }
 0x5e0   :  { %v4397_v1 = vpop.eup %4396 }
 0x5e1   :  { %v2086_v6 = vmul.f32 %v4397_v1, %v2085_v28  ;;  %2282 = vmatpush1.bf16.msra.mxu0 %v5814_v42  ;;  %3945 = vmatpush3.bf16.msra.mxu1 %v5817_v21 }
 0x5e2   :  { %2283 = vmatprep.subr.bf16.mxu0 %v5820_v9  ;;  %3946 = vmatprep.subr.bf16.mxu1 %v6733_v57 }
 0x5e3   :  { %v2087_v19 = vadd.f32 %v2086_v6, %v1984_v55  ;;  %v6889_v6 = vld [vmem:[#allocation44_spill] sm:$0xff] }
 0x5e5   :  { %4398 = vtanh.f32 %v2087_v19  ;;  %2284 = vmatpush1.bf16.msra.mxu0 %v6880_v62  ;;  %3947 = vmatpush3.bf16.msra.mxu1 %v6881_v18 }
 0x5e6   :  { %2285 = vmatprep.subr.bf16.mxu0 %v6882_v27  ;;  %3948 = vmatprep.subr.bf16.mxu1 %v6733_v57  ;;  %4400 = vrcp.f32 %v2082_v60 }
 0x5e9   :  { %2286 = vmatpush1.bf16.msra.mxu0 %v6883_v49  ;;  %3949 = vmatpush3.bf16.msra.mxu1 %v6884_v24 }
 0x5ea   :  { %2287 = vmatprep.subr.bf16.mxu0 %v6885_v58  ;;  %3950 = vmatprep.subr.bf16.mxu1 %v6733_v57 }
 0x5ed   :  { %2288 = vmatpush1.bf16.msra.mxu0 %v6886_v2  ;;  %3951 = vmatpush3.bf16.msra.mxu1 %v6887_v54 }
 0x5ee   :  { %2289 = vmatprep.subr.bf16.mxu0 %v6888_v7  ;;  %3952 = vmatprep.subr.bf16.mxu1 %v6733_v57 }
 0x5ef   :  { %v4399_v28 = vpop.eup %4398 }
 0x5f0   :  { %v2089_v1 = vsub.f32 %v5865_v10, %v4399_v28  ;;  %v4401_v55 = vpop.eup %4400  ;;  %v6003_v10 = vld [vmem:[#allocation5 + $0x4] ss:$12 sps:$4 sm:$0xff]  }
 0x5f1   :  { %2290 = vmatpush1.bf16.msra.mxu0 %v5855_v50  ;;  %3953 = vmatpush3.bf16.msra.mxu1 %v6889_v6  ;;  %6891 = vst [vmem:[#allocation49_spill] sm:$0xff] %v6003_v10 }
 0x5f2   :  { %2291 = vmatprep.subr.bf16.mxu0 %v5861_v29  ;;  %3954 = vmatprep.subr.bf16.mxu1 %v6733_v57  ;;  %v2090_v19 = vmul.f32 %v4401_v55, %v2089_v1  ;;  %v6007_v29 = vld [vmem:[#allocation5] ss:$12 sps:$4 sm:$0xff]   ;;  %v6013_v1 = vld [vmem:[#allocation5 + $0x1c] ss:$12 sps:$4 sm:$0xff]  }
 0x5f3   :  { %6892 = vst [vmem:[#allocation61_spill] sm:$0xff] %v6007_v29  ;;  %6894 = vst [vmem:[#allocation63_spill] sm:$0xff] %v6013_v1  ;;  %v6023_v55 = vld [vmem:[#allocation5 + $0x20] ss:$12 sps:$4 sm:$0xff]  }
 0x5f4   :  { %v5997_v60 = vadd.f32 %v4399_v28, %v2090_v19  ;;  %v6010_v28 = vld [vmem:[#allocation5 + $0x8] ss:$12 sps:$4 sm:$0xff]   ;;  %6896 = vst [vmem:[#allocation65_spill] sm:$0xff] %v6023_v55 }
 0x5f5   :  { %2292 = vmatpush1.bf16.msra.mxu0 %v5867_v16  ;;  %3955 = vmatpush3.bf16.msra.mxu1 %v5870_v33  ;;  %6893 = vst [vmem:[#allocation62_spill] sm:$0xff] %v6010_v28  ;;  %v6026_v19 = vld [vmem:[#allocation5 + $0x34] ss:$12 sps:$4 sm:$0xff]  }
 0x5f6   :  { %6890 = vst [vmem:[#allocation48_spill] sm:$0xff] %v5997_v60  ;;  %v2276_v7 = vpack.c.bf16 %v5997_v60, %v5997_v60  ;;  %2380 = vmatprep.subr.bf16.mxu0 %v6003_v10  ;;  %3960 = vmatprep.subr.bf16.mxu1 %v6733_v57  ;;  %6897 = vst [vmem:[#allocation66_spill] sm:$0xff] %v6026_v19  ;;  %v6914_v33 = vld [vmem:[#allocation29_spill] sm:$0xff] }
 0x5f8   :  { %2310 = vmatmul.mubr.bf16.vlgmr.msra.gmra.mrb[56].mxu0 %v2276_v7  ;;  %3957 = vmatmul.mubr.bf16.vlgmr.msra.gmra.mrb[68].mxu1 %v2276_v7  ;;  %v6020_v7 = vld [vmem:[#allocation5 + $0x18] ss:$12 sps:$4 sm:$0xff]  }
 0x5f9   :  { %2381 = vmatpush1.bf16.msra.mxu0 %v6007_v29  ;;  %3961 = vmatpush3.bf16.msra.mxu1 %v6010_v28  ;;  %6895 = vst [vmem:[#allocation64_spill] sm:$0xff] %v6020_v7  ;;  %v6033_v28 = vld [vmem:[#allocation5 + $0x38] ss:$12 sps:$4 sm:$0xff]  }
 0x5fa   :  { %2382 = vmatprep.subr.bf16.mxu0 %v6013_v1  ;;  %3962 = vmatprep.subr.bf16.mxu1 %v6733_v57  ;;  %v6030_v1 = vld [vmem:[#allocation5 + $0x30] ss:$12 sps:$4 sm:$0xff]   ;;  %6899 = vst [vmem:[#allocation68_spill] sm:$0xff] %v6033_v28  ;;  %v6036_v29 = vld [vmem:[#allocation5 + $0x4c] ss:$12 sps:$4 sm:$0xff]  }
 0x5fb   :  { %2412 = vmatprep.mubr.bf16.mxu0 %v6734_v4  ;;  %3976 = vmatprep.mubr.msk.bf16.mxu1 %vm4794_vm2, %v6733_v57  ;;  %6898 = vst [vmem:[#allocation67_spill] sm:$0xff] %v6030_v1  ;;  %6900 = vst [vmem:[#allocation69_spill] sm:$0xff] %v6036_v29 }
 0x5fd   :  { %2383 = vmatpush1.bf16.msra.mxu0 %v6020_v7  ;;  %3963 = vmatpush3.bf16.msra.mxu1 %v6023_v55  ;;  %v6040_v55 = vld [vmem:[#allocation5 + $0x48] ss:$12 sps:$4 sm:$0xff]   ;;  %v6046_v7 = vld [vmem:[#allocation5 + $0x64] ss:$12 sps:$4 sm:$0xff]  }
 0x5fe   :  { %2384 = vmatprep.subr.bf16.mxu0 %v6026_v19  ;;  %3964 = vmatprep.subr.bf16.mxu1 %v6733_v57  ;;  %6901 = vst [vmem:[#allocation70_spill] sm:$0xff] %v6040_v55  ;;  %v6043_v19 = vld [vmem:[#allocation5 + $0x50] ss:$12 sps:$4 sm:$0xff]   ;;  %6903 = vst [vmem:[#allocation23_spill] sm:$0xff] %v6046_v7 }
 0x5ff   :  { %6902 = vst [vmem:[#allocation21_spill] sm:$0xff] %v6043_v19 }
 0x601   :  { %2385 = vmatpush1.bf16.msra.mxu0 %v6030_v1  ;;  %3965 = vmatpush3.bf16.msra.mxu1 %v6033_v28  ;;  %v6050_v28 = vld [vmem:[#allocation5 + $0x60] ss:$12 sps:$4 sm:$0xff]   ;;  %v6056_v1 = vld [vmem:[#allocation5 + $0x7c] ss:$12 sps:$4 sm:$0xff]  }
 0x602   :  { %2386 = vmatprep.subr.bf16.mxu0 %v6036_v29  ;;  %3966 = vmatprep.subr.bf16.mxu1 %v6733_v57  ;;  %6904 = vst [vmem:[#allocation24_spill] sm:$0xff] %v6050_v28  ;;  %v6053_v29 = vld [vmem:[#allocation5 + $0x68] ss:$12 sps:$4 sm:$0xff]   ;;  %6906 = vst [vmem:[#allocation26_spill] sm:$0xff] %v6056_v1 }
 0x603   :  { %6905 = vst [vmem:[#allocation25_spill] sm:$0xff] %v6053_v29 }
 0x605   :  { %2387 = vmatpush1.bf16.msra.mxu0 %v6040_v55  ;;  %3967 = vmatpush3.bf16.msra.mxu1 %v6043_v19  ;;  %v6060_v19 = vld [vmem:[#allocation5 + $0x78] ss:$12 sps:$4 sm:$0xff]   ;;  %v6066_v55 = vld [vmem:[#allocation5 + $0x94] ss:$12 sps:$4 sm:$0xff]  }
 0x606   :  { %2388 = vmatprep.subr.bf16.mxu0 %v6046_v7  ;;  %3968 = vmatprep.subr.bf16.mxu1 %v6733_v57  ;;  %6907 = vst [vmem:[#allocation30_spill] sm:$0xff] %v6060_v19  ;;  %v6063_v7 = vld [vmem:[#allocation5 + $0x80] ss:$12 sps:$4 sm:$0xff]   ;;  %6909 = vst [vmem:[#allocation20_spill] sm:$0xff] %v6066_v55 }
 0x607   :  { %6908 = vst [vmem:[#allocation19_spill] sm:$0xff] %v6063_v7 }
 0x609   :  { %2389 = vmatpush1.bf16.msra.mxu0 %v6050_v28  ;;  %3969 = vmatpush3.bf16.msra.mxu1 %v6053_v29  ;;  %v6070_v29 = vld [vmem:[#allocation5 + $0x90] ss:$12 sps:$4 sm:$0xff]  }
 0x60a   :  { %2390 = vmatprep.subr.bf16.mxu0 %v6056_v1  ;;  %3970 = vmatprep.subr.bf16.mxu1 %v6733_v57  ;;  %6910 = vst [vmem:[#allocation22_spill] sm:$0xff] %v6070_v29  ;;  %v6074_v1 = vld [vmem:[#allocation5 + $0xac] ss:$12 sps:$4 sm:$0xff]  }
 0x60b   :  { %6911 = vst [vmem:[#allocation50_spill] sm:$0xff] %v6074_v1 }
 0x60d   :  { %2391 = vmatpush1.bf16.msra.mxu0 %v6060_v19  ;;  %3971 = vmatpush3.bf16.msra.mxu1 %v6063_v7  ;;  %v6078_v19 = vld [vmem:[#allocation5 + $0xa8] ss:$12 sps:$4 sm:$0xff]   ;;  %v6913_v7 = vld [vmem:[#allocation27_spill] sm:$0xff] }
 0x60e   :  { %2392 = vmatprep.subr.bf16.mxu0 %v6066_v55  ;;  %3972 = vmatprep.subr.bf16.mxu1 %v6733_v57  ;;  %6912 = vst [vmem:[#allocation51_spill] sm:$0xff] %v6078_v19 }
 0x611   :  { %2393 = vmatpush1.bf16.msra.mxu0 %v6070_v29  ;;  %3973 = vmatpush3.bf16.msra.mxu1 %v5668_v11 }
 0x612   :  { %2394 = vmatprep.subr.bf16.mxu0 %v6074_v1  ;;  %3974 = vmatprep.subr.bf16.mxu1 %v6733_v57 }
 0x615   :  { %2395 = vmatpush1.bf16.msra.mxu0 %v6078_v19  ;;  %3975 = vmatpush3.bf16.msra.mxu1 %v5674_v61 }
 0x616   :  { %2482 = vmatprep.subr.bf16.mxu0 %v5677_v63  ;;  %3980 = vmatprep.subr.bf16.mxu1 %v6733_v57 }
 0x68b   :  { %v2127_v55 = vpop.f32.mrb[52].mxu0  ;;  %v2168_v29 = vpop.f32.mrb[60].mxu1 }
 0x68c   :  { %v2174_v11 = vadd.f32 %v2127_v55, %v6913_v7  ;;  %v2129_v28 = vpop.f32.mrb[53].mxu0  ;;  %v3918_v10 = vpop.f32.mrb[61].mxu1  ;;  %v2188_v58 = vadd.f32 %v5683_v13, %v2168_v29  ;;  %v6915_v55 = vld [vmem:[#allocation32_spill] sm:$0xff] }
 0x68d   :  { %v2181_v1 = vadd.f32 %v2129_v28, %v6914_v33  ;;  %v2131_v16 = vpop.f32.mrb[54].mxu0  ;;  %v2171_v6 = vpop.f32.mrb[62].mxu1 }
 0x68e   :  { %v3377_v50 = vmul.f32 -1.442695, %v2174_v11  ;;  %v2132_v60 = vpop.f32.mrb[55].mxu0  ;;  %v3919_v54 = vpop.f32.mrb[63].mxu1  ;;  %v6931_v11 = vld [vmem:[#allocation63_spill] sm:$0xff] }
 0x68f   :  { %v3378_v19 = vmul.f32 -1.442695, %v2181_v1 }
 0x690   :  { %4402 = vpow2.f32 %v3377_v50 }
 0x691   :  { %4404 = vpow2.f32 %v3378_v19  ;;  %v6930_v19 = vld [vmem:[#allocation62_spill] sm:$0xff] }
 0x69a   :  { %v4403_v61 = vpop.eup %4402 }
 0x69b   :  { %v2178_v2 = vadd.f32 1.0, %v4403_v61  ;;  %v4405_v63 = vpop.eup %4404  ;;  %v6932_v61 = vld [vmem:[#allocation64_spill] sm:$0xff] }
 0x69c   :  { %v2185_v49 = vadd.f32 1.0, %v4405_v63  ;;  %v6933_v63 = vld [vmem:[#allocation65_spill] sm:$0xff] }
 0x69d   :  { %4406 = vrcp.f32 %v2178_v2 }
 0x6a7   :  { %v4407_v24 = vpop.eup %4406 }
 0x6a8   :  { %v2189_v7 = vmul.f32 %v4407_v24, %v2188_v58  ;;  %v6928_v24 = vld [vmem:[#allocation49_spill] sm:$0xff] }
 0x6a9   :  { %v6929_v58 = vld [vmem:[#allocation61_spill] sm:$0xff] }
 0x6aa   :  { %v2190_v10 = vadd.f32 %v2189_v7, %v6915_v55  ;;  %v6934_v7 = vld [vmem:[#allocation66_spill] sm:$0xff]  ;;  %v6935_v55 = vld [vmem:[#allocation67_spill] sm:$0xff] }
 0x6ab   :  { %v6088_v33 = vpop.f32.mrb[64].mxu1 }
 0x6ac   :  { %4408 = vtanh.f32 %v2190_v10  ;;  %v3938_v16 = vpop.f32.mrb[65].mxu1  ;;  %v6936_v10 = vld [vmem:[#allocation68_spill] sm:$0xff] }
 0x6ad   :  { %v2273_v6 = vpop.f32.mrb[66].mxu1  ;;  %4410 = vrcp.f32 %v2185_v49  ;;  %v6938_v16 = vld [vmem:[#allocation70_spill] sm:$0xff] }
 0x6ae   :  { %v3939_v50 = vpop.f32.mrb[67].mxu1  ;;  %v6939_v6 = vld [vmem:[#allocation21_spill] sm:$0xff] }
 0x6af   :  { %v6940_v50 = vld [vmem:[#allocation23_spill] sm:$0xff] }
 0x6b6   :  { %v4409_v54 = vpop.eup %4408 }
 0x6b7   :  { %v2192_v60 = vsub.f32 %v5919_v36, %v4409_v54  ;;  %v4411_v28 = vpop.eup %4410 }
 0x6b9   :  { %v2193_v2 = vmul.f32 %v4411_v28, %v2192_v60  ;;  %v6942_v60 = vld [vmem:[#allocation25_spill] sm:$0xff]  ;;  %v6943_v28 = vld [vmem:[#allocation26_spill] sm:$0xff] }
 0x6bb   :  { %v6091_v1 = vadd.f32 %v4409_v54, %v2193_v2  ;;  %v6941_v54 = vld [vmem:[#allocation24_spill] sm:$0xff]  ;;  %v6944_v2 = vld [vmem:[#allocation30_spill] sm:$0xff] }
 0x6bd   :  { %v2379_v13 = vpack.c.bf16 %v6091_v1, %v6091_v1 }
 0x6bf   :  { %2413 = vmatmul.mubr.bf16.vlgmr.msra.gmra.mrb[60].mxu0 %v2379_v13  ;;  %3977 = vmatmul.mubr.bf16.vlgmr.msra.gmra.mrb[72].mxu1 %v2379_v13 }
 0x6c0   :  { %2483 = vmatpush1.bf16.msra.mxu0 %v5698_v44  ;;  %3981 = vmatpush3.bf16.msra.mxu1 %v5701_v0 }
 0x6c1   :  { %2484 = vmatprep.subr.bf16.mxu0 %v5704_v25  ;;  %3982 = vmatprep.subr.bf16.mxu1 %v6733_v57 }
 0x6c2   :  { %2514 = vmatprep.mubr.bf16.mxu0 %v6734_v4  ;;  %3996 = vmatprep.mubr.msk.bf16.mxu1 %vm4794_vm2, %v6733_v57 }
 0x6c4   :  { %2485 = vmatpush1.bf16.msra.mxu0 %v5711_v39  ;;  %3983 = vmatpush3.bf16.msra.mxu1 %v5714_v41 }
 0x6c5   :  { %2486 = vmatprep.subr.bf16.mxu0 %v5717_v12  ;;  %3984 = vmatprep.subr.bf16.mxu1 %v6733_v57 }
 0x6c8   :  { %2487 = vmatpush1.bf16.msra.mxu0 %v5721_v26  ;;  %3985 = vmatpush3.bf16.msra.mxu1 %v5724_v48 }
 0x6c9   :  { %2488 = vmatprep.subr.bf16.mxu0 %v5727_v52  ;;  %3986 = vmatprep.subr.bf16.mxu1 %v6733_v57 }
 0x6cb   :  { %v2311_v44 = vpop.f32.mrb[56].mxu0  ;;  %v2352_v0 = vpop.f32.mrb[68].mxu1 }
 0x6cc   :  { %v4148_v25 = vadd.f32 %v2311_v44, %v5392_v15  ;;  %v2313_v29 = vpop.f32.mrb[57].mxu0  ;;  %v3958_v39 = vpop.f32.mrb[69].mxu1  ;;  %2489 = vmatpush1.bf16.msra.mxu0 %v5734_v56  ;;  %3987 = vmatpush3.bf16.msra.mxu1 %v5737_v5  ;;  %v6946_v44 = vld [vmem:[#allocation20_spill] sm:$0xff] }
 0x6cd   :  { %v2315_v41 = vpop.f32.mrb[58].mxu0  ;;  %v2355_v12 = vpop.f32.mrb[70].mxu1  ;;  %2490 = vmatprep.subr.bf16.mxu0 %v5740_v59  ;;  %3988 = vmatprep.subr.bf16.mxu1 %v6733_v57  ;;  %v4149_v56 = vadd.f32 %v2313_v29, %v5403_v30  ;;  %v6948_v29 = vld [vmem:[#allocation50_spill] sm:$0xff]  ;;  %v6949_v39 = vld [vmem:[#allocation51_spill] sm:$0xff] }
 0x6ce   :  { %v3379_v26 = vmul.f32 -1.442695, %v4148_v25  ;;  %v2316_v48 = vpop.f32.mrb[59].mxu0  ;;  %v3959_v52 = vpop.f32.mrb[71].mxu1  ;;  %v4568_v25 = vld [vmem:[#allocation5 + $0x98] ss:$12 sps:$4 sm:$0xff]  }
 0x6cf   :  { %v3380_v5 = vmul.f32 -1.442695, %v4149_v56  ;;  %v4569_v41 = vld [vmem:[#allocation5 + $0xb0] ss:$12 sps:$4 sm:$0xff]  }
 0x6d0   :  { %4412 = vpow2.f32 %v3379_v26  ;;  %2491 = vmatpush1.bf16.msra.mxu0 %v5744_v38  ;;  %3989 = vmatpush3.bf16.msra.mxu1 %v5747_v3  ;;  %v6206_v12 = vld [vmem:[#allocation8 + $0x4] ss:$12 sps:$4 sm:$0xff]   ;;  %v6950_v52 = vld [vmem:[#allocation33_spill] sm:$0xff] }
 0x6d1   :  { %2492 = vmatprep.subr.bf16.mxu0 %v5750_v47  ;;  %3990 = vmatprep.subr.bf16.mxu1 %v6733_v57  ;;  %4414 = vpow2.f32 %v3380_v5  ;;  %v2372_v47 = vadd.f32 %v5971_v43, %v2352_v0  ;;  %v6947_v0 = vld [vmem:[#allocation22_spill] sm:$0xff] }
 0x6d4   :  { %2493 = vmatpush1.bf16.msra.mxu0 %v5755_v32  ;;  %3991 = vmatpush3.bf16.msra.mxu1 %v5758_v14  ;;  %v2271_v14 = vadd.f32 %v6088_v33, %v5433_v20  ;;  %v6937_v33 = vld [vmem:[#allocation69_spill] sm:$0xff] }
 0x6d5   :  { %2494 = vmatprep.subr.bf16.mxu0 %v5761_v46  ;;  %3992 = vmatprep.subr.bf16.mxu1 %v6733_v57 }
 0x6d8   :  { %2495 = vmatpush1.bf16.msra.mxu0 %v5765_v40  ;;  %3993 = vmatpush3.bf16.msra.mxu1 %v6869_v53  ;;  %v6916_v53 = vld [vmem:[#allocation60_spill] sm:$0xff] }
 0x6d9   :  { %2496 = vmatprep.subr.bf16.mxu0 %v6870_v37  ;;  %3994 = vmatprep.subr.bf16.mxu1 %v6733_v57  ;;  %v6920_v37 = vld [vmem:[#allocation41_spill] sm:$0xff] }
 0x6da   :  { %v4413_v59 = vpop.eup %4412 }
 0x6db   :  { %v2362_v38 = vadd.f32 1.0, %v4413_v59  ;;  %v4415_v3 = vpop.eup %4414 }
 0x6dc   :  { %2497 = vmatpush1.bf16.msra.mxu0 %v6871_v51  ;;  %3995 = vmatpush3.bf16.msra.mxu1 %v6872_v23  ;;  %v2369_v36 = vadd.f32 1.0, %v4415_v3  ;;  %v6921_v51 = vld [vmem:[#allocation42_spill] sm:$0xff] }
 0x6dd   :  { %4416 = vrcp.f32 %v2362_v38  ;;  %2564 = vmatprep.subr.bf16.mxu0 %v6873_v8  ;;  %4000 = vmatprep.subr.bf16.mxu1 %v6733_v57  ;;  %v6922_v8 = vld [vmem:[#allocation48_spill] sm:$0xff]  ;;  %v6951_v38 = vld [vmem:[#allocation34_spill] sm:$0xff] }
 0x6df   :  { %2515 = vmatmul.mubr.bf16.vlgmr.msra.gmra.mrb[64].mxu0 %v2379_v13  ;;  %3997 = vmatmul.mubr.bf16.vlgmr.msra.gmra.mrb[76].mxu1 %v2379_v13  ;;  %v6945_v13 = vld [vmem:[#allocation19_spill] sm:$0xff] }
 0x6e0   :  { %2565 = vmatpush1.bf16.msra.mxu0 %v6874_v22  ;;  %4001 = vmatpush3.bf16.msra.mxu1 %v6875_v45 }
 0x6e1   :  { %2566 = vmatprep.subr.bf16.mxu0 %v6876_v17  ;;  %4002 = vmatprep.subr.bf16.mxu1 %v6733_v57  ;;  %v6923_v17 = vld [vmem:[#allocation43_spill] sm:$0xff] }
 0x6e2   :  { %2596 = vmatprep.mubr.bf16.mxu0 %v6734_v4  ;;  %4016 = vmatprep.mubr.msk.bf16.mxu1 %vm4794_vm2, %v6733_v57 }
 0x6e4   :  { %2567 = vmatpush1.bf16.msra.mxu0 %v6877_v31  ;;  %4003 = vmatpush3.bf16.msra.mxu1 %v6878_v34  ;;  %v6924_v31 = vld [vmem:[#allocation44_spill] sm:$0xff]  ;;  %v6925_v34 = vld [vmem:[#allocation45_spill] sm:$0xff] }
 0x6e5   :  { %2568 = vmatprep.subr.bf16.mxu0 %v6879_v35  ;;  %4004 = vmatprep.subr.bf16.mxu1 %v6733_v57 }
 0x6e7   :  { %v4417_v32 = vpop.eup %4416 }
 0x6e8   :  { %v2373_v46 = vmul.f32 %v4417_v32, %v2372_v47  ;;  %2569 = vmatpush1.bf16.msra.mxu0 %v5814_v42  ;;  %4005 = vmatpush3.bf16.msra.mxu1 %v5817_v21  ;;  %v6917_v42 = vld [vmem:[#allocation38_spill] sm:$0xff]  ;;  %v6918_v21 = vld [vmem:[#allocation39_spill] sm:$0xff] }
 0x6e9   :  { %2570 = vmatprep.subr.bf16.mxu0 %v5820_v9  ;;  %4006 = vmatprep.subr.bf16.mxu1 %v6733_v57  ;;  %v6919_v9 = vld [vmem:[#allocation40_spill] sm:$0xff] }
 0x6ea   :  { %v2374_v40 = vadd.f32 %v2373_v46, %v2271_v14 }
 0x6ec   :  { %4418 = vtanh.f32 %v2374_v40  ;;  %2571 = vmatpush1.bf16.msra.mxu0 %v6880_v62  ;;  %4007 = vmatpush3.bf16.msra.mxu1 %v6881_v18  ;;  %v6926_v18 = vld [vmem:[#allocation46_spill] sm:$0xff] }
 0x6ed   :  { %2572 = vmatprep.subr.bf16.mxu0 %v6882_v27  ;;  %4008 = vmatprep.subr.bf16.mxu1 %v6733_v57  ;;  %4420 = vrcp.f32 %v2369_v36  ;;  %v6927_v27 = vld [vmem:[#allocation47_spill] sm:$0xff] }
 0x6f0   :  { %2573 = vmatpush1.bf16.msra.mxu0 %v6916_v53  ;;  %4009 = vmatpush3.bf16.msra.mxu1 %v6917_v42 }
 0x6f1   :  { %2574 = vmatprep.subr.bf16.mxu0 %v6918_v21  ;;  %4010 = vmatprep.subr.bf16.mxu1 %v6733_v57 }
 0x6f4   :  { %2575 = vmatpush1.bf16.msra.mxu0 %v6919_v9  ;;  %4011 = vmatpush3.bf16.msra.mxu1 %v6920_v37  ;;  %v6212_v9 = vld [vmem:[#allocation7] ss:$0 sm:$0xff] }
 0x6f5   :  { %2576 = vmatprep.subr.bf16.mxu0 %v6921_v51  ;;  %4012 = vmatprep.subr.bf16.mxu1 %v6733_v57 }
 0x6f6   :  { %v4419_v23 = vpop.eup %4418 }
 0x6f7   :  { %v2376_v22 = vsub.f32 %v6922_v8, %v4419_v23  ;;  %v4421_v45 = vpop.eup %4420  ;;  %v6952_v8 = vld [vmem:[#allocation28_spill] sm:$0xff] }
 0x6f8   :  { %2577 = vmatpush1.bf16.msra.mxu0 %v6923_v17  ;;  %4013 = vmatpush3.bf16.msra.mxu1 %v6924_v31 }
 0x6f9   :  { %2578 = vmatprep.subr.bf16.mxu0 %v6925_v34  ;;  %4014 = vmatprep.subr.bf16.mxu1 %v6733_v57  ;;  %v2377_v35 = vmul.f32 %v4421_v45, %v2376_v22 }
 0x6fb   :  { %v6167_v62 = vadd.f32 %v4419_v23, %v2377_v35 }
 0x6fc   :  { %2579 = vmatpush1.bf16.msra.mxu0 %v6926_v18  ;;  %4015 = vmatpush3.bf16.msra.mxu1 %v6927_v27 }
 0x6fd   :  { %v2563_v49 = vpack.c.bf16 %v6167_v62, %v6167_v62  ;;  %2667 = vmatprep.subr.bf16.mxu0 %v6928_v24  ;;  %4020 = vmatprep.subr.bf16.mxu1 %v6733_v57 }
 0x6ff   :  { %2597 = vmatmul.mubr.bf16.vlgmr.msra.gmra.mrb[64].mxu0 %v2563_v49  ;;  %4017 = vmatmul.mubr.bf16.vlgmr.msra.gmra.mrb[80].mxu1 %v2563_v49 }
 0x700   :  { %2668 = vmatpush1.bf16.msra.mxu0 %v6929_v58  ;;  %4021 = vmatpush3.bf16.msra.mxu1 %v6930_v19 }
 0x701   :  { %2669 = vmatprep.subr.bf16.mxu0 %v6931_v11  ;;  %4022 = vmatprep.subr.bf16.mxu1 %v6733_v57  ;;  %v6227_v11 = vld [vmem:[#allocation8] ss:$12 sps:$4 sm:$0xff]  }
 0x702   :  { %2699 = vmatprep.mubr.bf16.mxu0 %v6734_v4  ;;  %4036 = vmatprep.mubr.msk.bf16.mxu1 %vm4794_vm2, %v6733_v57 }
 0x704   :  { %2670 = vmatpush1.bf16.msra.mxu0 %v6932_v61  ;;  %4023 = vmatpush3.bf16.msra.mxu1 %v6933_v63  ;;  %v6230_v61 = vld [vmem:[#allocation8 + $0x8] ss:$12 sps:$4 sm:$0xff]   ;;  %v6240_v63 = vld [vmem:[#allocation8 + $0x18] ss:$12 sps:$4 sm:$0xff]  }
 0x705   :  { %2671 = vmatprep.subr.bf16.mxu0 %v6934_v7  ;;  %4024 = vmatprep.subr.bf16.mxu1 %v6733_v57  ;;  %v6243_v7 = vld [vmem:[#allocation8 + $0x20] ss:$12 sps:$4 sm:$0xff]  }
 0x708   :  { %2672 = vmatpush1.bf16.msra.mxu0 %v6935_v55  ;;  %4025 = vmatpush3.bf16.msra.mxu1 %v6936_v10  ;;  %v6246_v55 = vld [vmem:[#allocation8 + $0x34] ss:$12 sps:$4 sm:$0xff]   ;;  %v6250_v10 = vld [vmem:[#allocation8 + $0x30] ss:$12 sps:$4 sm:$0xff]  }
 0x709   :  { %2673 = vmatprep.subr.bf16.mxu0 %v6937_v33  ;;  %4026 = vmatprep.subr.bf16.mxu1 %v6733_v57  ;;  %v6253_v33 = vld [vmem:[#allocation8 + $0x38] ss:$12 sps:$4 sm:$0xff]  }
 0x70c   :  { %2674 = vmatpush1.bf16.msra.mxu0 %v6938_v16  ;;  %4027 = vmatpush3.bf16.msra.mxu1 %v6939_v6  ;;  %v6256_v16 = vld [vmem:[#allocation8 + $0x4c] ss:$12 sps:$4 sm:$0xff]  }
 0x70d   :  { %2675 = vmatprep.subr.bf16.mxu0 %v6940_v50  ;;  %4028 = vmatprep.subr.bf16.mxu1 %v6733_v57 }
 0x710   :  { %2676 = vmatpush1.bf16.msra.mxu0 %v6941_v54  ;;  %4029 = vmatpush3.bf16.msra.mxu1 %v6942_v60 }
 0x711   :  { %2677 = vmatprep.subr.bf16.mxu0 %v6943_v28  ;;  %4030 = vmatprep.subr.bf16.mxu1 %v6733_v57 }
 0x714   :  { %2678 = vmatpush1.bf16.msra.mxu0 %v6944_v2  ;;  %4031 = vmatpush3.bf16.msra.mxu1 %v6945_v13  ;;  %v6263_v2 = vld [vmem:[#allocation8 + $0x48] ss:$12 sps:$4 sm:$0xff]   ;;  %v6266_v13 = vld [vmem:[#allocation8 + $0x50] ss:$12 sps:$4 sm:$0xff]  }
 0x715   :  { %2679 = vmatprep.subr.bf16.mxu0 %v6946_v44  ;;  %4032 = vmatprep.subr.bf16.mxu1 %v6733_v57 }
 0x718   :  { %2680 = vmatpush1.bf16.msra.mxu0 %v6947_v0  ;;  %4033 = vmatpush3.bf16.msra.mxu1 %v4568_v25  ;;  %v6269_v25 = vld [vmem:[#allocation8 + $0x64] ss:$12 sps:$4 sm:$0xff]  }
 0x719   :  { %2681 = vmatprep.subr.bf16.mxu0 %v6948_v29  ;;  %4034 = vmatprep.subr.bf16.mxu1 %v6733_v57 }
 0x71c   :  { %2682 = vmatpush1.bf16.msra.mxu0 %v6949_v39  ;;  %4035 = vmatpush3.bf16.msra.mxu1 %v4569_v41 }
 0x71d   :  { %2769 = vmatprep.subr.bf16.mxu0 %v6206_v12  ;;  %4040 = vmatprep.subr.bf16.mxu1 %v6733_v57 }
 0x792   :  { %v2414_v26 = vpop.f32.mrb[60].mxu0  ;;  %v2455_v48 = vpop.f32.mrb[72].mxu1 }
 0x793   :  { %v2461_v56 = vadd.f32 %v2414_v26, %v6950_v52  ;;  %v2416_v5 = vpop.f32.mrb[61].mxu0  ;;  %v3978_v59 = vpop.f32.mrb[73].mxu1  ;;  %v2475_v37 = vadd.f32 %v6212_v9, %v2455_v48  ;;  %v6273_v26 = vld [vmem:[#allocation8 + $0x60] ss:$12 sps:$4 sm:$0xff]   ;;  %v6276_v48 = vld [vmem:[#allocation8 + $0x68] ss:$12 sps:$4 sm:$0xff]  }
 0x794   :  { %v2468_v3 = vadd.f32 %v2416_v5, %v6951_v38  ;;  %v2418_v47 = vpop.f32.mrb[62].mxu0  ;;  %v2458_v32 = vpop.f32.mrb[74].mxu1  ;;  %v6279_v52 = vld [vmem:[#allocation8 + $0x7c] ss:$12 sps:$4 sm:$0xff]   ;;  %v6284_v5 = vld [vmem:[#allocation8 + $0x78] ss:$12 sps:$4 sm:$0xff]  }
 0x795   :  { %v3381_v14 = vmul.f32 -1.442695, %v2461_v56  ;;  %v2419_v46 = vpop.f32.mrb[63].mxu0  ;;  %v3979_v40 = vpop.f32.mrb[75].mxu1  ;;  %v6287_v59 = vld [vmem:[#allocation8 + $0x80] ss:$12 sps:$4 sm:$0xff]  }
 0x796   :  { %v3382_v36 = vmul.f32 -1.442695, %v2468_v3  ;;  %v6290_v38 = vld [vmem:[#allocation8 + $0x94] ss:$12 sps:$4 sm:$0xff]   ;;  %v6294_v47 = vld [vmem:[#allocation8 + $0x90] ss:$12 sps:$4 sm:$0xff]  }
 0x797   :  { %4422 = vpow2.f32 %v3381_v14  ;;  %v6297_v32 = vld [vmem:[#allocation8 + $0x98] ss:$12 sps:$4 sm:$0xff]  }
 0x798   :  { %4424 = vpow2.f32 %v3382_v36  ;;  %v6300_v14 = vld [vmem:[#allocation8 + $0xac] ss:$12 sps:$4 sm:$0xff]   ;;  %v6304_v36 = vld [vmem:[#allocation8 + $0xa8] ss:$12 sps:$4 sm:$0xff]  }
 0x7a1   :  { %v4423_v53 = vpop.eup %4422 }
 0x7a2   :  { %v2465_v42 = vadd.f32 1.0, %v4423_v53  ;;  %v4425_v21 = vpop.eup %4424  ;;  %v6307_v53 = vld [vmem:[#allocation8 + $0xb0] ss:$12 sps:$4 sm:$0xff]  }
 0x7a3   :  { %v2472_v45 = vadd.f32 1.0, %v4425_v21  ;;  %v6316_v21 = vld [vmem:[#allocation10] ss:$12 sps:$4 sm:$0xff]  }
 0x7a4   :  { %4426 = vrcp.f32 %v2465_v42  ;;  %v6310_v42 = vld [vmem:[#allocation10 + $0x4] ss:$12 sps:$4 sm:$0xff]  }
 0x7ae   :  { %v4427_v51 = vpop.eup %4426 }
 0x7af   :  { %v2476_v23 = vmul.f32 %v4427_v51, %v2475_v37  ;;  %v6319_v37 = vld [vmem:[#allocation10 + $0x8] ss:$12 sps:$4 sm:$0xff]  }
 0x7b0   :  { %v6322_v51 = vld [vmem:[#allocation10 + $0x1c] ss:$12 sps:$4 sm:$0xff]  }
 0x7b1   :  { %v2477_v22 = vadd.f32 %v2476_v23, %v6952_v8  ;;  %v6329_v23 = vld [vmem:[#allocation10 + $0x18] ss:$12 sps:$4 sm:$0xff]   ;;  %v6332_v8 = vld [vmem:[#allocation10 + $0x20] ss:$12 sps:$4 sm:$0xff]  }
 0x7b2   :  { %v6216_v17 = vpop.f32.mrb[76].mxu1 }
 0x7b3   :  { %4428 = vtanh.f32 %v2477_v22  ;;  %v3998_v31 = vpop.f32.mrb[77].mxu1  ;;  %v6335_v22 = vld [vmem:[#allocation10 + $0x34] ss:$12 sps:$4 sm:$0xff]  }
 0x7b4   :  { %v2560_v34 = vpop.f32.mrb[78].mxu1  ;;  %4430 = vrcp.f32 %v2472_v45 }
 0x7b5   :  { %v3999_v35 = vpop.f32.mrb[79].mxu1 }
 0x7b6   :  { %v2558_v35 = vadd.f32 %v6216_v17, %v5433_v20  ;;  %v6356_v17 = vld [vmem:[#allocation10 + $0x50] ss:$12 sps:$4 sm:$0xff]  }
 0x7bd   :  { %v4429_v18 = vpop.eup %4428 }
 0x7be   :  { %v2479_v27 = vsub.f32 %v6091_v1, %v4429_v18  ;;  %v4431_v49 = vpop.eup %4430  ;;  %v6233_v1 = vld [vmem:[#allocation8 + $0x1c] ss:$12 sps:$4 sm:$0xff]  }
 0x7c0   :  { %v2480_v24 = vmul.f32 %v4431_v49, %v2479_v27  ;;  %v6343_v27 = vld [vmem:[#allocation10 + $0x30] ss:$12 sps:$4 sm:$0xff]   ;;  %v6346_v49 = vld [vmem:[#allocation10 + $0x38] ss:$12 sps:$4 sm:$0xff]  }
 0x7c2   :  { %v6219_v58 = vadd.f32 %v4429_v18, %v2480_v24  ;;  %v6349_v24 = vld [vmem:[#allocation10 + $0x4c] ss:$12 sps:$4 sm:$0xff]  }
 0x7c4   :  { %v6223_v19 = vpack.c.bf16 %v6219_v58, %v6219_v58 }
 0x7c6   :  { %2700 = vmatmul.mubr.bf16.vlgmr.msra.gmra.mrb[68].mxu0 %v6223_v19  ;;  %4037 = vmatmul.mubr.bf16.vlgmr.msra.gmra.mrb[84].mxu1 %v6223_v19 }
 0x7c7   :  { %2770 = vmatpush1.bf16.msra.mxu0 %v6227_v11  ;;  %4041 = vmatpush3.bf16.msra.mxu1 %v6230_v61 }
 0x7c8   :  { %2771 = vmatprep.subr.bf16.mxu0 %v6233_v1  ;;  %4042 = vmatprep.subr.bf16.mxu1 %v6733_v57 }
 0x7c9   :  { %2801 = vmatprep.mubr.bf16.mxu0 %v6734_v4  ;;  %4056 = vmatprep.mubr.msk.bf16.mxu1 %vm4794_vm2, %v6733_v57 }
 0x7cb   :  { %2772 = vmatpush1.bf16.msra.mxu0 %v6240_v63  ;;  %4043 = vmatpush3.bf16.msra.mxu1 %v6243_v7 }
 0x7cc   :  { %2773 = vmatprep.subr.bf16.mxu0 %v6246_v55  ;;  %4044 = vmatprep.subr.bf16.mxu1 %v6733_v57 }
 0x7cf   :  { %2774 = vmatpush1.bf16.msra.mxu0 %v6250_v10  ;;  %4045 = vmatpush3.bf16.msra.mxu1 %v6253_v33 }
 0x7d0   :  { %2775 = vmatprep.subr.bf16.mxu0 %v6256_v16  ;;  %4046 = vmatprep.subr.bf16.mxu1 %v6733_v57 }
 0x7d2   :  { %v2598_v6 = vpop.f32.mrb[64].mxu0  ;;  %v6260_v50 = vpop.f32.mrb[80].mxu1 }
 0x7d3   :  { %v4150_v54 = vadd.f32 %v2598_v6, %v5392_v15  ;;  %v2600_v60 = vpop.f32.mrb[65].mxu0  ;;  %v4018_v28 = vpop.f32.mrb[81].mxu1  ;;  %2776 = vmatpush1.bf16.msra.mxu0 %v6263_v2  ;;  %4047 = vmatpush3.bf16.msra.mxu1 %v6266_v13  ;;  %v2659_v31 = vadd.f32 %v5971_v43, %v6260_v50  ;;  %v6353_v6 = vld [vmem:[#allocation10 + $0x48] ss:$12 sps:$4 sm:$0xff]   ;;  %v6359_v50 = vld [vmem:[#allocation10 + $0x64] ss:$12 sps:$4 sm:$0xff]  }
 0x7d4   :  { %v2602_v44 = vpop.f32.mrb[66].mxu0  ;;  %v2642_v0 = vpop.f32.mrb[82].mxu1  ;;  %2777 = vmatprep.subr.bf16.mxu0 %v6269_v25  ;;  %4048 = vmatprep.subr.bf16.mxu1 %v6733_v57  ;;  %v4151_v56 = vadd.f32 %v2600_v60, %v5403_v30  ;;  %v6366_v60 = vld [vmem:[#allocation10 + $0x68] ss:$12 sps:$4 sm:$0xff]  }
 0x7d5   :  { %v3383_v29 = vmul.f32 -1.442695, %v4150_v54  ;;  %v2603_v39 = vpop.f32.mrb[67].mxu0  ;;  %v4019_v41 = vpop.f32.mrb[83].mxu1  ;;  %v6363_v54 = vld [vmem:[#allocation10 + $0x60] ss:$12 sps:$4 sm:$0xff]  }
 0x7d6   :  { %v3384_v3 = vmul.f32 -1.442695, %v4151_v56  ;;  %v6369_v28 = vld [vmem:[#allocation10 + $0x7c] ss:$12 sps:$4 sm:$0xff]   ;;  %v6373_v44 = vld [vmem:[#allocation10 + $0x78] ss:$12 sps:$4 sm:$0xff]  }
 0x7d7   :  { %4432 = vpow2.f32 %v3383_v29  ;;  %2778 = vmatpush1.bf16.msra.mxu0 %v6273_v26  ;;  %4049 = vmatpush3.bf16.msra.mxu1 %v6276_v48  ;;  %v6376_v0 = vld [vmem:[#allocation10 + $0x80] ss:$12 sps:$4 sm:$0xff]  }
 0x7d8   :  { %2779 = vmatprep.subr.bf16.mxu0 %v6279_v52  ;;  %4050 = vmatprep.subr.bf16.mxu1 %v6733_v57  ;;  %4434 = vpow2.f32 %v3384_v3  ;;  %v6379_v29 = vld [vmem:[#allocation10 + $0x94] ss:$12 sps:$4 sm:$0xff]   ;;  %v6384_v3 = vld [vmem:[#allocation10 + $0x90] ss:$12 sps:$4 sm:$0xff]  }
 0x7db   :  { %2780 = vmatpush1.bf16.msra.mxu0 %v6284_v5  ;;  %4051 = vmatpush3.bf16.msra.mxu1 %v6287_v59 }
 0x7dc   :  { %2781 = vmatprep.subr.bf16.mxu0 %v6290_v38  ;;  %4052 = vmatprep.subr.bf16.mxu1 %v6733_v57 }
 0x7df   :  { %2782 = vmatpush1.bf16.msra.mxu0 %v6294_v47  ;;  %4053 = vmatpush3.bf16.msra.mxu1 %v6297_v32 }
 0x7e0   :  { %2783 = vmatprep.subr.bf16.mxu0 %v6300_v14  ;;  %4054 = vmatprep.subr.bf16.mxu1 %v6733_v57 }
 0x7e1   :  { %v4433_v46 = vpop.eup %4432 }
 0x7e2   :  { %v2649_v40 = vadd.f32 1.0, %v4433_v46  ;;  %v4435_v45 = vpop.eup %4434  ;;  %v6387_v46 = vld [vmem:[#allocation10 + $0x98] ss:$12 sps:$4 sm:$0xff]  }
 0x7e3   :  { %2784 = vmatpush1.bf16.msra.mxu0 %v6304_v36  ;;  %4055 = vmatpush3.bf16.msra.mxu1 %v6307_v53 }
 0x7e4   :  { %4436 = vrcp.f32 %v2649_v40  ;;  %2851 = vmatprep.subr.bf16.mxu0 %v6310_v42  ;;  %4060 = vmatprep.subr.bf16.mxu1 %v6733_v57  ;;  %v6390_v40 = vld [vmem:[#allocation10 + $0xac] ss:$12 sps:$4 sm:$0xff]  }
 0x7e6   :  { %2802 = vmatmul.mubr.bf16.vlgmr.msra.gmra.mrb[72].mxu0 %v6223_v19  ;;  %4057 = vmatmul.mubr.bf16.vlgmr.msra.gmra.mrb[88].mxu1 %v6223_v19  ;;  %v2656_v19 = vadd.f32 1.0, %v4435_v45 }
 0x7e7   :  { %2852 = vmatpush1.bf16.msra.mxu0 %v6316_v21  ;;  %4061 = vmatpush3.bf16.msra.mxu1 %v6319_v37 }
 0x7e8   :  { %2853 = vmatprep.subr.bf16.mxu0 %v6322_v51  ;;  %4062 = vmatprep.subr.bf16.mxu1 %v6733_v57 }
 0x7e9   :  { %2883 = vmatprep.mubr.bf16.mxu0 %v6734_v4  ;;  %4076 = vmatprep.mubr.msk.bf16.mxu1 %vm4794_vm2, %v6733_v57 }
 0x7eb   :  { %2854 = vmatpush1.bf16.msra.mxu0 %v6329_v23  ;;  %4063 = vmatpush3.bf16.msra.mxu1 %v6332_v8 }
 0x7ec   :  { %2855 = vmatprep.subr.bf16.mxu0 %v6335_v22  ;;  %4064 = vmatprep.subr.bf16.mxu1 %v6733_v57 }
 0x7ee   :  { %v4437_v34 = vpop.eup %4436 }
 0x7ef   :  { %v2660_v18 = vmul.f32 %v4437_v34, %v2659_v31  ;;  %2856 = vmatpush1.bf16.msra.mxu0 %v6343_v27  ;;  %4065 = vmatpush3.bf16.msra.mxu1 %v6346_v49  ;;  %v6396_v34 = vld [vmem:[#allocation10 + $0xa8] ss:$12 sps:$4 sm:$0xff]  }
 0x7f0   :  { %2857 = vmatprep.subr.bf16.mxu0 %v6349_v24  ;;  %4066 = vmatprep.subr.bf16.mxu1 %v6733_v57 }
 0x7f1   :  { %v2661_v43 = vadd.f32 %v2660_v18, %v2558_v35 }
 0x7f3   :  { %4438 = vtanh.f32 %v2661_v43  ;;  %2858 = vmatpush1.bf16.msra.mxu0 %v6353_v6  ;;  %4067 = vmatpush3.bf16.msra.mxu1 %v6356_v17 }
 0x7f4   :  { %2859 = vmatprep.subr.bf16.mxu0 %v6359_v50  ;;  %4068 = vmatprep.subr.bf16.mxu1 %v6733_v57  ;;  %4440 = vrcp.f32 %v2656_v19 }
 0x7f7   :  { %2860 = vmatpush1.bf16.msra.mxu0 %v6363_v54  ;;  %4069 = vmatpush3.bf16.msra.mxu1 %v6366_v60 }
 0x7f8   :  { %2861 = vmatprep.subr.bf16.mxu0 %v6369_v28  ;;  %4070 = vmatprep.subr.bf16.mxu1 %v6733_v57 }
 0x7fb   :  { %2862 = vmatpush1.bf16.msra.mxu0 %v6373_v44  ;;  %4071 = vmatpush3.bf16.msra.mxu1 %v6376_v0 }
 0x7fc   :  { %2863 = vmatprep.subr.bf16.mxu0 %v6379_v29  ;;  %4072 = vmatprep.subr.bf16.mxu1 %v6733_v57 }
 0x7fd   :  { %v4439_v39 = vpop.eup %4438 }
 0x7fe   :  { %v2663_v41 = vsub.f32 %v6167_v62, %v4439_v39  ;;  %v4441_v56 = vpop.eup %4440  ;;  %v6399_v62 = vld [vmem:[#allocation10 + $0xb0] ss:$12 sps:$4 sm:$0xff]  }
 0x7ff   :  { %2864 = vmatpush1.bf16.msra.mxu0 %v6384_v3  ;;  %4073 = vmatpush3.bf16.msra.mxu1 %v6387_v46 }
 0x800   :  { %2865 = vmatprep.subr.bf16.mxu0 %v6390_v40  ;;  %4074 = vmatprep.subr.bf16.mxu1 %v6733_v57  ;;  %v2664_v45 = vmul.f32 %v4441_v56, %v2663_v41 }
 0x802   :  { %v6394_v31 = vadd.f32 %v4439_v39, %v2664_v45 }
 0x803   :  { %2866 = vmatpush1.bf16.msra.mxu0 %v6396_v34  ;;  %4075 = vmatpush3.bf16.msra.mxu1 %v6399_v62 }
 0x804   :  { %v2850_v35 = vpack.c.bf16 %v6394_v31, %v6394_v31  ;;  %2954 = vmatprep.subr.bf16.mxu0 %v6206_v12  ;;  %4080 = vmatprep.subr.bf16.mxu1 %v6733_v57 }
 0x806   :  { %2884 = vmatmul.mubr.bf16.vlgmr.msra.gmra.mrb[72].mxu0 %v2850_v35  ;;  %4077 = vmatmul.mubr.bf16.vlgmr.msra.gmra.mrb[92].mxu1 %v2850_v35 }
 0x807   :  { %2955 = vmatpush1.bf16.msra.mxu0 %v6227_v11  ;;  %4081 = vmatpush3.bf16.msra.mxu1 %v6230_v61  ;;  %v6953_v61 = vld [vmem:[#allocation35_spill] sm:$0xff] }
 0x808   :  { %2956 = vmatprep.subr.bf16.mxu0 %v6233_v1  ;;  %4082 = vmatprep.subr.bf16.mxu1 %v6733_v57 }
 0x809   :  { %2986 = vmatprep.mubr.bf16.mxu0 %v6734_v4  ;;  %4096 = vmatprep.mubr.msk.bf16.mxu1 %vm4794_vm2, %v6733_v57 }
 0x80b   :  { %2957 = vmatpush1.bf16.msra.mxu0 %v6240_v63  ;;  %4083 = vmatpush3.bf16.msra.mxu1 %v6243_v7 }
 0x80c   :  { %2958 = vmatprep.subr.bf16.mxu0 %v6246_v55  ;;  %4084 = vmatprep.subr.bf16.mxu1 %v6733_v57  ;;  %v6954_v55 = vld [vmem:[#allocation36_spill] sm:$0xff] }
 0x80f   :  { %2959 = vmatpush1.bf16.msra.mxu0 %v6250_v10  ;;  %4085 = vmatpush3.bf16.msra.mxu1 %v6253_v33 }
 0x810   :  { %2960 = vmatprep.subr.bf16.mxu0 %v6256_v16  ;;  %4086 = vmatprep.subr.bf16.mxu1 %v6733_v57 }
 0x813   :  { %2961 = vmatpush1.bf16.msra.mxu0 %v6263_v2  ;;  %4087 = vmatpush3.bf16.msra.mxu1 %v6266_v13 }
 0x814   :  { %2962 = vmatprep.subr.bf16.mxu0 %v6269_v25  ;;  %4088 = vmatprep.subr.bf16.mxu1 %v6733_v57 }
 0x817   :  { %2963 = vmatpush1.bf16.msra.mxu0 %v6273_v26  ;;  %4089 = vmatpush3.bf16.msra.mxu1 %v6276_v48 }
 0x818   :  { %2964 = vmatprep.subr.bf16.mxu0 %v6279_v52  ;;  %4090 = vmatprep.subr.bf16.mxu1 %v6733_v57 }
 0x81b   :  { %2965 = vmatpush1.bf16.msra.mxu0 %v6284_v5  ;;  %4091 = vmatpush3.bf16.msra.mxu1 %v6287_v59 }
 0x81c   :  { %2966 = vmatprep.subr.bf16.mxu0 %v6290_v38  ;;  %4092 = vmatprep.subr.bf16.mxu1 %v6733_v57 }
 0x81f   :  { %2967 = vmatpush1.bf16.msra.mxu0 %v6294_v47  ;;  %4093 = vmatpush3.bf16.msra.mxu1 %v6297_v32  ;;  %v6955_v32 = vld [vmem:[#allocation31_spill] sm:$0xff] }
 0x820   :  { %2968 = vmatprep.subr.bf16.mxu0 %v6300_v14  ;;  %4094 = vmatprep.subr.bf16.mxu1 %v6733_v57 }
 0x823   :  { %2969 = vmatpush1.bf16.msra.mxu0 %v6304_v36  ;;  %4095 = vmatpush3.bf16.msra.mxu1 %v6307_v53 }
 0x824   :  { %3036 = vmatprep.subr.bf16.mxu0 %v6310_v42  ;;  %4100 = vmatprep.subr.bf16.mxu1 %v6733_v57 }
 0x899   :  { %v2701_v12 = vpop.f32.mrb[68].mxu0  ;;  %v2742_v11 = vpop.f32.mrb[84].mxu1 }
 0x89a   :  { %v2748_v1 = vadd.f32 %v2701_v12, %v6953_v61  ;;  %v2703_v63 = vpop.f32.mrb[69].mxu0  ;;  %v4038_v7 = vpop.f32.mrb[85].mxu1  ;;  %v2762_v59 = vadd.f32 %v6212_v9, %v2742_v11  ;;  %v4304_v61 = vld [vmem:[%s6551_s9] sm:$0xff]  }
 0x89b   :  { %v2755_v10 = vadd.f32 %v2703_v63, %v6954_v55  ;;  %v2705_v33 = vpop.f32.mrb[70].mxu0  ;;  %v2745_v16 = vpop.f32.mrb[86].mxu1  ;;  %v4307_v63 = vld [vmem:[%s6551_s9 + $0x18] sm:$0xff]   ;;  %v4308_v7 = vld [vmem:[%s6551_s9 + $0x20] sm:$0xff]   ;;  %v4309_v55 = vld [vmem:[%s6551_s9 + $0x28] sm:$0xff]  }
 0x89c   :  { %v3385_v2 = vmul.f32 -1.442695, %v2748_v1  ;;  %v2706_v13 = vpop.f32.mrb[71].mxu0  ;;  %v4039_v25 = vpop.f32.mrb[87].mxu1  ;;  %v4306_v1 = vld [vmem:[%s6551_s9 + $0x10] sm:$0xff]   ;;  %v4311_v33 = vld [vmem:[%s6551_s9 + $0x38] sm:$0xff]  }
 0x89d   :  { %v3386_v26 = vmul.f32 -1.442695, %v2755_v10  ;;  %v4310_v10 = vld [vmem:[%s6551_s9 + $0x30] sm:$0xff]  }
 0x89e   :  { %4442 = vpow2.f32 %v3385_v2 }
 0x89f   :  { %4444 = vpow2.f32 %v3386_v26 }
 0x8a8   :  { %v4443_v48 = vpop.eup %4442 }
 0x8a9   :  { %v2752_v52 = vadd.f32 1.0, %v4443_v48  ;;  %v4445_v5 = vpop.eup %4444 }
 0x8aa   :  { %v2759_v36 = vadd.f32 1.0, %v4445_v5 }
 0x8ab   :  { %4446 = vrcp.f32 %v2752_v52 }
 0x8b5   :  { %v4447_v38 = vpop.eup %4446 }
 0x8b6   :  { %v2763_v47 = vmul.f32 %v4447_v38, %v2762_v59 }
 0x8b8   :  { %v2764_v14 = vadd.f32 %v2763_v47, %v6955_v32 }
 0x8b9   :  { %v6445_v53 = vpop.f32.mrb[88].mxu1 }
 0x8ba   :  { %4448 = vtanh.f32 %v2764_v14  ;;  %v4058_v42 = vpop.f32.mrb[89].mxu1 }
 0x8bb   :  { %v2847_v18 = vpop.f32.mrb[90].mxu1  ;;  %4450 = vrcp.f32 %v2759_v36 }
 0x8bc   :  { %v4059_v43 = vpop.f32.mrb[91].mxu1 }
 0x8c4   :  { %v4449_v19 = vpop.eup %4448 }
 0x8c5   :  { %v2766_v39 = vsub.f32 %v6219_v58, %v4449_v19  ;;  %v4451_v41 = vpop.eup %4450 }
 0x8c7   :  { %v2767_v56 = vmul.f32 %v4451_v41, %v2766_v39 }
 0x8c9   :  { %v2768_v45 = vadd.f32 %v4449_v19, %v2767_v56 }
 0x8cb   :  { %v2953_v35 = vpack.c.bf16 %v2768_v45, %v2768_v45 }
 0x8cd   :  { %2987 = vmatmul.mubr.bf16.vlgmr.msra.gmra.mrb[76].mxu0 %v2953_v35  ;;  %4097 = vmatmul.mubr.bf16.vlgmr.msra.gmra.mrb[96].mxu1 %v2953_v35 }
 0x8ce   :  { %3037 = vmatpush1.bf16.msra.mxu0 %v6316_v21  ;;  %4101 = vmatpush3.bf16.msra.mxu1 %v6319_v37 }
 0x8cf   :  { %3038 = vmatprep.subr.bf16.mxu0 %v6322_v51  ;;  %4102 = vmatprep.subr.bf16.mxu1 %v6733_v57 }
 0x8d0   :  { %3068 = vmatprep.mubr.bf16.mxu0 %v6734_v4  ;;  %4116 = vmatprep.mubr.msk.bf16.mxu1 %vm4794_vm2, %v6733_v57 }
 0x8d2   :  { %3039 = vmatpush1.bf16.msra.mxu0 %v6329_v23  ;;  %4103 = vmatpush3.bf16.msra.mxu1 %v6332_v8 }
 0x8d3   :  { %3040 = vmatprep.subr.bf16.mxu0 %v6335_v22  ;;  %4104 = vmatprep.subr.bf16.mxu1 %v6733_v57 }
 0x8d6   :  { %3041 = vmatpush1.bf16.msra.mxu0 %v6343_v27  ;;  %4105 = vmatpush3.bf16.msra.mxu1 %v6346_v49 }
 0x8d7   :  { %3042 = vmatprep.subr.bf16.mxu0 %v6349_v24  ;;  %4106 = vmatprep.subr.bf16.mxu1 %v6733_v57 }
 0x8d9   :  { %v2885_v4 = vpop.f32.mrb[72].mxu0  ;;  %v2926_v9 = vpop.f32.mrb[92].mxu1 }
 0x8da   :  { %v4152_v58 = vadd.f32 %v2885_v4, %v5392_v15  ;;  %v2887_v21 = vpop.f32.mrb[73].mxu0  ;;  %v4078_v37 = vpop.f32.mrb[93].mxu1  ;;  %3043 = vmatpush1.bf16.msra.mxu0 %v6353_v6  ;;  %4107 = vmatpush3.bf16.msra.mxu1 %v6356_v17 }
 0x8db   :  { %v2889_v51 = vpop.f32.mrb[74].mxu0  ;;  %v2929_v23 = vpop.f32.mrb[94].mxu1  ;;  %3044 = vmatprep.subr.bf16.mxu0 %v6359_v50  ;;  %4108 = vmatprep.subr.bf16.mxu1 %v6733_v57  ;;  %v4153_v49 = vadd.f32 %v2887_v21, %v5403_v30  ;;  %v3391_v37 = vld [vmem:[%s6552_s10] ss:$0 sm:$0xff] }
 0x8dc   :  { %v3387_v8 = vmul.f32 -1.442695, %v4152_v58  ;;  %v2890_v22 = vpop.f32.mrb[75].mxu0  ;;  %v4079_v27 = vpop.f32.mrb[95].mxu1 }
 0x8dd   :  { %v3388_v24 = vmul.f32 -1.442695, %v4153_v49 }
 0x8de   :  { %4452 = vpow2.f32 %v3387_v8  ;;  %3045 = vmatpush1.bf16.msra.mxu0 %v6363_v54  ;;  %4109 = vmatpush3.bf16.msra.mxu1 %v6366_v60  ;;  %v6484_v54 = vld [vmem:[#allocation11] ss:$0 sm:$0xff] }
 0x8df   :  { %3046 = vmatprep.subr.bf16.mxu0 %v6369_v28  ;;  %4110 = vmatprep.subr.bf16.mxu1 %v6733_v57  ;;  %4454 = vpow2.f32 %v3388_v24  ;;  %v2946_v60 = vadd.f32 %v6484_v54, %v2926_v9 }
 0x8e2   :  { %3047 = vmatpush1.bf16.msra.mxu0 %v6373_v44  ;;  %4111 = vmatpush3.bf16.msra.mxu1 %v6376_v0  ;;  %v2845_v44 = vadd.f32 %v6445_v53, %v5433_v20 }
 0x8e3   :  { %3048 = vmatprep.subr.bf16.mxu0 %v6379_v29  ;;  %4112 = vmatprep.subr.bf16.mxu1 %v6733_v57 }
 0x8e6   :  { %3049 = vmatpush1.bf16.msra.mxu0 %v6384_v3  ;;  %4113 = vmatpush3.bf16.msra.mxu1 %v6387_v46 }
 0x8e7   :  { %3050 = vmatprep.subr.bf16.mxu0 %v6390_v40  ;;  %4114 = vmatprep.subr.bf16.mxu1 %v6733_v57 }
 0x8e8   :  { %v4453_v6 = vpop.eup %4452 }
 0x8e9   :  { %v2936_v17 = vadd.f32 1.0, %v4453_v6  ;;  %v4455_v50 = vpop.eup %4454 }
 0x8ea   :  { %3051 = vmatpush1.bf16.msra.mxu0 %v6396_v34  ;;  %4115 = vmatpush3.bf16.msra.mxu1 %v6399_v62  ;;  %v2943_v3 = vadd.f32 1.0, %v4455_v50 }
 0x8eb   :  { %4456 = vrcp.f32 %v2936_v17  ;;  %4120 = vmatprep.subr.bf16.mxu0 %v6733_v57 }
 0x8f5   :  { %v4457_v28 = vpop.eup %4456 }
 0x8f6   :  { %v2947_v0 = vmul.f32 %v4457_v28, %v2946_v60 }
 0x8f8   :  { %v2948_v29 = vadd.f32 %v2947_v0, %v2845_v44 }
 0x8fa   :  { %4458 = vtanh.f32 %v2948_v29 }
 0x8fb   :  { %4460 = vrcp.f32 %v2943_v3 }
 0x904   :  { %v4459_v46 = vpop.eup %4458 }
 0x905   :  { %v2950_v40 = vsub.f32 %v6394_v31, %v4459_v46  ;;  %v4461_v34 = vpop.eup %4460  ;;  %v4305_v31 = vld [vmem:[%s6551_s9 + $0x8] sm:$0xff]  }
 0x907   :  { %v2951_v62 = vmul.f32 %v4461_v34, %v2950_v40 }
 0x909   :  { %v2952_v12 = vadd.f32 %v4459_v46, %v2951_v62 }
 0x90b   :  { %v3035_v11 = vpack.c.bf16 %v2952_v12, %v2952_v12 }
 0x90d   :  { %3069 = vmatmul.mubr.bf16.vlgmr.msra.gmra.mrb[76].mxu0 %v3035_v11  ;;  %4117 = vmatmul.mubr.bf16.vlgmr.msra.gmra.mrb[100].mxu1 %v3035_v11 }
 0x90e   :  { %4136 = vmatprep.mubr.msk.bf16.mxu0 %vm4794_vm2, %v6733_v57  ;;  %4121 = vmatpush3.bf16.msra.mxu0 %v4304_v61 }
 0x90f   :  { %4122 = vmatprep.subr.bf16.mxu0 %v6733_v57 }
 0x912   :  { %4123 = vmatpush3.bf16.msra.mxu0 %v4305_v31 }
 0x913   :  { %4124 = vmatprep.subr.bf16.mxu0 %v6733_v57 }
 0x916   :  { %4125 = vmatpush3.bf16.msra.mxu0 %v4306_v1 }
 0x917   :  { %4126 = vmatprep.subr.bf16.mxu0 %v6733_v57 }
 0x91a   :  { %4127 = vmatpush3.bf16.msra.mxu0 %v4307_v63 }
 0x91b   :  { %4128 = vmatprep.subr.bf16.mxu0 %v6733_v57 }
 0x91e   :  { %4129 = vmatpush3.bf16.msra.mxu0 %v4308_v7 }
 0x91f   :  { %4130 = vmatprep.subr.bf16.mxu0 %v6733_v57 }
 0x922   :  { %4131 = vmatpush3.bf16.msra.mxu0 %v4309_v55 }
 0x923   :  { %4132 = vmatprep.subr.bf16.mxu0 %v6733_v57 }
 0x926   :  { %4133 = vmatpush3.bf16.msra.mxu0 %v4310_v10 }
 0x927   :  { %4134 = vmatprep.subr.bf16.mxu0 %v6733_v57 }
 0x92a   :  { %4135 = vmatpush3.bf16.msra.mxu0 %v4311_v33 }
 0x9a0   :  { %v3029_v16 = vpop.f32.mrb[96].mxu1 }
 0x9a1   :  { %v4098_v2 = vpop.f32.mrb[97].mxu1 }
 0x9a2   :  { %v3032_v13 = vpop.f32.mrb[98].mxu1 }
 0x9a3   :  { %v4099_v25 = vpop.f32.mrb[99].mxu1 }
 0x9e0   :  { %v3070_v26 = vpop.f32.mrb[76].mxu0  ;;  %v3111_v48 = vpop.f32.mrb[100].mxu1 }
 0x9e1   :  { %v4154_v52 = vadd.f32 %v3070_v26, %v5392_v15  ;;  %v3072_v5 = vpop.f32.mrb[77].mxu0  ;;  %v4118_v59 = vpop.f32.mrb[101].mxu1  ;;  %v3131_v19 = vadd.f32 %v6484_v54, %v3111_v48  ;;  %v3030_v15 = vadd.f32 %v3029_v16, %v5433_v20 }
 0x9e2   :  { %v3074_v38 = vpop.f32.mrb[78].mxu0  ;;  %v3114_v47 = vpop.f32.mrb[102].mxu1  ;;  %v4155_v53 = vadd.f32 %v3072_v5, %v5403_v30 }
 0x9e3   :  { %v3389_v32 = vmul.f32 -1.442695, %v4154_v52  ;;  %v3075_v14 = vpop.f32.mrb[79].mxu0  ;;  %v4119_v36 = vpop.f32.mrb[103].mxu1 }
 0x9e4   :  { %v3390_v57 = vmul.f32 -1.442695, %v4155_v53 }
 0x9e5   :  { %4462 = vpow2.f32 %v3389_v32 }
 0x9e6   :  { %4464 = vpow2.f32 %v3390_v57 }
 0x9ef   :  { %v4463_v42 = vpop.eup %4462 }
 0x9f0   :  { %v3121_v18 = vadd.f32 1.0, %v4463_v42  ;;  %v4465_v43 = vpop.eup %4464 }
 0x9f1   :  { %v3128_v45 = vadd.f32 1.0, %v4465_v43 }
 0x9f2   :  { %4466 = vrcp.f32 %v3121_v18 }
 0x9fc   :  { %v4467_v39 = vpop.eup %4466 }
 0x9fd   :  { %v3132_v41 = vmul.f32 %v4467_v39, %v3131_v19 }
 0x9ff   :  { %v3133_v56 = vadd.f32 %v3132_v41, %v3030_v15 }
 0xa01   :  { %4468 = vtanh.f32 %v3133_v56 }
 0xa02   :  { %4470 = vrcp.f32 %v3128_v45 }
 0xa0b   :  { %v4469_v35 = vpop.eup %4468 }
 0xa0c   :  { %v3135_v4 = vsub.f32 %v2952_v12, %v4469_v35  ;;  %v4471_v9 = vpop.eup %4470 }
 0xa0e   :  { %v3136_v30 = vmul.f32 %v4471_v9, %v3135_v4 }
 0xa10   :  { %v3137_v58 = vadd.f32 %v4469_v35, %v3136_v30 }
 0xa12   :  { %v3138_v21 = vpack.c.bf16 %v3137_v58, %v3137_v58 }
 0xa14   :  { %4137 = vmatmul.mubr.bf16.vlgmr.msra.gmra.mrb[80].mxu0 %v3138_v21 }
 0xae7   :  { %v3244_v51 = vpop.f32.mrb[80].mxu0 }
 0xae8   :  { %v3245_v20 = vadd.f32 %v3391_v37, %v3244_v51  ;;  %v4138_v23 = vpop.f32.mrb[81].mxu0 }
 0xae9   :  { %v3247_v8 = vpop.f32.mrb[82].mxu0 }
 0xaea   :  { %3250 = vst [vmem:[#allocation13] sm:$0xff] %v3245_v20  ;;  %v4139_v22 = vpop.f32.mrb[83].mxu0 }
 0xaeb   :  { %4763 = shalt.err (!%p4760_p10)
}
 0xaec   :  { %s4764_s10 = scalar_lea.hbm %s6553_s11, 128 }
 0xaed   :  { %p4765_p11 = scmp.ne.s32.totalorder %s6553_s11, %s4764_s10  ;;  %p4768_p12 = scmp.lt.u32.totalorder %s4764_s10, %s6553_s11 }
 0xaef   :  { %p4770_p13 = pnand %p4768_p12, %p4765_p11 }
 0xaf1   :  { %4773 = shalt.err (!%p4770_p13)
}
 0xaf2   :  { %3260 = dma.vmem_to_hbm [thread:$0]  %s3258_s8, 128, %s6553_s11, [#allocation4]  }
 0xaf3   :  { %4782 = dma.done.wait [#allocation4], 128  }
 0xaf4   :  { %4783 = vsyncadd [#allocation4], 4294967168 }
 0xaf5   :  { %3264 = vsyncpa [#allocation3], 1 }
 0xaf6   :  { %3265 = vsyncpa [#allocation6], 1 }
 0xaf7   :  { %3266 = vsyncpa [#allocation9], 1 }
 0xaf8   :  { %3267 = vsyncpa [#allocation12], 1 }
 0xaf9   :  { %3268 = vsyncpa [#allocation4], 1 }

</bundles_post_ra>
